<compile_context>
chip_gen: v5e
topology: v5e:2x2
jax: 0.10.0
libtpu: 0.0.40
codegen_flags: <defaults>
</compile_context>

<pallas_src>
import math

import numpy as np
import jax
import jax.numpy as jnp
from jax import lax
from jax.experimental import pallas as pl
from jax.experimental.pallas import tpu as pltpu

D_STATE = 16
D_CONV = 4
EXPAND = 2
SCAN_CHUNK = 8          # unrolled scan steps per fori_loop iteration (1 sublane tile)


# ----------------------------------------------------------------------------
# Pallas kernel: the whole MambaBlock stack, streamed over the sequence in
# T_L-step tiles.  Grid = (B, L // T_L); per-block h and conv tails are carried
# across the L axis in VMEM scratch.
# ----------------------------------------------------------------------------
def fused_mamba_kernel(x_ref, w_in, conv_w, conv_b, w_z, w_dt, b_dt, neg_a,
                       d_skip, w_out, o_ref,
                       h_sc, conv_sc, u_sc, dt_sc, res_sc, g_sc, b_sc, c_sc):
    depth = w_in.shape[0]
    d_inner = w_in.shape[2] // 2
    K = conv_w.shape[1]
    n_state = neg_a.shape[1]
    r_pad = w_dt.shape[1]
    t_l = x_ref.shape[1]
    n_chunks = t_l // SCAN_CHUNK

    @pl.when(pl.program_id(1) == 0)
    def _init():                       # new batch element: reset carried state
        h_sc[...] = jnp.zeros_like(h_sc)
        conv_sc[...] = jnp.zeros_like(conv_sc)

    cur = x_ref[0].astype(jnp.bfloat16)                           # (T_L, C)

    for d in range(depth):                                        # fused stack
        # ---- fused input projection: [x-branch | gate-branch] --------------
        proj = jnp.dot(cur, w_in[d], preferred_element_type=jnp.float32)
        u0 = proj[:, :d_inner]                                    # (T_L, d_inner)
        res_sc[...] = proj[:, d_inner:]                           # gate branch

        # ---- causal depthwise conv1d with cross-tile tail carry ------------
        # conv_sc rows [cbase+5, cbase+8) hold the previous tile's last K-1
        # rows (zeros for the first tile); u0 is stored sublane-aligned at
        # row cbase+8.
        cbase = d * (t_l + 8)
        conv_sc[pl.ds(cbase + 8, t_l), :] = u0
        cwv = conv_w[d]                                           # (K, d_inner)
        conv = conv_b[d]                                          # (1, d_inner)
        for k in range(K):
            conv = conv + (conv_sc[pl.ds(cbase + 8 - (K - 1) + k, t_l), :]
                           * cwv[k:k + 1, :])
        # save this tile's last K-1 rows of u0 as next tile's tail
        conv_sc[pl.ds(cbase + 8 - (K - 1), K - 1), :] = \
            conv_sc[pl.ds(cbase + 8 + t_l - (K - 1), K - 1), :]

        u = conv * jax.nn.sigmoid(conv)                           # SiLU
        u_sc[...] = u
        ub = u.astype(jnp.bfloat16)

        # ---- fused dt/B/C projection (one MXU op, sliced afterwards) -------
        zproj = jnp.dot(ub, w_z[d], preferred_element_type=jnp.float32)
        dt_low = zproj[:, :r_pad]
        b_sc[...] = zproj[:, r_pad:r_pad + n_state]               # (T_L, N)
        c_sc[...] = zproj[:, r_pad + n_state:]                    # (T_L, N)
        dt_sc[...] = jax.nn.softplus(
            jnp.dot(dt_low.astype(jnp.bfloat16), w_dt[d],
                    preferred_element_type=jnp.float32) + b_dt[d])

        neg_a_v = neg_a[d]                                        # (N, d_inner)
        dskip_v = d_skip[d]                                       # (1, d_inner)
        hbase = d * n_state

        # ---- chunked selective scan: dA/dBu per 8-step chunk, C-reduction,
        #      D-skip and SiLU gate folded in, aligned (8, d_inner) stores ----
        def chunk_body(c, h):
            off = pl.multiple_of(c * SCAN_CHUNK, SCAN_CHUNK)
            d_c = dt_sc[pl.ds(off, SCAN_CHUNK), :]                # (8, d_inner)
            u_c = u_sc[pl.ds(off, SCAN_CHUNK), :]
            b_c = b_sc[pl.ds(off, SCAN_CHUNK), :]                 # (8, N)
            c_c = c_sc[pl.ds(off, SCAN_CHUNK), :]
            r_c = res_sc[pl.ds(off, SCAN_CHUNK), :]
            dA = jnp.exp(d_c[:, None, :] * neg_a_v[None, :, :])   # (8, N, d_inner)
            dBu = (d_c * u_c)[:, None, :] * b_c[:, :, None]       # (8, N, d_inner)
            hs = []
            for t in range(SCAN_CHUNK):
                h = dA[t] * h + dBu[t]
                hs.append(h)
            H = jnp.stack(hs, axis=0)                             # (8, N, d_inner)
            y = jnp.sum(c_c[:, :, None] * H, axis=1) + dskip_v * u_c
            g_sc[pl.ds(off, SCAN_CHUNK), :] = y * (r_c * jax.nn.sigmoid(r_c))
            return h

        h = lax.fori_loop(0, n_chunks, chunk_body,
                          h_sc[pl.ds(hbase, n_state), :])
        h_sc[pl.ds(hbase, n_state), :] = h

        outp = jnp.dot(g_sc[...].astype(jnp.bfloat16), w_out[d],
                       preferred_element_type=jnp.float32)        # (T_L, C)
        if d == depth - 1:
            # TODO(synk): for C < 128 this is a masked store; lane-dense output
            # repacking (wrapper-side reshape) would remove it.
            o_ref[0] = outp.astype(o_ref.dtype)
        else:
            cur = outp.astype(jnp.bfloat16)


# ----------------------------------------------------------------------------
# Wrapper: weight packing, specs, pallas_call
# ----------------------------------------------------------------------------
def _w_spec(shape):
    n = len(shape)
    idx = lambda b, l, _n=n: (0,) * _n
    try:
        # Grid-invariant weights: single buffer (halves their VMEM footprint).
        return pl.BlockSpec(shape, idx, pipeline_mode=pl.Buffered(1))
    except Exception:  # pragma: no cover - fallback for jax w/o pipeline_mode
        return pl.BlockSpec(shape, idx)


def _pick_seq_tile(L, target=128):
    t = min(target, L)
    t -= t % SCAN_CHUNK
    while t >= SCAN_CHUNK and L % t:
        t -= SCAN_CHUNK
    if t < SCAN_CHUNK or L % t:
        # TODO(synk): ragged L (not a multiple of 8) would need sequence padding.
        raise ValueError("sequence length must be a multiple of 8")
    return t


def pack_block_params(params_list):
    """Stack per-block params along a leading depth axis + fuse projections."""
    r = params_list[0]["w_xdt"].shape[1]
    r_pad = -(-r // 8) * 8
    bf = lambda w: w.astype(jnp.bfloat16)

    def stk(fn):
        return jnp.stack([fn(p) for p in params_list], axis=0)

    w_in = bf(stk(lambda p: jnp.concatenate([p["w_in_x"], p["w_in_res"]], axis=1)))
    conv_w = stk(lambda p: p["conv_w"])
    conv_b = stk(lambda p: p["conv_b"])
    # Fused dt/B/C input projection; dt factor zero-padded to a multiple of 8
    # (numerically exact: padded columns/rows are zero).
    w_z = bf(stk(lambda p: jnp.concatenate(
        [jnp.pad(p["w_xdt"], ((0, 0), (0, r_pad - r))), p["w_xB"], p["w_xC"]],
        axis=1)))
    w_dt = bf(stk(lambda p: jnp.pad(p["w_dt"], ((0, r_pad - r), (0, 0)))))
    b_dt = stk(lambda p: p["b_dt"])
    neg_a = stk(lambda p: (-jnp.exp(p["A_log"])).T)               # (N, d_inner)
    d_skip = stk(lambda p: p["D"])
    w_out = bf(stk(lambda p: p["w_out"]))
    return [w_in, conv_w, conv_b, w_z, w_dt, b_dt, neg_a, d_skip, w_out]


def body_branch_apply(x_seq, params_list, *, seq_tile=128):
    """Apply the fused MambaBlock stack to x_seq of shape (B, L, C)."""
    B, L, C = x_seq.shape
    depth = len(params_list)
    d_inner = params_list[0]["w_in_x"].shape[1]
    d_state = params_list[0]["w_xB"].shape[1]
    t_l = _pick_seq_tile(L, seq_tile)
    assert L % t_l == 0 and t_l % SCAN_CHUNK == 0 and t_l >= D_CONV - 1

    weights = pack_block_params(params_list)

    return pl.pallas_call(
        fused_mamba_kernel,
        out_shape=jax.ShapeDtypeStruct((B, L, C), x_seq.dtype),
        grid_spec=pltpu.PrefetchScalarGridSpec(
            num_scalar_prefetch=0,
            grid=(B, L // t_l),
            in_specs=[pl.BlockSpec((1, t_l, C), lambda b, l: (b, l, 0))]
                     + [_w_spec(w.shape) for w in weights],
            out_specs=pl.BlockSpec((1, t_l, C), lambda b, l: (b, l, 0)),
            scratch_shapes=[
                pltpu.VMEM((depth * d_state, d_inner), jnp.float32),     # h carry
                pltpu.VMEM((depth * (t_l + 8), d_inner), jnp.float32),   # conv buf
                pltpu.VMEM((t_l, d_inner), jnp.float32),                 # u
                pltpu.VMEM((t_l, d_inner), jnp.float32),                 # delta
                pltpu.VMEM((t_l, d_inner), jnp.float32),                 # res (gate)
                pltpu.VMEM((t_l, d_inner), jnp.float32),                 # gated y
                pltpu.VMEM((t_l, d_state), jnp.float32),                 # B_t
                pltpu.VMEM((t_l, d_state), jnp.float32),                 # C_t
            ],
        ),
        compiler_params=pltpu.CompilerParams(
            # L axis carries state -> must stay "arbitrary"; B is parallel
            # (megacore-shardable when B >= 2).
            dimension_semantics=("parallel", "arbitrary"),
            # 48 MiB is safe on all of v5e/v6e/v7x; v5e/v6e could go higher.
            vmem_limit_bytes=48 * 1024 * 1024),
    )(x_seq, *weights)


def body_branch_forward(x_nchw, params_list):
    B, C, H, W = x_nchw.shape
    x_seq = jnp.transpose(x_nchw, (0, 2, 3, 1)).reshape(B, H * W, C)
    y_seq = body_branch_apply(x_seq, params_list)
    return jnp.transpose(y_seq.reshape(B, H, W, C), (0, 3, 1, 2))


# ----------------------------------------------------------------------------
# Parameter init (deterministic, synthetic)
# ----------------------------------------------------------------------------
def init_mamba_params(key, d_model):
    d_inner = EXPAND * d_model
    dt_rank = max(1, math.ceil(d_model / 16))
    ks = jax.random.split(key, 8)

    def nrm(k, shape, scale):
        return scale * jax.random.normal(k, shape, jnp.float32)

    return {
        "w_in_x": nrm(ks[0], (d_model, d_inner), 0.3),
        "w_in_res": nrm(ks[1], (d_model, d_inner), 0.3),
        "conv_w": nrm(ks[2], (D_CONV, d_inner), 0.3),
        "conv_b": jnp.zeros((1, d_inner), jnp.float32),
        "w_xdt": nrm(ks[3], (d_inner, dt_rank), 0.3),
        "w_dt": nrm(ks[4], (dt_rank, d_inner), 0.5),
        "b_dt": jnp.full((1, d_inner), 0.1, jnp.float32),
        "w_xB": nrm(ks[5], (d_inner, D_STATE), 0.3),
        "w_xC": nrm(ks[6], (d_inner, D_STATE), 0.3),
        "A_log": jnp.log(jnp.tile(
            jnp.arange(1, D_STATE + 1, dtype=jnp.float32)[None, :],
            (d_inner, 1))),
        "D": jnp.ones((1, d_inner), jnp.float32),
        "w_out": nrm(ks[7], (d_inner, d_model), 0.3),
    }


# ----------------------------------------------------------------------------
# Pure-JAX reference (mirrors the kernel's bf16 matmul operand precision so
# the comparison isolates structural / layout / chunking errors).
# ----------------------------------------------------------------------------
def _bdot(a, b):
    return jnp.dot(a.astype(jnp.bfloat16), b.astype(jnp.bfloat16),
                   preferred_element_type=jnp.float32)


def _mamba_ref_one(xs, p):
    L = xs.shape[0]
    d_inner = p["w_in_x"].shape[1]
    d_state = p["w_xB"].shape[1]
    u0 = _bdot(xs, p["w_in_x"])
    res = _bdot(xs, p["w_in_res"])
    K = p["conv_w"].shape[0]
    conv = jnp.zeros_like(u0) + p["conv_b"]
    for k in range(K):
        s = K - 1 - k
        shifted = jnp.pad(u0, ((s, 0), (0, 0)))[:L]
        conv = conv + shifted * p["conv_w"][k]
    u = jax.nn.silu(conv)
    delta = jax.nn.softplus(_bdot(_bdot(u, p["w_xdt"]), p["w_dt"]) + p["b_dt"][0])
    Bm = _bdot(u, p["w_xB"])
    Cm = _bdot(u, p["w_xC"])
    A = -jnp.exp(p["A_log"])
    dA = jnp.exp(delta[:, :, None] * A[None])
    dBu = (delta * u)[:, :, None] * Bm[:, None, :]

    def step(h, inp):
        dA_t, dBu_t, c_t, u_t = inp
        h = dA_t * h + dBu_t
        y_t = (h * c_t[None, :]).sum(-1) + p["D"][0] * u_t
        return h, y_t

    _, ys = lax.scan(step, jnp.zeros((d_inner, d_state), jnp.float32),
                     (dA, dBu, Cm, u))
    return _bdot(ys * jax.nn.silu(res), p["w_out"])


def body_branch_reference(x_nchw, params_list):
    B, C, H, W = x_nchw.shape
    x_seq = jnp.transpose(x_nchw, (0, 2, 3, 1)).reshape(B, H * W, C)
    for p in params_list:
        x_seq = jax.vmap(lambda s, _p=p: _mamba_ref_one(s, _p))(x_seq)
    return jnp.transpose(x_seq.reshape(B, H, W, C), (0, 3, 1, 2))


if __name__ == "__main__":
    key = jax.random.PRNGKey(0)
    k_x, k_p = jax.random.split(key)

    B, C, H, W = 2, 16, 16, 16                 # NCHW input, like the PyTorch module
    depth = 2                                  # L = 256 -> two 128-step tiles/batch
    x = jax.random.normal(k_x, (B, C, H, W), jnp.float32)
    pkeys = jax.random.split(k_p, depth)
    params = [init_mamba_params(pkeys[i], C) for i in range(depth)]

    out = jax.jit(body_branch_forward)(x, params)
    out = jax.block_until_ready(out)

    ref = body_branch_reference(x, params)
    np.testing.assert_allclose(np.asarray(out), np.asarray(ref),
                               rtol=1e-2, atol=1e-2)
    print("KERNEL_OK")
</pallas_src>

<mosaic_0001>
module attributes {stable_mosaic.version = 11 : i64} {
  func.func @fused_mamba_kernel(%arg0: i32, %arg1: i32, %arg2: memref<1x128x16xf32, #tpu.memory_space<vmem>>, %arg3: memref<2x16x64xbf16, #tpu.memory_space<vmem>>, %arg4: memref<2x4x32xf32, #tpu.memory_space<vmem>>, %arg5: memref<2x1x32xf32, #tpu.memory_space<vmem>>, %arg6: memref<2x32x40xbf16, #tpu.memory_space<vmem>>, %arg7: memref<2x8x32xbf16, #tpu.memory_space<vmem>>, %arg8: memref<2x1x32xf32, #tpu.memory_space<vmem>>, %arg9: memref<2x16x32xf32, #tpu.memory_space<vmem>>, %arg10: memref<2x1x32xf32, #tpu.memory_space<vmem>>, %arg11: memref<2x32x16xbf16, #tpu.memory_space<vmem>>, %arg12: memref<1x128x16xf32, #tpu.memory_space<vmem>>, %arg13: memref<32x32xf32, #tpu.memory_space<vmem>>, %arg14: memref<272x32xf32, #tpu.memory_space<vmem>>, %arg15: memref<128x32xf32, #tpu.memory_space<vmem>>, %arg16: memref<128x32xf32, #tpu.memory_space<vmem>>, %arg17: memref<128x32xf32, #tpu.memory_space<vmem>>, %arg18: memref<128x32xf32, #tpu.memory_space<vmem>>, %arg19: memref<128x16xf32, #tpu.memory_space<vmem>>, %arg20: memref<128x16xf32, #tpu.memory_space<vmem>>) attributes {dimension_semantics = [#tpu.dimension_semantics<parallel>, #tpu.dimension_semantics<arbitrary>], iteration_bounds = array<i64: 2, 2>, scalar_prefetch = 0 : i64, scratch_operands = 8 : i64, tpu.core_type = #tpu.core_type<tc>, window_params = [{transform_indices = @transform_0, window_bounds = array<i64: 1, 128, 16>}, {pipeline_mode = #tpu.pipeline_mode<synchronous>, transform_indices = @transform_1, window_bounds = array<i64: 2, 16, 64>}, {pipeline_mode = #tpu.pipeline_mode<synchronous>, transform_indices = @transform_2, window_bounds = array<i64: 2, 4, 32>}, {pipeline_mode = #tpu.pipeline_mode<synchronous>, transform_indices = @transform_3, window_bounds = array<i64: 2, 1, 32>}, {pipeline_mode = #tpu.pipeline_mode<synchronous>, transform_indices = @transform_4, window_bounds = array<i64: 2, 32, 40>}, {pipeline_mode = #tpu.pipeline_mode<synchronous>, transform_indices = @transform_5, window_bounds = array<i64: 2, 8, 32>}, {pipeline_mode = #tpu.pipeline_mode<synchronous>, transform_indices = @transform_6, window_bounds = array<i64: 2, 1, 32>}, {pipeline_mode = #tpu.pipeline_mode<synchronous>, transform_indices = @transform_7, window_bounds = array<i64: 2, 16, 32>}, {pipeline_mode = #tpu.pipeline_mode<synchronous>, transform_indices = @transform_8, window_bounds = array<i64: 2, 1, 32>}, {pipeline_mode = #tpu.pipeline_mode<synchronous>, transform_indices = @transform_9, window_bounds = array<i64: 2, 32, 16>}, {transform_indices = @transform_10, window_bounds = array<i64: 1, 128, 16>}]} {
    %c0_i32 = arith.constant 0 : i32
    %0 = arith.cmpi eq, %arg1, %c0_i32 : i32
    %1 = arith.extui %0 : i1 to i32
    %c0_i32_0 = arith.constant 0 : i32
    %2 = arith.cmpi ne, %1, %c0_i32_0 : i32
    scf.if %2 {
      %cst_127 = arith.constant 0.000000e+00 : f32
      %182 = vector.broadcast %cst_127 : f32 to vector<32x32xf32>
      %c0_128 = arith.constant 0 : index
      %c0_129 = arith.constant 0 : index
      %183 = vector.load %arg13[%c0_128, %c0_129] : memref<32x32xf32, #tpu.memory_space<vmem>>, vector<32x32xf32>
      tpu.vector_store %arg13[%c0_128, %c0_129], %182 {strides = array<i32>} : memref<32x32xf32, #tpu.memory_space<vmem>>, vector<32x32xf32>,
      %cst_130 = arith.constant 0.000000e+00 : f32
      %184 = vector.broadcast %cst_130 : f32 to vector<272x32xf32>
      %c0_131 = arith.constant 0 : index
      %c0_132 = arith.constant 0 : index
      %185 = vector.load %arg14[%c0_131, %c0_132] : memref<272x32xf32, #tpu.memory_space<vmem>>, vector<272x32xf32>
      tpu.vector_store %arg14[%c0_131, %c0_132], %184 {strides = array<i32>} : memref<272x32xf32, #tpu.memory_space<vmem>>, vector<272x32xf32>,
    } else {
    }
    %c0 = arith.constant 0 : index
    %c0_1 = arith.constant 0 : index
    %c0_2 = arith.constant 0 : index
    %3 = vector.load %arg2[%c0, %c0_1, %c0_2] : memref<1x128x16xf32, #tpu.memory_space<vmem>>, vector<1x128x16xf32>
    %4 = vector.shape_cast %3 : vector<1x128x16xf32> to vector<128x16xf32>
    %5 = arith.truncf %4 : vector<128x16xf32> to vector<128x16xbf16>
    %c0_3 = arith.constant 0 : index
    %c0_4 = arith.constant 0 : index
    %c0_5 = arith.constant 0 : index
    %6 = vector.load %arg3[%c0_3, %c0_4, %c0_5] : memref<2x16x64xbf16, #tpu.memory_space<vmem>>, vector<1x16x64xbf16>
    %7 = vector.shape_cast %6 : vector<1x16x64xbf16> to vector<16x64xbf16>
    %cst = arith.constant dense<0.000000e+00> : vector<128x64xf32>
    %8 = tpu.matmul %5, %7, %cst {dimension_numbers = #tpu.dot_dimension_numbers<[1], [0], [0], [1], [0, 0, 1, 1], [], []>} : vector<128x16xbf16>, vector<16x64xbf16>, vector<128x64xf32> -> vector<128x64xf32>
    %9 = vector.extract_strided_slice %8 {offsets = [0, 0], sizes = [128, 32], strides = [1, 1]} : vector<128x64xf32> to vector<128x32xf32>
    %10 = vector.extract_strided_slice %8 {offsets = [0, 32], sizes = [128, 32], strides = [1, 1]} : vector<128x64xf32> to vector<128x32xf32>
    %c0_6 = arith.constant 0 : index
    %c0_7 = arith.constant 0 : index
    %11 = vector.load %arg17[%c0_6, %c0_7] : memref<128x32xf32, #tpu.memory_space<vmem>>, vector<128x32xf32>
    tpu.vector_store %arg17[%c0_6, %c0_7], %10 {strides = array<i32>} : memref<128x32xf32, #tpu.memory_space<vmem>>, vector<128x32xf32>,
    %c8 = arith.constant 8 : index
    %c0_8 = arith.constant 0 : index
    %12 = vector.load %arg14[%c8, %c0_8] : memref<272x32xf32, #tpu.memory_space<vmem>>, vector<128x32xf32>
    tpu.vector_store %arg14[%c8, %c0_8], %9 {strides = array<i32>} : memref<272x32xf32, #tpu.memory_space<vmem>>, vector<128x32xf32>,
    %c0_9 = arith.constant 0 : index
    %c0_10 = arith.constant 0 : index
    %c0_11 = arith.constant 0 : index
    %13 = vector.load %arg4[%c0_9, %c0_10, %c0_11] : memref<2x4x32xf32, #tpu.memory_space<vmem>>, vector<1x4x32xf32>
    %14 = vector.shape_cast %13 : vector<1x4x32xf32> to vector<4x32xf32>
    %c0_12 = arith.constant 0 : index
    %c0_13 = arith.constant 0 : index
    %c0_14 = arith.constant 0 : index
    %15 = vector.load %arg5[%c0_12, %c0_13, %c0_14] : memref<2x1x32xf32, #tpu.memory_space<vmem>>, vector<1x1x32xf32>
    %16 = vector.shape_cast %15 : vector<1x1x32xf32> to vector<1x32xf32>
    %c5 = arith.constant 5 : index
    %c0_15 = arith.constant 0 : index
    %17 = vector.load %arg14[%c5, %c0_15] : memref<272x32xf32, #tpu.memory_space<vmem>>, vector<128x32xf32>
    %18 = vector.extract_strided_slice %14 {offsets = [0, 0], sizes = [1, 32], strides = [1, 1]} : vector<4x32xf32> to vector<1x32xf32>
    %19 = vector.broadcast %18 : vector<1x32xf32> to vector<128x32xf32>
    %20 = arith.mulf %17, %19 : vector<128x32xf32>
    %21 = vector.broadcast %16 : vector<1x32xf32> to vector<128x32xf32>
    %22 = arith.addf %21, %20 : vector<128x32xf32>
    %c6 = arith.constant 6 : index
    %c0_16 = arith.constant 0 : index
    %23 = vector.load %arg14[%c6, %c0_16] : memref<272x32xf32, #tpu.memory_space<vmem>>, vector<128x32xf32>
    %24 = vector.extract_strided_slice %14 {offsets = [1, 0], sizes = [1, 32], strides = [1, 1]} : vector<4x32xf32> to vector<1x32xf32>
    %25 = vector.broadcast %24 : vector<1x32xf32> to vector<128x32xf32>
    %26 = arith.mulf %23, %25 : vector<128x32xf32>
    %27 = arith.addf %22, %26 : vector<128x32xf32>
    %c7 = arith.constant 7 : index
    %c0_17 = arith.constant 0 : index
    %28 = vector.load %arg14[%c7, %c0_17] : memref<272x32xf32, #tpu.memory_space<vmem>>, vector<128x32xf32>
    %29 = vector.extract_strided_slice %14 {offsets = [2, 0], sizes = [1, 32], strides = [1, 1]} : vector<4x32xf32> to vector<1x32xf32>
    %30 = vector.broadcast %29 : vector<1x32xf32> to vector<128x32xf32>
    %31 = arith.mulf %28, %30 : vector<128x32xf32>
    %32 = arith.addf %27, %31 : vector<128x32xf32>
    %c8_18 = arith.constant 8 : index
    %c0_19 = arith.constant 0 : index
    %33 = vector.load %arg14[%c8_18, %c0_19] : memref<272x32xf32, #tpu.memory_space<vmem>>, vector<128x32xf32>
    %34 = vector.extract_strided_slice %14 {offsets = [3, 0], sizes = [1, 32], strides = [1, 1]} : vector<4x32xf32> to vector<1x32xf32>
    %35 = vector.broadcast %34 : vector<1x32xf32> to vector<128x32xf32>
    %36 = arith.mulf %33, %35 : vector<128x32xf32>
    %37 = arith.addf %32, %36 : vector<128x32xf32>
    %c133 = arith.constant 133 : index
    %c0_20 = arith.constant 0 : index
    %38 = vector.load %arg14[%c133, %c0_20] : memref<272x32xf32, #tpu.memory_space<vmem>>, vector<3x32xf32>
    %c5_21 = arith.constant 5 : index
    %c0_22 = arith.constant 0 : index
    %39 = vector.load %arg14[%c5_21, %c0_22] : memref<272x32xf32, #tpu.memory_space<vmem>>, vector<3x32xf32>
    tpu.vector_store %arg14[%c5_21, %c0_22], %38 {strides = array<i32>} : memref<272x32xf32, #tpu.memory_space<vmem>>, vector<3x32xf32>,
    %40 = arith.negf %37 : vector<128x32xf32>
    %41 = math.exp %40 : vector<128x32xf32>
    %cst_23 = arith.constant 1.000000e+00 : f32
    %42 = vector.broadcast %cst_23 : f32 to vector<128x32xf32>
    %43 = arith.addf %42, %41 : vector<128x32xf32>
    %44 = arith.divf %42, %43 : vector<128x32xf32>
    %45 = arith.mulf %37, %44 : vector<128x32xf32>
    %c0_24 = arith.constant 0 : index
    %c0_25 = arith.constant 0 : index
    %46 = vector.load %arg15[%c0_24, %c0_25] : memref<128x32xf32, #tpu.memory_space<vmem>>, vector<128x32xf32>
    tpu.vector_store %arg15[%c0_24, %c0_25], %45 {strides = array<i32>} : memref<128x32xf32, #tpu.memory_space<vmem>>, vector<128x32xf32>,
    %47 = arith.truncf %45 : vector<128x32xf32> to vector<128x32xbf16>
    %c0_26 = arith.constant 0 : index
    %c0_27 = arith.constant 0 : index
    %c0_28 = arith.constant 0 : index
    %48 = vector.load %arg6[%c0_26, %c0_27, %c0_28] : memref<2x32x40xbf16, #tpu.memory_space<vmem>>, vector<1x32x40xbf16>
    %49 = vector.shape_cast %48 : vector<1x32x40xbf16> to vector<32x40xbf16>
    %cst_29 = arith.constant dense<0.000000e+00> : vector<128x40xf32>
    %50 = tpu.matmul %47, %49, %cst_29 {dimension_numbers = #tpu.dot_dimension_numbers<[1], [0], [0], [1], [0, 0, 1, 1], [], []>} : vector<128x32xbf16>, vector<32x40xbf16>, vector<128x40xf32> -> vector<128x40xf32>
    %51 = vector.extract_strided_slice %50 {offsets = [0, 0], sizes = [128, 8], strides = [1, 1]} : vector<128x40xf32> to vector<128x8xf32>
    %52 = vector.extract_strided_slice %50 {offsets = [0, 8], sizes = [128, 16], strides = [1, 1]} : vector<128x40xf32> to vector<128x16xf32>
    %c0_30 = arith.constant 0 : index
    %c0_31 = arith.constant 0 : index
    %53 = vector.load %arg19[%c0_30, %c0_31] : memref<128x16xf32, #tpu.memory_space<vmem>>, vector<128x16xf32>
    tpu.vector_store %arg19[%c0_30, %c0_31], %52 {strides = array<i32>} : memref<128x16xf32, #tpu.memory_space<vmem>>, vector<128x16xf32>,
    %54 = vector.extract_strided_slice %50 {offsets = [0, 24], sizes = [128, 16], strides = [1, 1]} : vector<128x40xf32> to vector<128x16xf32>
    %c0_32 = arith.constant 0 : index
    %c0_33 = arith.constant 0 : index
    %55 = vector.load %arg20[%c0_32, %c0_33] : memref<128x16xf32, #tpu.memory_space<vmem>>, vector<128x16xf32>
    tpu.vector_store %arg20[%c0_32, %c0_33], %54 {strides = array<i32>} : memref<128x16xf32, #tpu.memory_space<vmem>>, vector<128x16xf32>,
    %56 = arith.truncf %51 : vector<128x8xf32> to vector<128x8xbf16>
    %c0_34 = arith.constant 0 : index
    %c0_35 = arith.constant 0 : index
    %c0_36 = arith.constant 0 : index
    %57 = vector.load %arg7[%c0_34, %c0_35, %c0_36] : memref<2x8x32xbf16, #tpu.memory_space<vmem>>, vector<1x8x32xbf16>
    %58 = vector.shape_cast %57 : vector<1x8x32xbf16> to vector<8x32xbf16>
    %cst_37 = arith.constant dense<0.000000e+00> : vector<128x32xf32>
    %59 = tpu.matmul %56, %58, %cst_37 {dimension_numbers = #tpu.dot_dimension_numbers<[1], [0], [0], [1], [0, 0, 1, 1], [], []>} : vector<128x8xbf16>, vector<8x32xbf16>, vector<128x32xf32> -> vector<128x32xf32>
    %c0_38 = arith.constant 0 : index
    %c0_39 = arith.constant 0 : index
    %c0_40 = arith.constant 0 : index
    %60 = vector.load %arg8[%c0_38, %c0_39, %c0_40] : memref<2x1x32xf32, #tpu.memory_space<vmem>>, vector<1x1x32xf32>
    %61 = vector.shape_cast %60 : vector<1x1x32xf32> to vector<1x32xf32>
    %62 = vector.broadcast %61 : vector<1x32xf32> to vector<128x32xf32>
    %63 = arith.addf %59, %62 : vector<128x32xf32>
    %cst_41 = arith.constant 0.000000e+00 : f32
    %64 = vector.broadcast %cst_41 : f32 to vector<128x32xf32>
    %65 = arith.maximumf %63, %64 : vector<128x32xf32>
    %66 = vector.broadcast %cst_41 : f32 to vector<128x32xf32>
    %67 = arith.subf %63, %66 : vector<128x32xf32>
    %68 = arith.cmpf one, %67, %67 : vector<128x32xf32>
    %69 = vector.broadcast %cst_41 : f32 to vector<128x32xf32>
    %70 = arith.addf %63, %69 : vector<128x32xf32>
    %71 = math.absf %67 : vector<128x32xf32>
    %cst_42 = arith.constant 0.000000e+00 : f32
    %72 = vector.broadcast %cst_42 : f32 to vector<128x32xf32>
    %73 = arith.subf %72, %71 : vector<128x32xf32>
    %74 = math.exp %73 : vector<128x32xf32>
    %75 = math.log1p %74 : vector<128x32xf32>
    %76 = arith.addf %65, %75 : vector<128x32xf32>
    %77 = arith.select %68, %70, %76 : vector<128x32xi1>, vector<128x32xf32>
    %c0_43 = arith.constant 0 : index
    %c0_44 = arith.constant 0 : index
    %78 = vector.load %arg16[%c0_43, %c0_44] : memref<128x32xf32, #tpu.memory_space<vmem>>, vector<128x32xf32>
    tpu.vector_store %arg16[%c0_43, %c0_44], %77 {strides = array<i32>} : memref<128x32xf32, #tpu.memory_space<vmem>>, vector<128x32xf32>,
    %c0_45 = arith.constant 0 : index
    %c0_46 = arith.constant 0 : index
    %c0_47 = arith.constant 0 : index
    %79 = vector.load %arg9[%c0_45, %c0_46, %c0_47] : memref<2x16x32xf32, #tpu.memory_space<vmem>>, vector<1x16x32xf32>
    %80 = vector.shape_cast %79 : vector<1x16x32xf32> to vector<16x32xf32>
    %c0_48 = arith.constant 0 : index
    %c0_49 = arith.constant 0 : index
    %c0_50 = arith.constant 0 : index
    %81 = vector.load %arg10[%c0_48, %c0_49, %c0_50] : memref<2x1x32xf32, #tpu.memory_space<vmem>>, vector<1x1x32xf32>
    %82 = vector.shape_cast %81 : vector<1x1x32xf32> to vector<1x32xf32>
    %c0_51 = arith.constant 0 : index
    %c0_52 = arith.constant 0 : index
    %83 = vector.load %arg13[%c0_51, %c0_52] : memref<32x32xf32, #tpu.memory_space<vmem>>, vector<16x32xf32>
    %c0_i32_53 = arith.constant 0 : i32
    %c16_i32 = arith.constant 16 : i32
    %84 = arith.addi %c0_i32_53, %c16_i32 : i32
    %c1_i32 = arith.constant 1 : i32
    %85 = scf.for %arg21 = %c0_i32_53 to %84 step %c1_i32 iter_args(%arg22 = %83) -> (vector<16x32xf32>)  : i32 {
      %c8_i32 = arith.constant 8 : i32
      %182 = arith.muli %arg21, %c8_i32 : i32
      %183 = tpu.assume_multiple %182, 8 : i32
      %184 = arith.index_cast %183 : i32 to index
      %c0_127 = arith.constant 0 : index
      %185 = vector.load %arg16[%184, %c0_127] : memref<128x32xf32, #tpu.memory_space<vmem>>, vector<8x32xf32>
      %186 = arith.index_cast %183 : i32 to index
      %c0_128 = arith.constant 0 : index
      %187 = vector.load %arg15[%186, %c0_128] : memref<128x32xf32, #tpu.memory_space<vmem>>, vector<8x32xf32>
      %188 = arith.index_cast %183 : i32 to index
      %c0_129 = arith.constant 0 : index
      %189 = vector.load %arg19[%188, %c0_129] : memref<128x16xf32, #tpu.memory_space<vmem>>, vector<8x16xf32>
      %190 = arith.index_cast %183 : i32 to index
      %c0_130 = arith.constant 0 : index
      %191 = vector.load %arg20[%190, %c0_130] : memref<128x16xf32, #tpu.memory_space<vmem>>, vector<8x16xf32>
      %192 = arith.index_cast %183 : i32 to index
      %c0_131 = arith.constant 0 : index
      %193 = vector.load %arg17[%192, %c0_131] : memref<128x32xf32, #tpu.memory_space<vmem>>, vector<8x32xf32>
      %194 = vector.shape_cast %185 : vector<8x32xf32> to vector<8x1x32xf32>
      %195 = vector.shape_cast %80 : vector<16x32xf32> to vector<1x16x32xf32>
      %196 = vector.broadcast %194 : vector<8x1x32xf32> to vector<8x16x32xf32>
      %197 = vector.broadcast %195 : vector<1x16x32xf32> to vector<8x16x32xf32>
      %198 = arith.mulf %196, %197 : vector<8x16x32xf32>
      %199 = math.exp %198 : vector<8x16x32xf32>
      %200 = arith.mulf %185, %187 : vector<8x32xf32>
      %201 = vector.shape_cast %200 : vector<8x32xf32> to vector<8x1x32xf32>
      %202 = vector.shape_cast %189 : vector<8x16xf32> to vector<8x16x1xf32>
      %203 = vector.broadcast %201 : vector<8x1x32xf32> to vector<8x16x32xf32>
      %204 = vector.broadcast %202 : vector<8x16x1xf32> to vector<8x16x32xf32>
      %205 = arith.mulf %203, %204 : vector<8x16x32xf32>
      %206 = vector.extract_strided_slice %199 {offsets = [0, 0, 0], sizes = [1, 16, 32], strides = [1, 1, 1]} : vector<8x16x32xf32> to vector<1x16x32xf32>
      %207 = vector.shape_cast %206 : vector<1x16x32xf32> to vector<16x32xf32>
      %208 = arith.mulf %207, %arg22 : vector<16x32xf32>
      %209 = vector.extract_strided_slice %205 {offsets = [0, 0, 0], sizes = [1, 16, 32], strides = [1, 1, 1]} : vector<8x16x32xf32> to vector<1x16x32xf32>
      %210 = vector.shape_cast %209 : vector<1x16x32xf32> to vector<16x32xf32>
      %211 = arith.addf %208, %210 : vector<16x32xf32>
      %212 = vector.extract_strided_slice %199 {offsets = [1, 0, 0], sizes = [1, 16, 32], strides = [1, 1, 1]} : vector<8x16x32xf32> to vector<1x16x32xf32>
      %213 = vector.shape_cast %212 : vector<1x16x32xf32> to vector<16x32xf32>
      %214 = arith.mulf %213, %211 : vector<16x32xf32>
      %215 = vector.extract_strided_slice %205 {offsets = [1, 0, 0], sizes = [1, 16, 32], strides = [1, 1, 1]} : vector<8x16x32xf32> to vector<1x16x32xf32>
      %216 = vector.shape_cast %215 : vector<1x16x32xf32> to vector<16x32xf32>
      %217 = arith.addf %214, %216 : vector<16x32xf32>
      %218 = vector.extract_strided_slice %199 {offsets = [2, 0, 0], sizes = [1, 16, 32], strides = [1, 1, 1]} : vector<8x16x32xf32> to vector<1x16x32xf32>
      %219 = vector.shape_cast %218 : vector<1x16x32xf32> to vector<16x32xf32>
      %220 = arith.mulf %219, %217 : vector<16x32xf32>
      %221 = vector.extract_strided_slice %205 {offsets = [2, 0, 0], sizes = [1, 16, 32], strides = [1, 1, 1]} : vector<8x16x32xf32> to vector<1x16x32xf32>
      %222 = vector.shape_cast %221 : vector<1x16x32xf32> to vector<16x32xf32>
      %223 = arith.addf %220, %222 : vector<16x32xf32>
      %224 = vector.extract_strided_slice %199 {offsets = [3, 0, 0], sizes = [1, 16, 32], strides = [1, 1, 1]} : vector<8x16x32xf32> to vector<1x16x32xf32>
      %225 = vector.shape_cast %224 : vector<1x16x32xf32> to vector<16x32xf32>
      %226 = arith.mulf %225, %223 : vector<16x32xf32>
      %227 = vector.extract_strided_slice %205 {offsets = [3, 0, 0], sizes = [1, 16, 32], strides = [1, 1, 1]} : vector<8x16x32xf32> to vector<1x16x32xf32>
      %228 = vector.shape_cast %227 : vector<1x16x32xf32> to vector<16x32xf32>
      %229 = arith.addf %226, %228 : vector<16x32xf32>
      %230 = vector.extract_strided_slice %199 {offsets = [4, 0, 0], sizes = [1, 16, 32], strides = [1, 1, 1]} : vector<8x16x32xf32> to vector<1x16x32xf32>
      %231 = vector.shape_cast %230 : vector<1x16x32xf32> to vector<16x32xf32>
      %232 = arith.mulf %231, %229 : vector<16x32xf32>
      %233 = vector.extract_strided_slice %205 {offsets = [4, 0, 0], sizes = [1, 16, 32], strides = [1, 1, 1]} : vector<8x16x32xf32> to vector<1x16x32xf32>
      %234 = vector.shape_cast %233 : vector<1x16x32xf32> to vector<16x32xf32>
      %235 = arith.addf %232, %234 : vector<16x32xf32>
      %236 = vector.extract_strided_slice %199 {offsets = [5, 0, 0], sizes = [1, 16, 32], strides = [1, 1, 1]} : vector<8x16x32xf32> to vector<1x16x32xf32>
      %237 = vector.shape_cast %236 : vector<1x16x32xf32> to vector<16x32xf32>
      %238 = arith.mulf %237, %235 : vector<16x32xf32>
      %239 = vector.extract_strided_slice %205 {offsets = [5, 0, 0], sizes = [1, 16, 32], strides = [1, 1, 1]} : vector<8x16x32xf32> to vector<1x16x32xf32>
      %240 = vector.shape_cast %239 : vector<1x16x32xf32> to vector<16x32xf32>
      %241 = arith.addf %238, %240 : vector<16x32xf32>
      %242 = vector.extract_strided_slice %199 {offsets = [6, 0, 0], sizes = [1, 16, 32], strides = [1, 1, 1]} : vector<8x16x32xf32> to vector<1x16x32xf32>
      %243 = vector.shape_cast %242 : vector<1x16x32xf32> to vector<16x32xf32>
      %244 = arith.mulf %243, %241 : vector<16x32xf32>
      %245 = vector.extract_strided_slice %205 {offsets = [6, 0, 0], sizes = [1, 16, 32], strides = [1, 1, 1]} : vector<8x16x32xf32> to vector<1x16x32xf32>
      %246 = vector.shape_cast %245 : vector<1x16x32xf32> to vector<16x32xf32>
      %247 = arith.addf %244, %246 : vector<16x32xf32>
      %248 = vector.extract_strided_slice %199 {offsets = [7, 0, 0], sizes = [1, 16, 32], strides = [1, 1, 1]} : vector<8x16x32xf32> to vector<1x16x32xf32>
      %249 = vector.shape_cast %248 : vector<1x16x32xf32> to vector<16x32xf32>
      %250 = arith.mulf %249, %247 : vector<16x32xf32>
      %251 = vector.extract_strided_slice %205 {offsets = [7, 0, 0], sizes = [1, 16, 32], strides = [1, 1, 1]} : vector<8x16x32xf32> to vector<1x16x32xf32>
      %252 = vector.shape_cast %251 : vector<1x16x32xf32> to vector<16x32xf32>
      %253 = arith.addf %250, %252 : vector<16x32xf32>
      %254 = vector.shape_cast %211 : vector<16x32xf32> to vector<1x16x32xf32>
      %255 = vector.shape_cast %217 : vector<16x32xf32> to vector<1x16x32xf32>
      %256 = vector.shape_cast %223 : vector<16x32xf32> to vector<1x16x32xf32>
      %257 = vector.shape_cast %229 : vector<16x32xf32> to vector<1x16x32xf32>
      %258 = vector.shape_cast %235 : vector<16x32xf32> to vector<1x16x32xf32>
      %259 = vector.shape_cast %241 : vector<16x32xf32> to vector<1x16x32xf32>
      %260 = vector.shape_cast %247 : vector<16x32xf32> to vector<1x16x32xf32>
      %261 = vector.shape_cast %253 : vector<16x32xf32> to vector<1x16x32xf32>
      %262 = tpu.concatenate %254, %255, %256, %257, %258, %259, %260, %261 in 0 : vector<1x16x32xf32>, vector<1x16x32xf32>, vector<1x16x32xf32>, vector<1x16x32xf32>, vector<1x16x32xf32>, vector<1x16x32xf32>, vector<1x16x32xf32>, vector<1x16x32xf32> -> vector<8x16x32xf32>
      %263 = vector.shape_cast %191 : vector<8x16xf32> to vector<8x16x1xf32>
      %264 = vector.broadcast %263 : vector<8x16x1xf32> to vector<8x16x32xf32>
      %265 = arith.mulf %264, %262 : vector<8x16x32xf32>
      %cst_132 = arith.constant dense<0.000000e+00> : vector<8x32xf32>
      %266 = vector.multi_reduction <add>, %265, %cst_132 [1] : vector<8x16x32xf32> to vector<8x32xf32>
      %267 = vector.broadcast %82 : vector<1x32xf32> to vector<8x32xf32>
      %268 = arith.mulf %267, %187 : vector<8x32xf32>
      %269 = arith.addf %266, %268 : vector<8x32xf32>
      %270 = arith.negf %193 : vector<8x32xf32>
      %271 = math.exp %270 : vector<8x32xf32>
      %cst_133 = arith.constant 1.000000e+00 : f32
      %272 = vector.broadcast %cst_133 : f32 to vector<8x32xf32>
      %273 = arith.addf %272, %271 : vector<8x32xf32>
      %274 = arith.divf %272, %273 : vector<8x32xf32>
      %275 = arith.mulf %193, %274 : vector<8x32xf32>
      %276 = arith.mulf %269, %275 : vector<8x32xf32>
      %277 = arith.index_cast %183 : i32 to index
      %c0_134 = arith.constant 0 : index
      %278 = vector.load %arg18[%277, %c0_134] : memref<128x32xf32, #tpu.memory_space<vmem>>, vector<8x32xf32>
      tpu.vector_store %arg18[%277, %c0_134], %276 {strides = array<i32>} : memref<128x32xf32, #tpu.memory_space<vmem>>, vector<8x32xf32>,
      scf.yield %253 : vector<16x32xf32>
    }
    %c16_i32_54 = arith.constant 16 : i32
    %c0_55 = arith.constant 0 : index
    %c0_56 = arith.constant 0 : index
    %86 = vector.load %arg13[%c0_55, %c0_56] : memref<32x32xf32, #tpu.memory_space<vmem>>, vector<16x32xf32>
    tpu.vector_store %arg13[%c0_55, %c0_56], %85 {strides = array<i32>} : memref<32x32xf32, #tpu.memory_space<vmem>>, vector<16x32xf32>,
    %c0_57 = arith.constant 0 : index
    %c0_58 = arith.constant 0 : index
    %87 = vector.load %arg18[%c0_57, %c0_58] : memref<128x32xf32, #tpu.memory_space<vmem>>, vector<128x32xf32>
    %88 = arith.truncf %87 : vector<128x32xf32> to vector<128x32xbf16>
    %c0_59 = arith.constant 0 : index
    %c0_60 = arith.constant 0 : index
    %c0_61 = arith.constant 0 : index
    %89 = vector.load %arg11[%c0_59, %c0_60, %c0_61] : memref<2x32x16xbf16, #tpu.memory_space<vmem>>, vector<1x32x16xbf16>
    %90 = vector.shape_cast %89 : vector<1x32x16xbf16> to vector<32x16xbf16>
    %cst_62 = arith.constant dense<0.000000e+00> : vector<128x16xf32>
    %91 = tpu.matmul %88, %90, %cst_62 {dimension_numbers = #tpu.dot_dimension_numbers<[1], [0], [0], [1], [0, 0, 1, 1], [], []>} : vector<128x32xbf16>, vector<32x16xbf16>, vector<128x16xf32> -> vector<128x16xf32>
    %92 = arith.truncf %91 : vector<128x16xf32> to vector<128x16xbf16>
    %c1 = arith.constant 1 : index
    %c0_63 = arith.constant 0 : index
    %c0_64 = arith.constant 0 : index
    %93 = vector.load %arg3[%c1, %c0_63, %c0_64] : memref<2x16x64xbf16, #tpu.memory_space<vmem>>, vector<1x16x64xbf16>
    %94 = vector.shape_cast %93 : vector<1x16x64xbf16> to vector<16x64xbf16>
    %cst_65 = arith.constant dense<0.000000e+00> : vector<128x64xf32>
    %95 = tpu.matmul %92, %94, %cst_65 {dimension_numbers = #tpu.dot_dimension_numbers<[1], [0], [0], [1], [0, 0, 1, 1], [], []>} : vector<128x16xbf16>, vector<16x64xbf16>, vector<128x64xf32> -> vector<128x64xf32>
    %96 = vector.extract_strided_slice %95 {offsets = [0, 0], sizes = [128, 32], strides = [1, 1]} : vector<128x64xf32> to vector<128x32xf32>
    %97 = vector.extract_strided_slice %95 {offsets = [0, 32], sizes = [128, 32], strides = [1, 1]} : vector<128x64xf32> to vector<128x32xf32>
    %c0_66 = arith.constant 0 : index
    %c0_67 = arith.constant 0 : index
    %98 = vector.load %arg17[%c0_66, %c0_67] : memref<128x32xf32, #tpu.memory_space<vmem>>, vector<128x32xf32>
    tpu.vector_store %arg17[%c0_66, %c0_67], %97 {strides = array<i32>} : memref<128x32xf32, #tpu.memory_space<vmem>>, vector<128x32xf32>,
    %c144 = arith.constant 144 : index
    %c0_68 = arith.constant 0 : index
    %99 = vector.load %arg14[%c144, %c0_68] : memref<272x32xf32, #tpu.memory_space<vmem>>, vector<128x32xf32>
    tpu.vector_store %arg14[%c144, %c0_68], %96 {strides = array<i32>} : memref<272x32xf32, #tpu.memory_space<vmem>>, vector<128x32xf32>,
    %c1_69 = arith.constant 1 : index
    %c0_70 = arith.constant 0 : index
    %c0_71 = arith.constant 0 : index
    %100 = vector.load %arg4[%c1_69, %c0_70, %c0_71] : memref<2x4x32xf32, #tpu.memory_space<vmem>>, vector<1x4x32xf32>
    %101 = vector.shape_cast %100 : vector<1x4x32xf32> to vector<4x32xf32>
    %c1_72 = arith.constant 1 : index
    %c0_73 = arith.constant 0 : index
    %c0_74 = arith.constant 0 : index
    %102 = vector.load %arg5[%c1_72, %c0_73, %c0_74] : memref<2x1x32xf32, #tpu.memory_space<vmem>>, vector<1x1x32xf32>
    %103 = vector.shape_cast %102 : vector<1x1x32xf32> to vector<1x32xf32>
    %c141 = arith.constant 141 : index
    %c0_75 = arith.constant 0 : index
    %104 = vector.load %arg14[%c141, %c0_75] : memref<272x32xf32, #tpu.memory_space<vmem>>, vector<128x32xf32>
    %105 = vector.extract_strided_slice %101 {offsets = [0, 0], sizes = [1, 32], strides = [1, 1]} : vector<4x32xf32> to vector<1x32xf32>
    %106 = vector.broadcast %105 : vector<1x32xf32> to vector<128x32xf32>
    %107 = arith.mulf %104, %106 : vector<128x32xf32>
    %108 = vector.broadcast %103 : vector<1x32xf32> to vector<128x32xf32>
    %109 = arith.addf %108, %107 : vector<128x32xf32>
    %c142 = arith.constant 142 : index
    %c0_76 = arith.constant 0 : index
    %110 = vector.load %arg14[%c142, %c0_76] : memref<272x32xf32, #tpu.memory_space<vmem>>, vector<128x32xf32>
    %111 = vector.extract_strided_slice %101 {offsets = [1, 0], sizes = [1, 32], strides = [1, 1]} : vector<4x32xf32> to vector<1x32xf32>
    %112 = vector.broadcast %111 : vector<1x32xf32> to vector<128x32xf32>
    %113 = arith.mulf %110, %112 : vector<128x32xf32>
    %114 = arith.addf %109, %113 : vector<128x32xf32>
    %c143 = arith.constant 143 : index
    %c0_77 = arith.constant 0 : index
    %115 = vector.load %arg14[%c143, %c0_77] : memref<272x32xf32, #tpu.memory_space<vmem>>, vector<128x32xf32>
    %116 = vector.extract_strided_slice %101 {offsets = [2, 0], sizes = [1, 32], strides = [1, 1]} : vector<4x32xf32> to vector<1x32xf32>
    %117 = vector.broadcast %116 : vector<1x32xf32> to vector<128x32xf32>
    %118 = arith.mulf %115, %117 : vector<128x32xf32>
    %119 = arith.addf %114, %118 : vector<128x32xf32>
    %c144_78 = arith.constant 144 : index
    %c0_79 = arith.constant 0 : index
    %120 = vector.load %arg14[%c144_78, %c0_79] : memref<272x32xf32, #tpu.memory_space<vmem>>, vector<128x32xf32>
    %121 = vector.extract_strided_slice %101 {offsets = [3, 0], sizes = [1, 32], strides = [1, 1]} : vector<4x32xf32> to vector<1x32xf32>
    %122 = vector.broadcast %121 : vector<1x32xf32> to vector<128x32xf32>
    %123 = arith.mulf %120, %122 : vector<128x32xf32>
    %124 = arith.addf %119, %123 : vector<128x32xf32>
    %c269 = arith.constant 269 : index
    %c0_80 = arith.constant 0 : index
    %125 = vector.load %arg14[%c269, %c0_80] : memref<272x32xf32, #tpu.memory_space<vmem>>, vector<3x32xf32>
    %c141_81 = arith.constant 141 : index
    %c0_82 = arith.constant 0 : index
    %126 = vector.load %arg14[%c141_81, %c0_82] : memref<272x32xf32, #tpu.memory_space<vmem>>, vector<3x32xf32>
    tpu.vector_store %arg14[%c141_81, %c0_82], %125 {strides = array<i32>} : memref<272x32xf32, #tpu.memory_space<vmem>>, vector<3x32xf32>,
    %127 = arith.negf %124 : vector<128x32xf32>
    %128 = math.exp %127 : vector<128x32xf32>
    %cst_83 = arith.constant 1.000000e+00 : f32
    %129 = vector.broadcast %cst_83 : f32 to vector<128x32xf32>
    %130 = arith.addf %129, %128 : vector<128x32xf32>
    %131 = arith.divf %129, %130 : vector<128x32xf32>
    %132 = arith.mulf %124, %131 : vector<128x32xf32>
    %c0_84 = arith.constant 0 : index
    %c0_85 = arith.constant 0 : index
    %133 = vector.load %arg15[%c0_84, %c0_85] : memref<128x32xf32, #tpu.memory_space<vmem>>, vector<128x32xf32>
    tpu.vector_store %arg15[%c0_84, %c0_85], %132 {strides = array<i32>} : memref<128x32xf32, #tpu.memory_space<vmem>>, vector<128x32xf32>,
    %134 = arith.truncf %132 : vector<128x32xf32> to vector<128x32xbf16>
    %c1_86 = arith.constant 1 : index
    %c0_87 = arith.constant 0 : index
    %c0_88 = arith.constant 0 : index
    %135 = vector.load %arg6[%c1_86, %c0_87, %c0_88] : memref<2x32x40xbf16, #tpu.memory_space<vmem>>, vector<1x32x40xbf16>
    %136 = vector.shape_cast %135 : vector<1x32x40xbf16> to vector<32x40xbf16>
    %cst_89 = arith.constant dense<0.000000e+00> : vector<128x40xf32>
    %137 = tpu.matmul %134, %136, %cst_89 {dimension_numbers = #tpu.dot_dimension_numbers<[1], [0], [0], [1], [0, 0, 1, 1], [], []>} : vector<128x32xbf16>, vector<32x40xbf16>, vector<128x40xf32> -> vector<128x40xf32>
    %138 = vector.extract_strided_slice %137 {offsets = [0, 0], sizes = [128, 8], strides = [1, 1]} : vector<128x40xf32> to vector<128x8xf32>
    %139 = vector.extract_strided_slice %137 {offsets = [0, 8], sizes = [128, 16], strides = [1, 1]} : vector<128x40xf32> to vector<128x16xf32>
    %c0_90 = arith.constant 0 : index
    %c0_91 = arith.constant 0 : index
    %140 = vector.load %arg19[%c0_90, %c0_91] : memref<128x16xf32, #tpu.memory_space<vmem>>, vector<128x16xf32>
    tpu.vector_store %arg19[%c0_90, %c0_91], %139 {strides = array<i32>} : memref<128x16xf32, #tpu.memory_space<vmem>>, vector<128x16xf32>,
    %141 = vector.extract_strided_slice %137 {offsets = [0, 24], sizes = [128, 16], strides = [1, 1]} : vector<128x40xf32> to vector<128x16xf32>
    %c0_92 = arith.constant 0 : index
    %c0_93 = arith.constant 0 : index
    %142 = vector.load %arg20[%c0_92, %c0_93] : memref<128x16xf32, #tpu.memory_space<vmem>>, vector<128x16xf32>
    tpu.vector_store %arg20[%c0_92, %c0_93], %141 {strides = array<i32>} : memref<128x16xf32, #tpu.memory_space<vmem>>, vector<128x16xf32>,
    %143 = arith.truncf %138 : vector<128x8xf32> to vector<128x8xbf16>
    %c1_94 = arith.constant 1 : index
    %c0_95 = arith.constant 0 : index
    %c0_96 = arith.constant 0 : index
    %144 = vector.load %arg7[%c1_94, %c0_95, %c0_96] : memref<2x8x32xbf16, #tpu.memory_space<vmem>>, vector<1x8x32xbf16>
    %145 = vector.shape_cast %144 : vector<1x8x32xbf16> to vector<8x32xbf16>
    %cst_97 = arith.constant dense<0.000000e+00> : vector<128x32xf32>
    %146 = tpu.matmul %143, %145, %cst_97 {dimension_numbers = #tpu.dot_dimension_numbers<[1], [0], [0], [1], [0, 0, 1, 1], [], []>} : vector<128x8xbf16>, vector<8x32xbf16>, vector<128x32xf32> -> vector<128x32xf32>
    %c1_98 = arith.constant 1 : index
    %c0_99 = arith.constant 0 : index
    %c0_100 = arith.constant 0 : index
    %147 = vector.load %arg8[%c1_98, %c0_99, %c0_100] : memref<2x1x32xf32, #tpu.memory_space<vmem>>, vector<1x1x32xf32>
    %148 = vector.shape_cast %147 : vector<1x1x32xf32> to vector<1x32xf32>
    %149 = vector.broadcast %148 : vector<1x32xf32> to vector<128x32xf32>
    %150 = arith.addf %146, %149 : vector<128x32xf32>
    %cst_101 = arith.constant 0.000000e+00 : f32
    %151 = vector.broadcast %cst_101 : f32 to vector<128x32xf32>
    %152 = arith.maximumf %150, %151 : vector<128x32xf32>
    %153 = vector.broadcast %cst_101 : f32 to vector<128x32xf32>
    %154 = arith.subf %150, %153 : vector<128x32xf32>
    %155 = arith.cmpf one, %154, %154 : vector<128x32xf32>
    %156 = vector.broadcast %cst_101 : f32 to vector<128x32xf32>
    %157 = arith.addf %150, %156 : vector<128x32xf32>
    %158 = math.absf %154 : vector<128x32xf32>
    %cst_102 = arith.constant 0.000000e+00 : f32
    %159 = vector.broadcast %cst_102 : f32 to vector<128x32xf32>
    %160 = arith.subf %159, %158 : vector<128x32xf32>
    %161 = math.exp %160 : vector<128x32xf32>
    %162 = math.log1p %161 : vector<128x32xf32>
    %163 = arith.addf %152, %162 : vector<128x32xf32>
    %164 = arith.select %155, %157, %163 : vector<128x32xi1>, vector<128x32xf32>
    %c0_103 = arith.constant 0 : index
    %c0_104 = arith.constant 0 : index
    %165 = vector.load %arg16[%c0_103, %c0_104] : memref<128x32xf32, #tpu.memory_space<vmem>>, vector<128x32xf32>
    tpu.vector_store %arg16[%c0_103, %c0_104], %164 {strides = array<i32>} : memref<128x32xf32, #tpu.memory_space<vmem>>, vector<128x32xf32>,
    %c1_105 = arith.constant 1 : index
    %c0_106 = arith.constant 0 : index
    %c0_107 = arith.constant 0 : index
    %166 = vector.load %arg9[%c1_105, %c0_106, %c0_107] : memref<2x16x32xf32, #tpu.memory_space<vmem>>, vector<1x16x32xf32>
    %167 = vector.shape_cast %166 : vector<1x16x32xf32> to vector<16x32xf32>
    %c1_108 = arith.constant 1 : index
    %c0_109 = arith.constant 0 : index
    %c0_110 = arith.constant 0 : index
    %168 = vector.load %arg10[%c1_108, %c0_109, %c0_110] : memref<2x1x32xf32, #tpu.memory_space<vmem>>, vector<1x1x32xf32>
    %169 = vector.shape_cast %168 : vector<1x1x32xf32> to vector<1x32xf32>
    %c16 = arith.constant 16 : index
    %c0_111 = arith.constant 0 : index
    %170 = vector.load %arg13[%c16, %c0_111] : memref<32x32xf32, #tpu.memory_space<vmem>>, vector<16x32xf32>
    %c0_i32_112 = arith.constant 0 : i32
    %c16_i32_113 = arith.constant 16 : i32
    %171 = arith.addi %c0_i32_112, %c16_i32_113 : i32
    %c1_i32_114 = arith.constant 1 : i32
    %172 = scf.for %arg21 = %c0_i32_112 to %171 step %c1_i32_114 iter_args(%arg22 = %170) -> (vector<16x32xf32>)  : i32 {
      %c8_i32 = arith.constant 8 : i32
      %182 = arith.muli %arg21, %c8_i32 : i32
      %183 = tpu.assume_multiple %182, 8 : i32
      %184 = arith.index_cast %183 : i32 to index
      %c0_127 = arith.constant 0 : index
      %185 = vector.load %arg16[%184, %c0_127] : memref<128x32xf32, #tpu.memory_space<vmem>>, vector<8x32xf32>
      %186 = arith.index_cast %183 : i32 to index
      %c0_128 = arith.constant 0 : index
      %187 = vector.load %arg15[%186, %c0_128] : memref<128x32xf32, #tpu.memory_space<vmem>>, vector<8x32xf32>
      %188 = arith.index_cast %183 : i32 to index
      %c0_129 = arith.constant 0 : index
      %189 = vector.load %arg19[%188, %c0_129] : memref<128x16xf32, #tpu.memory_space<vmem>>, vector<8x16xf32>
      %190 = arith.index_cast %183 : i32 to index
      %c0_130 = arith.constant 0 : index
      %191 = vector.load %arg20[%190, %c0_130] : memref<128x16xf32, #tpu.memory_space<vmem>>, vector<8x16xf32>
      %192 = arith.index_cast %183 : i32 to index
      %c0_131 = arith.constant 0 : index
      %193 = vector.load %arg17[%192, %c0_131] : memref<128x32xf32, #tpu.memory_space<vmem>>, vector<8x32xf32>
      %194 = vector.shape_cast %185 : vector<8x32xf32> to vector<8x1x32xf32>
      %195 = vector.shape_cast %167 : vector<16x32xf32> to vector<1x16x32xf32>
      %196 = vector.broadcast %194 : vector<8x1x32xf32> to vector<8x16x32xf32>
      %197 = vector.broadcast %195 : vector<1x16x32xf32> to vector<8x16x32xf32>
      %198 = arith.mulf %196, %197 : vector<8x16x32xf32>
      %199 = math.exp %198 : vector<8x16x32xf32>
      %200 = arith.mulf %185, %187 : vector<8x32xf32>
      %201 = vector.shape_cast %200 : vector<8x32xf32> to vector<8x1x32xf32>
      %202 = vector.shape_cast %189 : vector<8x16xf32> to vector<8x16x1xf32>
      %203 = vector.broadcast %201 : vector<8x1x32xf32> to vector<8x16x32xf32>
      %204 = vector.broadcast %202 : vector<8x16x1xf32> to vector<8x16x32xf32>
      %205 = arith.mulf %203, %204 : vector<8x16x32xf32>
      %206 = vector.extract_strided_slice %199 {offsets = [0, 0, 0], sizes = [1, 16, 32], strides = [1, 1, 1]} : vector<8x16x32xf32> to vector<1x16x32xf32>
      %207 = vector.shape_cast %206 : vector<1x16x32xf32> to vector<16x32xf32>
      %208 = arith.mulf %207, %arg22 : vector<16x32xf32>
      %209 = vector.extract_strided_slice %205 {offsets = [0, 0, 0], sizes = [1, 16, 32], strides = [1, 1, 1]} : vector<8x16x32xf32> to vector<1x16x32xf32>
      %210 = vector.shape_cast %209 : vector<1x16x32xf32> to vector<16x32xf32>
      %211 = arith.addf %208, %210 : vector<16x32xf32>
      %212 = vector.extract_strided_slice %199 {offsets = [1, 0, 0], sizes = [1, 16, 32], strides = [1, 1, 1]} : vector<8x16x32xf32> to vector<1x16x32xf32>
      %213 = vector.shape_cast %212 : vector<1x16x32xf32> to vector<16x32xf32>
      %214 = arith.mulf %213, %211 : vector<16x32xf32>
      %215 = vector.extract_strided_slice %205 {offsets = [1, 0, 0], sizes = [1, 16, 32], strides = [1, 1, 1]} : vector<8x16x32xf32> to vector<1x16x32xf32>
      %216 = vector.shape_cast %215 : vector<1x16x32xf32> to vector<16x32xf32>
      %217 = arith.addf %214, %216 : vector<16x32xf32>
      %218 = vector.extract_strided_slice %199 {offsets = [2, 0, 0], sizes = [1, 16, 32], strides = [1, 1, 1]} : vector<8x16x32xf32> to vector<1x16x32xf32>
      %219 = vector.shape_cast %218 : vector<1x16x32xf32> to vector<16x32xf32>
      %220 = arith.mulf %219, %217 : vector<16x32xf32>
      %221 = vector.extract_strided_slice %205 {offsets = [2, 0, 0], sizes = [1, 16, 32], strides = [1, 1, 1]} : vector<8x16x32xf32> to vector<1x16x32xf32>
      %222 = vector.shape_cast %221 : vector<1x16x32xf32> to vector<16x32xf32>
      %223 = arith.addf %220, %222 : vector<16x32xf32>
      %224 = vector.extract_strided_slice %199 {offsets = [3, 0, 0], sizes = [1, 16, 32], strides = [1, 1, 1]} : vector<8x16x32xf32> to vector<1x16x32xf32>
      %225 = vector.shape_cast %224 : vector<1x16x32xf32> to vector<16x32xf32>
      %226 = arith.mulf %225, %223 : vector<16x32xf32>
      %227 = vector.extract_strided_slice %205 {offsets = [3, 0, 0], sizes = [1, 16, 32], strides = [1, 1, 1]} : vector<8x16x32xf32> to vector<1x16x32xf32>
      %228 = vector.shape_cast %227 : vector<1x16x32xf32> to vector<16x32xf32>
      %229 = arith.addf %226, %228 : vector<16x32xf32>
      %230 = vector.extract_strided_slice %199 {offsets = [4, 0, 0], sizes = [1, 16, 32], strides = [1, 1, 1]} : vector<8x16x32xf32> to vector<1x16x32xf32>
      %231 = vector.shape_cast %230 : vector<1x16x32xf32> to vector<16x32xf32>
      %232 = arith.mulf %231, %229 : vector<16x32xf32>
      %233 = vector.extract_strided_slice %205 {offsets = [4, 0, 0], sizes = [1, 16, 32], strides = [1, 1, 1]} : vector<8x16x32xf32> to vector<1x16x32xf32>
      %234 = vector.shape_cast %233 : vector<1x16x32xf32> to vector<16x32xf32>
      %235 = arith.addf %232, %234 : vector<16x32xf32>
      %236 = vector.extract_strided_slice %199 {offsets = [5, 0, 0], sizes = [1, 16, 32], strides = [1, 1, 1]} : vector<8x16x32xf32> to vector<1x16x32xf32>
      %237 = vector.shape_cast %236 : vector<1x16x32xf32> to vector<16x32xf32>
      %238 = arith.mulf %237, %235 : vector<16x32xf32>
      %239 = vector.extract_strided_slice %205 {offsets = [5, 0, 0], sizes = [1, 16, 32], strides = [1, 1, 1]} : vector<8x16x32xf32> to vector<1x16x32xf32>
      %240 = vector.shape_cast %239 : vector<1x16x32xf32> to vector<16x32xf32>
      %241 = arith.addf %238, %240 : vector<16x32xf32>
      %242 = vector.extract_strided_slice %199 {offsets = [6, 0, 0], sizes = [1, 16, 32], strides = [1, 1, 1]} : vector<8x16x32xf32> to vector<1x16x32xf32>
      %243 = vector.shape_cast %242 : vector<1x16x32xf32> to vector<16x32xf32>
      %244 = arith.mulf %243, %241 : vector<16x32xf32>
      %245 = vector.extract_strided_slice %205 {offsets = [6, 0, 0], sizes = [1, 16, 32], strides = [1, 1, 1]} : vector<8x16x32xf32> to vector<1x16x32xf32>
      %246 = vector.shape_cast %245 : vector<1x16x32xf32> to vector<16x32xf32>
      %247 = arith.addf %244, %246 : vector<16x32xf32>
      %248 = vector.extract_strided_slice %199 {offsets = [7, 0, 0], sizes = [1, 16, 32], strides = [1, 1, 1]} : vector<8x16x32xf32> to vector<1x16x32xf32>
      %249 = vector.shape_cast %248 : vector<1x16x32xf32> to vector<16x32xf32>
      %250 = arith.mulf %249, %247 : vector<16x32xf32>
      %251 = vector.extract_strided_slice %205 {offsets = [7, 0, 0], sizes = [1, 16, 32], strides = [1, 1, 1]} : vector<8x16x32xf32> to vector<1x16x32xf32>
      %252 = vector.shape_cast %251 : vector<1x16x32xf32> to vector<16x32xf32>
      %253 = arith.addf %250, %252 : vector<16x32xf32>
      %254 = vector.shape_cast %211 : vector<16x32xf32> to vector<1x16x32xf32>
      %255 = vector.shape_cast %217 : vector<16x32xf32> to vector<1x16x32xf32>
      %256 = vector.shape_cast %223 : vector<16x32xf32> to vector<1x16x32xf32>
      %257 = vector.shape_cast %229 : vector<16x32xf32> to vector<1x16x32xf32>
      %258 = vector.shape_cast %235 : vector<16x32xf32> to vector<1x16x32xf32>
      %259 = vector.shape_cast %241 : vector<16x32xf32> to vector<1x16x32xf32>
      %260 = vector.shape_cast %247 : vector<16x32xf32> to vector<1x16x32xf32>
      %261 = vector.shape_cast %253 : vector<16x32xf32> to vector<1x16x32xf32>
      %262 = tpu.concatenate %254, %255, %256, %257, %258, %259, %260, %261 in 0 : vector<1x16x32xf32>, vector<1x16x32xf32>, vector<1x16x32xf32>, vector<1x16x32xf32>, vector<1x16x32xf32>, vector<1x16x32xf32>, vector<1x16x32xf32>, vector<1x16x32xf32> -> vector<8x16x32xf32>
      %263 = vector.shape_cast %191 : vector<8x16xf32> to vector<8x16x1xf32>
      %264 = vector.broadcast %263 : vector<8x16x1xf32> to vector<8x16x32xf32>
      %265 = arith.mulf %264, %262 : vector<8x16x32xf32>
      %cst_132 = arith.constant dense<0.000000e+00> : vector<8x32xf32>
      %266 = vector.multi_reduction <add>, %265, %cst_132 [1] : vector<8x16x32xf32> to vector<8x32xf32>
      %267 = vector.broadcast %169 : vector<1x32xf32> to vector<8x32xf32>
      %268 = arith.mulf %267, %187 : vector<8x32xf32>
      %269 = arith.addf %266, %268 : vector<8x32xf32>
      %270 = arith.negf %193 : vector<8x32xf32>
      %271 = math.exp %270 : vector<8x32xf32>
      %cst_133 = arith.constant 1.000000e+00 : f32
      %272 = vector.broadcast %cst_133 : f32 to vector<8x32xf32>
      %273 = arith.addf %272, %271 : vector<8x32xf32>
      %274 = arith.divf %272, %273 : vector<8x32xf32>
      %275 = arith.mulf %193, %274 : vector<8x32xf32>
      %276 = arith.mulf %269, %275 : vector<8x32xf32>
      %277 = arith.index_cast %183 : i32 to index
      %c0_134 = arith.constant 0 : index
      %278 = vector.load %arg18[%277, %c0_134] : memref<128x32xf32, #tpu.memory_space<vmem>>, vector<8x32xf32>
      tpu.vector_store %arg18[%277, %c0_134], %276 {strides = array<i32>} : memref<128x32xf32, #tpu.memory_space<vmem>>, vector<8x32xf32>,
      scf.yield %253 : vector<16x32xf32>
    }
    %c16_i32_115 = arith.constant 16 : i32
    %c16_116 = arith.constant 16 : index
    %c0_117 = arith.constant 0 : index
    %173 = vector.load %arg13[%c16_116, %c0_117] : memref<32x32xf32, #tpu.memory_space<vmem>>, vector<16x32xf32>
    tpu.vector_store %arg13[%c16_116, %c0_117], %172 {strides = array<i32>} : memref<32x32xf32, #tpu.memory_space<vmem>>, vector<16x32xf32>,
    %c0_118 = arith.constant 0 : index
    %c0_119 = arith.constant 0 : index
    %174 = vector.load %arg18[%c0_118, %c0_119] : memref<128x32xf32, #tpu.memory_space<vmem>>, vector<128x32xf32>
    %175 = arith.truncf %174 : vector<128x32xf32> to vector<128x32xbf16>
    %c1_120 = arith.constant 1 : index
    %c0_121 = arith.constant 0 : index
    %c0_122 = arith.constant 0 : index
    %176 = vector.load %arg11[%c1_120, %c0_121, %c0_122] : memref<2x32x16xbf16, #tpu.memory_space<vmem>>, vector<1x32x16xbf16>
    %177 = vector.shape_cast %176 : vector<1x32x16xbf16> to vector<32x16xbf16>
    %cst_123 = arith.constant dense<0.000000e+00> : vector<128x16xf32>
    %178 = tpu.matmul %175, %177, %cst_123 {dimension_numbers = #tpu.dot_dimension_numbers<[1], [0], [0], [1], [0, 0, 1, 1], [], []>} : vector<128x32xbf16>, vector<32x16xbf16>, vector<128x16xf32> -> vector<128x16xf32>
    %c0_124 = arith.constant 0 : index
    %c0_125 = arith.constant 0 : index
    %c0_126 = arith.constant 0 : index
    %179 = vector.load %arg12[%c0_124, %c0_125, %c0_126] : memref<1x128x16xf32, #tpu.memory_space<vmem>>, vector<1x128x16xf32>
    %180 = vector.shape_cast %179 : vector<1x128x16xf32> to vector<128x16xf32>
    %181 = vector.shape_cast %178 : vector<128x16xf32> to vector<1x128x16xf32>
    tpu.vector_store %arg12[%c0_124, %c0_125, %c0_126], %181 {strides = array<i32>} : memref<1x128x16xf32, #tpu.memory_space<vmem>>, vector<1x128x16xf32>,
    return
  }
  func.func @transform_0(%arg0: i32, %arg1: i32) -> (i32, i32, i32) {
    %c0_i32 = arith.constant 0 : i32
    %c0_i32_0 = arith.constant 0 : i32
    return %arg0, %arg1, %c0_i32 : i32, i32, i32
  }
  func.func @transform_1(%arg0: i32, %arg1: i32) -> (i32, i32, i32) {
    %c0_i32 = arith.constant 0 : i32
    %c0_i32_0 = arith.constant 0 : i32
    %c0_i32_1 = arith.constant 0 : i32
    %c0_i32_2 = arith.constant 0 : i32
    return %c0_i32, %c0_i32_0, %c0_i32_1 : i32, i32, i32
  }
  func.func @transform_2(%arg0: i32, %arg1: i32) -> (i32, i32, i32) {
    %c0_i32 = arith.constant 0 : i32
    %c0_i32_0 = arith.constant 0 : i32
    %c0_i32_1 = arith.constant 0 : i32
    %c0_i32_2 = arith.constant 0 : i32
    return %c0_i32, %c0_i32_0, %c0_i32_1 : i32, i32, i32
  }
  func.func @transform_3(%arg0: i32, %arg1: i32) -> (i32, i32, i32) {
    %c0_i32 = arith.constant 0 : i32
    %c0_i32_0 = arith.constant 0 : i32
    %c0_i32_1 = arith.constant 0 : i32
    %c0_i32_2 = arith.constant 0 : i32
    return %c0_i32, %c0_i32_0, %c0_i32_1 : i32, i32, i32
  }
  func.func @transform_4(%arg0: i32, %arg1: i32) -> (i32, i32, i32) {
    %c0_i32 = arith.constant 0 : i32
    %c0_i32_0 = arith.constant 0 : i32
    %c0_i32_1 = arith.constant 0 : i32
    %c0_i32_2 = arith.constant 0 : i32
    return %c0_i32, %c0_i32_0, %c0_i32_1 : i32, i32, i32
  }
  func.func @transform_5(%arg0: i32, %arg1: i32) -> (i32, i32, i32) {
    %c0_i32 = arith.constant 0 : i32
    %c0_i32_0 = arith.constant 0 : i32
    %c0_i32_1 = arith.constant 0 : i32
    %c0_i32_2 = arith.constant 0 : i32
    return %c0_i32, %c0_i32_0, %c0_i32_1 : i32, i32, i32
  }
  func.func @transform_6(%arg0: i32, %arg1: i32) -> (i32, i32, i32) {
    %c0_i32 = arith.constant 0 : i32
    %c0_i32_0 = arith.constant 0 : i32
    %c0_i32_1 = arith.constant 0 : i32
    %c0_i32_2 = arith.constant 0 : i32
    return %c0_i32, %c0_i32_0, %c0_i32_1 : i32, i32, i32
  }
  func.func @transform_7(%arg0: i32, %arg1: i32) -> (i32, i32, i32) {
    %c0_i32 = arith.constant 0 : i32
    %c0_i32_0 = arith.constant 0 : i32
    %c0_i32_1 = arith.constant 0 : i32
    %c0_i32_2 = arith.constant 0 : i32
    return %c0_i32, %c0_i32_0, %c0_i32_1 : i32, i32, i32
  }
  func.func @transform_8(%arg0: i32, %arg1: i32) -> (i32, i32, i32) {
    %c0_i32 = arith.constant 0 : i32
    %c0_i32_0 = arith.constant 0 : i32
    %c0_i32_1 = arith.constant 0 : i32
    %c0_i32_2 = arith.constant 0 : i32
    return %c0_i32, %c0_i32_0, %c0_i32_1 : i32, i32, i32
  }
  func.func @transform_9(%arg0: i32, %arg1: i32) -> (i32, i32, i32) {
    %c0_i32 = arith.constant 0 : i32
    %c0_i32_0 = arith.constant 0 : i32
    %c0_i32_1 = arith.constant 0 : i32
    %c0_i32_2 = arith.constant 0 : i32
    return %c0_i32, %c0_i32_0, %c0_i32_1 : i32, i32, i32
  }
  func.func @transform_10(%arg0: i32, %arg1: i32) -> (i32, i32, i32) {
    %c0_i32 = arith.constant 0 : i32
    %c0_i32_0 = arith.constant 0 : i32
    return %arg0, %arg1, %c0_i32 : i32, i32, i32
  }
}

</mosaic_0001>

<bundles_post_ra>
// kernel: body_branch_forward.1
= control target key start
LH: loop header
LB: loop body
LE: loop exit
PB: predicated region body
PF: predicated region fallthrough
CT: control target
= control target key end

     0   :  { %s5499_s13 = smov 0   ;;  %s5501_s14 = smov 0   ;;  %s7263_s0 = inlined_call_operand.vmem [shape: f32[2,256,16], index: 0, kind: input, shape index: {}]   ;;  %s7264_s1 = inlined_call_operand.vmem [shape: bf16[2,16,64], index: 1, kind: input, shape index: {}]   ;;  %s7265_s2 = inlined_call_operand.vmem [shape: f32[2,4,32], index: 2, kind: input, shape index: {}]   ;;  %s7266_s3 = inlined_call_operand.vmem [shape: f32[2,1,32], index: 3, kind: input, shape index: {}]   ;;  %s7267_s4 = inlined_call_operand.vmem [shape: bf16[2,32,40], index: 4, kind: input, shape index: {}]   ;;  %s7268_s5 = inlined_call_operand.vmem [shape: bf16[2,8,32], index: 5, kind: input, shape index: {}]   ;;  %s7269_s6 = inlined_call_operand.vmem [shape: f32[2,1,32], index: 6, kind: input, shape index: {}]   ;;  %s7270_s7 = inlined_call_operand.vmem [shape: f32[2,16,32], index: 7, kind: input, shape index: {}]   ;;  %s7271_s8 = inlined_call_operand.vmem [shape: f32[2,1,32], index: 8, kind: input, shape index: {}]   ;;  %s7272_s9 = inlined_call_operand.vmem [shape: bf16[2,32,16], index: 9, kind: input, shape index: {}]   ;;  %s7273_s10 = inlined_call_operand.vmem [shape: f32[2,256,16], index: 10, kind: output, shape index: {}]  }
   0x1   :  { %s5503_s15 = smov 0   ;;  %s5505_s16 = smov 0  }
   0x2   :  { %s5507_s17 = smov 0  }
   0x3 LB: > { %s29_s18 = sadd.s32 1, %s5406_s15  ;;  %s32_s19 = sadd.s32 1, %s5410_s16  ;;  %s5414_s17 = sphi %s5507_s17, %s20_s17   ;;  %s5410_s16 = sphi %s5505_s16, %s7303_s16   ;;  %s5406_s15 = sphi %s5503_s15, %s7302_s15   ;;  %s5402_s14 = sphi %s5501_s14, %s7301_s14   ;;  %s5398_s13 = sphi %s5499_s13, %s7300_s13  }
   0x4   : > { %p30_p0 = scmp.ge.s32.totalorder %s29_s18, 2  ;;  %p4713_p1 = scmp.ge.s32.totalorder %s5414_s17, 1 }
   0x5   : > { %p333_p2 = scmp.lt.s32.totalorder %s5414_s17, 5 }
   0x6   : > { %s7305_s18 = smov (%p30_p0, %s29_s18), 0  ;;  %s7307_s19 = smov (!%p30_p0, %s32_s19), %s5410_s16 }
   0x7   : > { %p334_p3 = pnand %p4713_p1, %p333_p2  ;;  %p34_p4 = scmp.ge.s32.totalorder %s7307_s19, 2 }
   0x8   : > { %s4714_s20 = sshll.u32 (!%p334_p3), %s5398_s13, 4  ;;  %p380_p5 = scmp.lt.s32.totalorder (!%p334_p3), %s5402_s14, 1 }
   0x9   : > { %s7309_s19 = smov (%p34_p4, %s7307_s19), 0  ;;  %337 = sbr.rel (%p334_p3) target bundleno = 2288 (0x8f0), region = 60 }
   0xa   : > { %p382_p6 = scmp.lt.s32.totalorder (!%p334_p3), %s4714_s20, 31  ;;  %p4720_p7 = scmp.ne.s32.totalorder (!%p334_p3), %s5398_s13, 0 }
   0xe   : > { %s7311_s14 = smov (!%p380_p5, %s5402_s14), 1  ;;  %s7313_s20 = smov (!%p382_p6, %s4714_s20), 31 }
   0xf   : > { %s4715_s21 = sshll.u32 %s7311_s14, 5  ;;  %403 = sbr.rel (%p4720_p7) target bundleno = 59 (0x3b), region = 64 }
  0x10   : > { %s385_s22 = sadd.s32 %s4715_s21, %s7313_s20 }
  0x11   : > { %s4716_s23 = sshll.u32 %s385_s22, 3 }
  0x12   : > { %s5532_s26 = scalar_lea.vmem %s7263_s0, %s4716_s23  ;;  %s5537_s29 = scalar_lea.vmem %s7273_s10, %s4716_s23 }
  0x14   : > { %vm404_vm0 = vcmask 261120   ;;  %v5440_v0 = vmov 0.0  }
  0x15   : > { %405 = vst.msk [vmem:[#allocation2] sm:$0xff] %vm404_vm0, %v5440_v0 }
  0x16   : > { %406 = vst.msk [vmem:[#allocation2 + $0x8] sm:$0xff] %vm404_vm0, %v5440_v0 }
  0x17   : > { %407 = vst.msk [vmem:[#allocation2 + $0x10] sm:$0xff] %vm404_vm0, %v5440_v0 }
  0x18   : > { %408 = vst.msk [vmem:[#allocation2 + $0x18] sm:$0xff] %vm404_vm0, %v5440_v0 }
  0x19   : > { %409 = vst.msk [vmem:[#allocation3] sm:$0xff] %vm404_vm0, %v5440_v0 }
  0x1a   : > { %410 = vst.msk [vmem:[#allocation3 + $0x8] sm:$0xff] %vm404_vm0, %v5440_v0 }
  0x1b   : > { %411 = vst.msk [vmem:[#allocation3 + $0x10] sm:$0xff] %vm404_vm0, %v5440_v0 }
  0x1c   : > { %412 = vst.msk [vmem:[#allocation3 + $0x18] sm:$0xff] %vm404_vm0, %v5440_v0 }
  0x1d   : > { %413 = vst.msk [vmem:[#allocation3 + $0x20] sm:$0xff] %vm404_vm0, %v5440_v0 }
  0x1e   : > { %414 = vst.msk [vmem:[#allocation3 + $0x28] sm:$0xff] %vm404_vm0, %v5440_v0 }
  0x1f   : > { %415 = vst.msk [vmem:[#allocation3 + $0x30] sm:$0xff] %vm404_vm0, %v5440_v0 }
  0x20   : > { %416 = vst.msk [vmem:[#allocation3 + $0x38] sm:$0xff] %vm404_vm0, %v5440_v0 }
  0x21   : > { %417 = vst.msk [vmem:[#allocation3 + $0x40] sm:$0xff] %vm404_vm0, %v5440_v0 }
  0x22   : > { %418 = vst.msk [vmem:[#allocation3 + $0x48] sm:$0xff] %vm404_vm0, %v5440_v0 }
  0x23   : > { %419 = vst.msk [vmem:[#allocation3 + $0x50] sm:$0xff] %vm404_vm0, %v5440_v0 }
  0x24   : > { %420 = vst.msk [vmem:[#allocation3 + $0x58] sm:$0xff] %vm404_vm0, %v5440_v0 }
  0x25   : > { %421 = vst.msk [vmem:[#allocation3 + $0x60] sm:$0xff] %vm404_vm0, %v5440_v0 }
  0x26   : > { %422 = vst.msk [vmem:[#allocation3 + $0x68] sm:$0xff] %vm404_vm0, %v5440_v0 }
  0x27   : > { %423 = vst.msk [vmem:[#allocation3 + $0x70] sm:$0xff] %vm404_vm0, %v5440_v0 }
  0x28   : > { %424 = vst.msk [vmem:[#allocation3 + $0x78] sm:$0xff] %vm404_vm0, %v5440_v0 }
  0x29   : > { %425 = vst.msk [vmem:[#allocation3 + $0x80] sm:$0xff] %vm404_vm0, %v5440_v0 }
  0x2a   : > { %426 = vst.msk [vmem:[#allocation3 + $0x88] sm:$0xff] %vm404_vm0, %v5440_v0 }
  0x2b   : > { %427 = vst.msk [vmem:[#allocation3 + $0x90] sm:$0xff] %vm404_vm0, %v5440_v0 }
  0x2c   : > { %428 = vst.msk [vmem:[#allocation3 + $0x98] sm:$0xff] %vm404_vm0, %v5440_v0 }
  0x2d   : > { %429 = vst.msk [vmem:[#allocation3 + $0xa0] sm:$0xff] %vm404_vm0, %v5440_v0 }
  0x2e   : > { %430 = vst.msk [vmem:[#allocation3 + $0xa8] sm:$0xff] %vm404_vm0, %v5440_v0 }
  0x2f   : > { %431 = vst.msk [vmem:[#allocation3 + $0xb0] sm:$0xff] %vm404_vm0, %v5440_v0 }
  0x30   : > { %432 = vst.msk [vmem:[#allocation3 + $0xb8] sm:$0xff] %vm404_vm0, %v5440_v0 }
  0x31   : > { %433 = vst.msk [vmem:[#allocation3 + $0xc0] sm:$0xff] %vm404_vm0, %v5440_v0 }
  0x32   : > { %434 = vst.msk [vmem:[#allocation3 + $0xc8] sm:$0xff] %vm404_vm0, %v5440_v0 }
  0x33   : > { %435 = vst.msk [vmem:[#allocation3 + $0xd0] sm:$0xff] %vm404_vm0, %v5440_v0 }
  0x34   : > { %436 = vst.msk [vmem:[#allocation3 + $0xd8] sm:$0xff] %vm404_vm0, %v5440_v0 }
  0x35   : > { %437 = vst.msk [vmem:[#allocation3 + $0xe0] sm:$0xff] %vm404_vm0, %v5440_v0 }
  0x36   : > { %438 = vst.msk [vmem:[#allocation3 + $0xe8] sm:$0xff] %vm404_vm0, %v5440_v0 }
  0x37   : > { %439 = vst.msk [vmem:[#allocation3 + $0xf0] sm:$0xff] %vm404_vm0, %v5440_v0 }
  0x38   : > { %440 = vst.msk [vmem:[#allocation3 + $0xf8] sm:$0xff] %vm404_vm0, %v5440_v0 }
  0x39   : > { %441 = vst.msk [vmem:[#allocation3 + $0x100] sm:$0xff] %vm404_vm0, %v5440_v0 }
  0x3a   : > { %442 = vst.msk [vmem:[#allocation3 + $0x108] sm:$0xff] %vm404_vm0, %v5440_v0 }
  0x3b PF: > { %v4880_v1 = vld [vmem:[%s7264_s1] sm:$0xff]  ;;  %v444_v3 = vld [vmem:[%s5532_s26 + $0x8] sm:$0xff]  ;;  %vm475_vm1 = vcmask 130048   ;;  %v445_v5 = vld [vmem:[%s5532_s26 + $0x10] sm:$0xff]  ;;  %vm613_vm2 = vcmask 261120   ;;  %s5441_s12 = smov 96  }
  0x3c   : > { %v443_v2 = vld [vmem:[%s5532_s26] sm:$0xff]  ;;  %507 = vmatpush.bf16.msra.mxu0 %v4880_v1  ;;  %v446_v6 = vld [vmem:[%s5532_s26 + $0x18] sm:$0xff]  ;;  %v448_v9 = vld [vmem:[%s5532_s26 + $0x28] sm:$0xff]  ;;  %s5442_s28 = smov 120   ;;  %s5443_s30 = smov 104  }
  0x3d   : > { %v459_v4 = vpack.c.bf16 %v444_v3, %v443_v2  ;;  %v460_v7 = vpack.c.bf16 %v446_v6, %v445_v5  ;;  %v447_v8 = vld [vmem:[%s5532_s26 + $0x20] sm:$0xff]  ;;  %v449_v11 = vld [vmem:[%s5532_s26 + $0x30] sm:$0xff]  ;;  %v450_v12 = vld [vmem:[%s5532_s26 + $0x38] sm:$0xff]  ;;  %s6174_s25 = smov 0  }
  0x3e   : > { %v461_v10 = vpack.c.bf16 %v448_v9, %v447_v8  ;;  %v462_v13 = vpack.c.bf16 %v450_v12, %v449_v11  ;;  %v451_v14 = vld [vmem:[%s5532_s26 + $0x40] sm:$0xff]  ;;  %v452_v15 = vld [vmem:[%s5532_s26 + $0x48] sm:$0xff]  ;;  %v453_v17 = vld [vmem:[%s5532_s26 + $0x50] sm:$0xff] }
  0x3f   : > { %4725 = vmatmul.msk.bf16.vlgmr.msra.gmra.mxu0 %vm475_vm1, %v459_v4  ;;  %v463_v16 = vpack.c.bf16 %v452_v15, %v451_v14  ;;  %v454_v18 = vld [vmem:[%s5532_s26 + $0x58] sm:$0xff]  ;;  %v455_v20 = vld [vmem:[%s5532_s26 + $0x60] sm:$0xff]  ;;  %v456_v21 = vld [vmem:[%s5532_s26 + $0x68] sm:$0xff] }
  0x40   : > { %v464_v19 = vpack.c.bf16 %v454_v18, %v453_v17  ;;  %v465_v22 = vpack.c.bf16 %v456_v21, %v455_v20  ;;  %v457_v23 = vld [vmem:[%s5532_s26 + $0x70] sm:$0xff]  ;;  %v458_v24 = vld [vmem:[%s5532_s26 + $0x78] sm:$0xff]  ;;  %v646_v27 = vld [vmem:[%s7265_s2] sm:$0xf] }
  0x41   : > { %v466_v25 = vpack.c.bf16 %v458_v24, %v457_v23  ;;  %v5609_v28 = vperm.slane %v646_v27, 0  ;;  %v5614_v29 = vld [vmem:[%s7266_s3] ss:$0 sm:$0xff]  ;;  %v5616_v30 = vperm.slane %v646_v27, 1  ;;  %v5621_v35 = vperm.slane %v646_v27, 2  ;;  %v4882_v48 = vld [vmem:[%s7267_s4 + $0x8] sm:$0xff] }
  0x42   : > { %v5625_v39 = vperm.slane %v646_v27, 3  ;;  %1240 = vmatpush.bf16.msra.mxu1 %v4882_v48  ;;  %v4881_v58 = vld [vmem:[%s7267_s4] sm:$0xff] }
  0x46   : > { %1241 = vmatpush.bf16.msra.mxu1 %v4881_v58 }
  0x4f   : > { %4726 = vmatmul.msk.bf16.gmra.mxu0 %vm475_vm1, %v460_v7 }
  0x5f   : > { %4727 = vmatmul.msk.bf16.gmra.mxu0 %vm475_vm1, %v461_v10 }
  0x6f   : > { %4728 = vmatmul.msk.bf16.gmra.mxu0 %vm475_vm1, %v462_v13 }
  0x7f   : > { %4729 = vmatmul.msk.bf16.gmra.mxu0 %vm475_vm1, %v463_v16 }
  0x8f   : > { %4730 = vmatmul.msk.bf16.gmra.mxu0 %vm475_vm1, %v464_v19 }
  0x9f   : > { %4731 = vmatmul.msk.bf16.gmra.mxu0 %vm475_vm1, %v465_v22 }
  0xaf   : > { %4732 = vmatmul.msk.bf16.gmra.mxu0 %vm475_vm1, %v466_v25 }
  0xbc   : > { %v509_v26 = vpop.f32.mrf.mxu0 }
  0xbd   : > { %630 = vst.msk [vmem:[#allocation3 + $0x8] sm:$0xff] %vm613_vm2, %v509_v26  ;;  %565 = vrot.lane.b32.xlu0 %v509_v26, %s5441_s12 }
  0xc4   : > { %v511_v31 = vpop.f32.mrf.mxu0  ;;  %v648_v32 = vld [vmem:[#allocation3 + $0x5] sm:$0xff] }
  0xc5   : > { %v700_v33 = vld [vmem:[#allocation3 + $0x6] sm:$0xff]  ;;  %631 = vst.msk [vmem:[#allocation3 + $0x10] sm:$0xff] %vm613_vm2, %v511_v31  ;;  %567 = vrot.lane.b32.xlu0 %v511_v31, %s5441_s12  ;;  %v665_v34 = vmul.f32 %v5609_v28, %v648_v32 }
  0xc6   : > { %v749_v36 = vld [vmem:[#allocation3 + $0x7] sm:$0xff]  ;;  %v717_v38 = vmul.f32 %v5616_v30, %v700_v33 }
  0xc7   : > { %v684_v37 = vadd.f32 %v5614_v29, %v665_v34  ;;  %v766_v41 = vmul.f32 %v5621_v35, %v749_v36  ;;  %v798_v42 = vld [vmem:[#allocation3 + $0x8] sm:$0xff] }
  0xc8   : > { %v815_v47 = vmul.f32 %v5625_v39, %v798_v42 }
  0xc9   : > { %v733_v40 = vadd.f32 %v717_v38, %v684_v37 }
  0xcb   : > { %v782_v43 = vadd.f32 %v766_v41, %v733_v40 }
  0xcc   : > { %v514_v44 = vpop.f32.mrf.mxu0  ;;  %v649_v45 = vld [vmem:[#allocation3 + $0xd] sm:$0xff] }
  0xcd   : > { %v701_v46 = vld [vmem:[#allocation3 + $0xe] sm:$0xff]  ;;  %632 = vst.msk [vmem:[#allocation3 + $0x18] sm:$0xff] %vm613_vm2, %v514_v44  ;;  %569 = vrot.lane.b32.xlu1 %v514_v44, %s5441_s12  ;;  %v666_v49 = vmul.f32 %v5609_v28, %v649_v45  ;;  %v5635_v51 = vadd.f32 %v815_v47, %v782_v43 }
  0xce   : > { %v750_v50 = vld [vmem:[#allocation3 + $0xf] sm:$0xff]  ;;  %v718_v53 = vmul.f32 %v5616_v30, %v701_v46 }
  0xcf   : > { %v685_v52 = vadd.f32 %v5614_v29, %v666_v49  ;;  %v799_v54 = vld [vmem:[#allocation3 + $0x10] sm:$0xff]  ;;  %v4733_v55 = vmul.f32 -1.442695, %v5635_v51  ;;  %v767_v57 = vmul.f32 %v5621_v35, %v750_v50 }
  0xd0   : > { %v816_v60 = vmul.f32 %v5625_v39, %v799_v54 }
  0xd1   : > { %v734_v56 = vadd.f32 %v718_v53, %v685_v52  ;;  %4984 = vpow2.f32 %v4733_v55 }
  0xd3   : > { %v783_v59 = vadd.f32 %v767_v57, %v734_v56 }
  0xd4   : > { %v516_v61 = vpop.f32.mrf.mxu0  ;;  %v650_v62 = vld [vmem:[#allocation3 + $0x15] sm:$0xff] }
  0xd5   : > { %v702_v63 = vld [vmem:[#allocation3 + $0x16] sm:$0xff]  ;;  %633 = vst.msk [vmem:[#allocation3 + $0x20] sm:$0xff] %vm613_vm2, %v516_v61  ;;  %571 = vrot.lane.b32.xlu1 %v516_v61, %s5441_s12  ;;  %v5647_v0 = vadd.f32 %v816_v60, %v783_v59  ;;  %v667_v1 = vmul.f32 %v5609_v28, %v650_v62 }
  0xd6   : > { %v719_v4 = vmul.f32 %v5616_v30, %v702_v63  ;;  %v751_v5 = vld [vmem:[#allocation3 + $0x17] sm:$0xff] }
  0xd7   : > { %v4734_v2 = vmul.f32 -1.442695, %v5647_v0  ;;  %v686_v3 = vadd.f32 %v5614_v29, %v667_v1  ;;  %v4985_v6 = vpop.eup %4984  ;;  %v800_v9 = vld [vmem:[#allocation3 + $0x18] sm:$0xff]  ;;  %v768_v10 = vmul.f32 %v5621_v35, %v751_v5 }
  0xd8   : > { %v898_v7 = vadd.f32 1.0, %v4985_v6  ;;  %v817_v15 = vmul.f32 %v5625_v39, %v800_v9 }
  0xd9   : > { %4986 = vpow2.f32 %v4734_v2  ;;  %v735_v8 = vadd.f32 %v719_v4, %v686_v3 }
  0xda   : > { %4988 = vrcp.f32 %v898_v7  ;;  %v925_v37 = vand.u32 2147483648, %v898_v7  ;;  %v923_v44 = vand.u32 2147483647, %v898_v7  ;;  %vm919_vm4 = vweird.f32 %v898_v7 }
  0xdb   : > { %v784_v14 = vadd.f32 %v768_v10, %v735_v8 }
  0xdc   : > { %v519_v11 = vpop.f32.mrf.mxu0  ;;  %v651_v12 = vld [vmem:[#allocation3 + $0x1d] sm:$0xff]  ;;  %v926_v52 = vor.u32 1.1754944e-38, %v925_v37  ;;  %vm924_vm6 = vcmp.eq.f32.partialorder %v923_v44, 8.507059e+37 }
  0xdd   : > { %v703_v13 = vld [vmem:[#allocation3 + $0x1e] sm:$0xff]  ;;  %634 = vst.msk [vmem:[#allocation3 + $0x28] sm:$0xff] %vm613_vm2, %v519_v11  ;;  %573 = vrot.lane.b32.xlu2 %v519_v11, %s5441_s12  ;;  %v668_v16 = vmul.f32 %v5609_v28, %v651_v12  ;;  %v5658_v18 = vadd.f32 %v817_v15, %v784_v14 }
  0xde   : > { %v752_v17 = vld [vmem:[#allocation3 + $0x1f] sm:$0xff]  ;;  %v720_v21 = vmul.f32 %v5616_v30, %v703_v13 }
  0xdf   : > { %v4987_v19 = vpop.eup %4986  ;;  %v687_v20 = vadd.f32 %v5614_v29, %v668_v16  ;;  %v801_v23 = vld [vmem:[#allocation3 + $0x20] sm:$0xff]  ;;  %v4735_v24 = vmul.f32 -1.442695, %v5658_v18  ;;  %v769_v27 = vmul.f32 %v5621_v35, %v752_v17 }
  0xe0   : > { %v5662_v22 = vadd.f32 1.0, %v4987_v19  ;;  %v4989_v25 = vpop.eup %4988  ;;  %v818_v33 = vmul.f32 %v5625_v39, %v801_v23 }
  0xe1   : > { %v736_v26 = vadd.f32 %v720_v21, %v687_v20  ;;  %v915_v31 = vmul.f32 %v4989_v25, %v898_v7  ;;  %vm920_vm3 = vweird.f32 %v4989_v25 }
  0xe2   : > { %4990 = vrcp.f32 %v5662_v22  ;;  %vm921_vm5 = vmor %vm919_vm4, %vm920_vm3  ;;  %v940_v1 = vand.u32 2147483648, %v5662_v22  ;;  %v938_v7 = vand.u32 2147483647, %v5662_v22  ;;  %vm934_vm8 = vweird.f32 %v5662_v22 }
  0xe3   : > { %v785_v32 = vadd.f32 %v769_v27, %v736_v26  ;;  %4992 = vpow2.f32 %v4735_v24  ;;  %v916_v36 = vsub.f32 1.0, %v915_v31 }
  0xe4   : > { %v521_v34 = vpop.f32.mrf.mxu0  ;;  %v652_v38 = vld [vmem:[#allocation3 + $0x25] sm:$0xff]  ;;  %v941_v14 = vor.u32 1.1754944e-38, %v940_v1  ;;  %vm939_vm10 = vcmp.eq.f32.partialorder %v938_v7, 8.507059e+37 }
  0xe5   : > { %v704_v40 = vld [vmem:[#allocation3 + $0x26] sm:$0xff]  ;;  %635 = vst.msk [vmem:[#allocation3 + $0x30] sm:$0xff] %vm613_vm2, %v521_v34  ;;  %575 = vrot.lane.b32.xlu2 %v521_v34, %s5441_s12  ;;  %v5670_v41 = vadd.f32 %v818_v33, %v785_v32  ;;  %v669_v42 = vmul.f32 %v5609_v28, %v652_v38  ;;  %v917_v43 = vmul.f32 %v4989_v25, %v916_v36 }
  0xe6   : > { %v753_v45 = vld [vmem:[#allocation3 + $0x27] sm:$0xff]  ;;  %v721_v48 = vmul.f32 %v5616_v30, %v704_v40 }
  0xe7   : > { %v4736_v46 = vmul.f32 -1.442695, %v5670_v41  ;;  %v688_v47 = vadd.f32 %v5614_v29, %v669_v42  ;;  %v918_v50 = vadd.f32 %v4989_v25, %v917_v43  ;;  %v770_v56 = vmul.f32 %v5621_v35, %v753_v45  ;;  %v802_v57 = vld [vmem:[#allocation3 + $0x28] sm:$0xff] }
  0xe8   : > { %v4991_v49 = vpop.eup %4990  ;;  %v819_v5 = vmul.f32 %v5625_v39, %v802_v57 }
  0xe9   : > { %v4993_v53 = vpop.eup %4992  ;;  %v930_v54 = vmul.f32 %v4991_v49, %v5662_v22  ;;  %4994 = vpow2.f32 %v4736_v46  ;;  %v737_v55 = vadd.f32 %v721_v48, %v688_v47  ;;  %v922_v58 = vsel %vm921_vm5, %v4989_v25, %v918_v50 }
  0xea   : > { %v5678_v59 = vadd.f32 1.0, %v4993_v53  ;;  %v927_v60 = vsel %vm924_vm6, %v926_v52, %v922_v58  ;;  %vm935_vm7 = vweird.f32 %v4991_v49 }
  0xeb   : > { %v931_v61 = vsub.f32 1.0, %v930_v54  ;;  %v786_v62 = vadd.f32 %v770_v56, %v737_v55  ;;  %v1154_v2 = vmul.f32 %v927_v60, %v5635_v51  ;;  %vm936_vm9 = vmor %vm934_vm8, %vm935_vm7 }
  0xec   : > { %v524_v63 = vpop.f32.mrf.mxu0  ;;  %4996 = vrcp.f32 %v5678_v59  ;;  %v653_v3 = vld [vmem:[#allocation3 + $0x2d] sm:$0xff]  ;;  %v955_v38 = vand.u32 2147483648, %v5678_v59  ;;  %vm949_vm12 = vweird.f32 %v5678_v59 }
  0xed   : > { %v705_v4 = vld [vmem:[#allocation3 + $0x2e] sm:$0xff]  ;;  %636 = vst.msk [vmem:[#allocation3 + $0x38] sm:$0xff] %vm613_vm2, %v524_v63  ;;  %577 = vrot.lane.b32.xlu0 %v524_v63, %s5441_s12  ;;  %v932_v6 = vmul.f32 %v4991_v49, %v931_v61  ;;  %v670_v8 = vmul.f32 %v5609_v28, %v653_v3  ;;  %v5689_v9 = vadd.f32 %v819_v5, %v786_v62 }
  0xee   : > { %1170 = vst.msk [vmem:[#allocation4] sm:$0xff] %vm613_vm2, %v1154_v2  ;;  %v722_v12 = vmul.f32 %v5616_v30, %v705_v4  ;;  %v754_v13 = vld [vmem:[#allocation3 + $0x2f] sm:$0xff]  ;;  %v956_v55 = vor.u32 1.1754944e-38, %v955_v38 }
  0xef   : > { %v4995_v51 = vpop.eup %4994  ;;  %v933_v10 = vadd.f32 %v4991_v49, %v932_v6  ;;  %v689_v11 = vadd.f32 %v5614_v29, %v670_v8  ;;  %v4737_v16 = vmul.f32 -1.442695, %v5689_v9  ;;  %v803_v20 = vld [vmem:[#allocation3 + $0x30] sm:$0xff]  ;;  %v771_v22 = vmul.f32 %v5621_v35, %v754_v13 }
  0xf0   : > { %v5694_v15 = vadd.f32 1.0, %v4995_v51  ;;  %v820_v31 = vmul.f32 %v5625_v39, %v803_v20 }
  0xf1   : > { %v937_v17 = vsel %vm936_vm9, %v4991_v49, %v933_v10  ;;  %v738_v19 = vadd.f32 %v722_v12, %v689_v11 }
  0xf2   : > { %v4997_v21 = vpop.eup %4996  ;;  %v942_v23 = vsel %vm939_vm10, %v941_v14, %v937_v17  ;;  %4998 = vrcp.f32 %v5694_v15  ;;  %v968_v62 = vand.u32 2147483647, %v5694_v15  ;;  %v970_v63 = vand.u32 2147483648, %v5694_v15 }
  0xf3   : > { %v1155_v24 = vmul.f32 %v942_v23, %v5647_v0  ;;  %v945_v25 = vmul.f32 %v4997_v21, %v5678_v59  ;;  %v787_v27 = vadd.f32 %v771_v22, %v738_v19  ;;  %5000 = vpow2.f32 %v4737_v16 }
  0xf4   : > { %v526_v26 = vpop.f32.mrf.mxu0  ;;  %v654_v32 = vld [vmem:[#allocation3 + $0x35] sm:$0xff]  ;;  %v953_v0 = vand.u32 2147483647, %v5678_v59  ;;  %vm950_vm11 = vweird.f32 %v4997_v21  ;;  %vm964_vm0 = vweird.f32 %v5694_v15  ;;  %v971_v11 = vor.u32 1.1754944e-38, %v970_v63 }
  0xf5   : > { %v706_v33 = vld [vmem:[#allocation3 + $0x36] sm:$0xff]  ;;  %637 = vst.msk [vmem:[#allocation3 + $0x40] sm:$0xff] %vm613_vm2, %v526_v26  ;;  %579 = vrot.lane.b32.xlu1 %v526_v26, %s5441_s12  ;;  %v1186_v34 = vpack.c.bf16 %v1155_v24, %v1154_v2  ;;  %v946_v36 = vsub.f32 1.0, %v945_v25  ;;  %v671_v37 = vmul.f32 %v5609_v28, %v654_v32  ;;  %v5708_v40 = vadd.f32 %v820_v31, %v787_v27  ;;  %vm951_vm13 = vmor %vm949_vm12, %vm950_vm11 }
  0xf6   : > { %1171 = vst.msk [vmem:[#allocation4 + $0x8] sm:$0xff] %vm613_vm2, %v1155_v24  ;;  %v755_v42 = vld [vmem:[#allocation3 + $0x37] sm:$0xff]  ;;  %v723_v45 = vmul.f32 %v5616_v30, %v706_v33  ;;  %vm954_vm14 = vcmp.eq.f32.partialorder %v953_v0, 8.507059e+37  ;;  %vm969_vm4 = vcmp.eq.f32.partialorder %v968_v62, 8.507059e+37 }
  0xf7   : > { %4757 = vmatmul.msk.bf16.vlgmr.msra.gmra.mxu1 %vm613_vm2, %v1186_v34  ;;  %v947_v43 = vmul.f32 %v4997_v21, %v946_v36  ;;  %v690_v44 = vadd.f32 %v5614_v29, %v671_v37  ;;  %v4738_v47 = vmul.f32 -1.442695, %v5708_v40  ;;  %v772_v52 = vmul.f32 %v5621_v35, %v755_v42  ;;  %v804_v53 = vld [vmem:[#allocation3 + $0x38] sm:$0xff] }
  0xf8   : > { %v4999_v46 = vpop.eup %4998  ;;  %v821_v2 = vmul.f32 %v5625_v39, %v804_v53 }
  0xf9   : > { %v948_v48 = vadd.f32 %v4997_v21, %v947_v43  ;;  %v960_v49 = vmul.f32 %v4999_v46, %v5694_v15  ;;  %v739_v50 = vadd.f32 %v723_v45, %v690_v44  ;;  %v5001_v54 = vpop.eup %5000  ;;  %5002 = vpow2.f32 %v4738_v47 }
  0xfa   : > { %v5717_v58 = vadd.f32 1.0, %v5001_v54  ;;  %vm965_vm15 = vweird.f32 %v4999_v46 }
  0xfb   : > { %v952_v56 = vsel %vm951_vm13, %v4997_v21, %v948_v48  ;;  %v961_v57 = vsub.f32 1.0, %v960_v49  ;;  %v788_v60 = vadd.f32 %v772_v52, %v739_v50  ;;  %vm966_vm3 = vmor %vm964_vm0, %vm965_vm15 }
  0xfc   : > { %v529_v59 = vpop.f32.mrf.mxu0  ;;  %v957_v61 = vsel %vm954_vm14, %v956_v55, %v952_v56  ;;  %v655_v1 = vld [vmem:[#allocation3 + $0x3d] sm:$0xff]  ;;  %5004 = vrcp.f32 %v5717_v58  ;;  %v983_v36 = vand.u32 2147483647, %v5717_v58  ;;  %v985_v37 = vand.u32 2147483648, %v5717_v58 }
  0xfd   : > { %638 = vst.msk [vmem:[#allocation3 + $0x48] sm:$0xff] %vm613_vm2, %v529_v59  ;;  %581 = vrot.lane.b32.xlu2 %v529_v59, %s5441_s12  ;;  %v962_v3 = vmul.f32 %v4999_v46, %v961_v57  ;;  %v1156_v4 = vmul.f32 %v957_v61, %v5658_v18  ;;  %v707_v5 = vld [vmem:[#allocation3 + $0x3e] sm:$0xff]  ;;  %v672_v6 = vmul.f32 %v5609_v28, %v655_v1  ;;  %vm979_vm6 = vweird.f32 %v5717_v58 }
  0xfe   : > { %v756_v8 = vld [vmem:[#allocation3 + $0x3f] sm:$0xff]  ;;  %v5729_v51 = vadd.f32 %v821_v2, %v788_v60  ;;  %v724_v18 = vmul.f32 %v5616_v30, %v707_v5  ;;  %vm984_vm8 = vcmp.eq.f32.partialorder %v983_v36, 8.507059e+37  ;;  %v986_v53 = vor.u32 1.1754944e-38, %v985_v37 }
  0xff   : > { %v963_v7 = vadd.f32 %v4999_v46, %v962_v3  ;;  %1172 = vst.msk [vmem:[#allocation4 + $0x10] sm:$0xff] %vm613_vm2, %v1156_v4  ;;  %v5003_v10 = vpop.eup %5002  ;;  %v691_v12 = vadd.f32 %v5614_v29, %v672_v6  ;;  %v805_v16 = vld [vmem:[#allocation3 + $0x40] sm:$0xff]  ;;  %v773_v20 = vmul.f32 %v5621_v35, %v756_v8 }
 0x100   : > { %v5733_v14 = vadd.f32 1.0, %v5003_v10  ;;  %v4739_v17 = vmul.f32 -1.442695, %v5729_v51  ;;  %v822_v26 = vmul.f32 %v5625_v39, %v805_v16 }
 0x101   : > { %v967_v13 = vsel %vm966_vm3, %v4999_v46, %v963_v7  ;;  %v740_v19 = vadd.f32 %v724_v18, %v691_v12 }
 0x102   : > { %v972_v15 = vsel %vm969_vm4, %v971_v11, %v967_v13  ;;  %v5005_v21 = vpop.eup %5004  ;;  %5006 = vrcp.f32 %v5733_v14  ;;  %v998_v54 = vand.u32 2147483647, %v5733_v14  ;;  %v1000_v63 = vand.u32 2147483648, %v5733_v14 }
 0x103   : > { %v1157_v23 = vmul.f32 %v972_v15, %v5670_v41  ;;  %v975_v24 = vmul.f32 %v5005_v21, %v5717_v58  ;;  %v789_v25 = vadd.f32 %v773_v20, %v740_v19  ;;  %5008 = vpow2.f32 %v4739_v17 }
 0x104   : > { %v531_v22 = vpop.f32.mrf.mxu0  ;;  %v656_v27 = vld [vmem:[#allocation3 + $0x45] sm:$0xff]  ;;  %vm980_vm5 = vweird.f32 %v5005_v21  ;;  %vm994_vm10 = vweird.f32 %v5733_v14  ;;  %v1001_v12 = vor.u32 1.1754944e-38, %v1000_v63  ;;  %vm999_vm12 = vcmp.eq.f32.partialorder %v998_v54, 8.507059e+37 }
 0x105   : > { %v708_v31 = vld [vmem:[#allocation3 + $0x46] sm:$0xff]  ;;  %639 = vst.msk [vmem:[#allocation3 + $0x50] sm:$0xff] %vm613_vm2, %v531_v22  ;;  %583 = vrot.lane.b32.xlu0 %v531_v22, %s5441_s12  ;;  %v1187_v32 = vpack.c.bf16 %v1157_v23, %v1156_v4  ;;  %v673_v33 = vmul.f32 %v5609_v28, %v656_v27  ;;  %v976_v41 = vsub.f32 1.0, %v975_v24  ;;  %v5745_v34 = vadd.f32 %v822_v26, %v789_v25  ;;  %vm981_vm7 = vmor %vm979_vm6, %vm980_vm5 }
 0x106   : > { %1173 = vst.msk [vmem:[#allocation4 + $0x18] sm:$0xff] %vm613_vm2, %v1157_v23  ;;  %v725_v38 = vmul.f32 %v5616_v30, %v708_v31  ;;  %v757_v42 = vld [vmem:[#allocation3 + $0x47] sm:$0xff] }
 0x107   : > { %4758 = vmatmul.msk.bf16.gmra.mxu1 %vm613_vm2, %v1187_v32  ;;  %v692_v0 = vadd.f32 %v5614_v29, %v673_v33  ;;  %v977_v43 = vmul.f32 %v5005_v21, %v976_v41  ;;  %v4740_v44 = vmul.f32 -1.442695, %v5745_v34  ;;  %v774_v49 = vmul.f32 %v5621_v35, %v757_v42  ;;  %v806_v50 = vld [vmem:[#allocation3 + $0x48] sm:$0xff] }
 0x108   : > { %v5007_v45 = vpop.eup %5006  ;;  %v823_v2 = vmul.f32 %v5625_v39, %v806_v50 }
 0x109   : > { %v741_v46 = vadd.f32 %v725_v38, %v692_v0  ;;  %v978_v47 = vadd.f32 %v5005_v21, %v977_v43  ;;  %v990_v48 = vmul.f32 %v5007_v45, %v5733_v14  ;;  %5010 = vpow2.f32 %v4740_v44  ;;  %v5009_v52 = vpop.eup %5008 }
 0x10a   : > { %v5757_v60 = vadd.f32 1.0, %v5009_v52  ;;  %vm995_vm9 = vweird.f32 %v5007_v45 }
 0x10b   : > { %v982_v56 = vsel %vm981_vm7, %v5005_v21, %v978_v47  ;;  %v991_v57 = vsub.f32 1.0, %v990_v48  ;;  %v790_v61 = vadd.f32 %v774_v49, %v741_v46  ;;  %vm996_vm11 = vmor %vm994_vm10, %vm995_vm9 }
 0x10c   : > { %v534_v55 = vpop.f32.mrf.mxu0  ;;  %v657_v58 = vld [vmem:[#allocation3 + $0x4d] sm:$0xff]  ;;  %v987_v62 = vsel %vm984_vm8, %v986_v53, %v982_v56  ;;  %5012 = vrcp.f32 %v5757_v60  ;;  %v1013_v33 = vand.u32 2147483647, %v5757_v60  ;;  %v1015_v37 = vand.u32 2147483648, %v5757_v60 }
 0x10d   : > { %v709_v59 = vld [vmem:[#allocation3 + $0x4e] sm:$0xff]  ;;  %640 = vst.msk [vmem:[#allocation3 + $0x58] sm:$0xff] %vm613_vm2, %v534_v55  ;;  %585 = vrot.lane.b32.xlu1 %v534_v55, %s5441_s12  ;;  %v674_v1 = vmul.f32 %v5609_v28, %v657_v58  ;;  %v992_v3 = vmul.f32 %v5007_v45, %v991_v57  ;;  %v1158_v4 = vmul.f32 %v987_v62, %v5689_v9  ;;  %vm1009_vm14 = vweird.f32 %v5757_v60 }
 0x10e   : > { %v726_v6 = vmul.f32 %v5616_v30, %v709_v59  ;;  %v758_v7 = vld [vmem:[#allocation3 + $0x4f] sm:$0xff]  ;;  %v5770_v11 = vadd.f32 %v823_v2, %v790_v61  ;;  %vm5794_vm15 = vcmp.eq.f32.partialorder %v1013_v33, 8.507059e+37  ;;  %v1016_v53 = vor.u32 1.1754944e-38, %v1015_v37 }
 0x10f   : > { %v693_v5 = vadd.f32 %v5614_v29, %v674_v1  ;;  %v5011_v8 = vpop.eup %5010  ;;  %v993_v10 = vadd.f32 %v5007_v45, %v992_v3  ;;  %1174 = vst.msk [vmem:[#allocation4 + $0x20] sm:$0xff] %vm613_vm2, %v1158_v4  ;;  %v807_v13 = vld [vmem:[#allocation3 + $0x50] sm:$0xff]  ;;  %v775_v17 = vmul.f32 %v5621_v35, %v758_v7 }
 0x110   : > { %v5772_v18 = vadd.f32 1.0, %v5011_v8  ;;  %v4741_v15 = vmul.f32 -1.442695, %v5770_v11  ;;  %v824_v22 = vmul.f32 %v5625_v39, %v807_v13 }
 0x111   : > { %v742_v9 = vadd.f32 %v726_v6, %v693_v5  ;;  %v997_v16 = vsel %vm996_vm11, %v5007_v45, %v993_v10 }
 0x112   : > { %v1002_v19 = vsel %vm999_vm12, %v1001_v12, %v997_v16  ;;  %5014 = vrcp.f32 %v5772_v18  ;;  %v5013_v14 = vpop.eup %5012  ;;  %v1028_v55 = vand.u32 2147483647, %v5772_v18  ;;  %v1030_v58 = vand.u32 2147483648, %v5772_v18 }
 0x113   : > { %v1159_v21 = vmul.f32 %v1002_v19, %v5708_v40  ;;  %v791_v23 = vadd.f32 %v775_v17, %v742_v9  ;;  %5016 = vpow2.f32 %v4741_v15  ;;  %v1005_v26 = vmul.f32 %v5013_v14, %v5757_v60 }
 0x114   : > { %v536_v20 = vpop.f32.mrf.mxu0  ;;  %v658_v24 = vld [vmem:[#allocation3 + $0x55] sm:$0xff]  ;;  %vm1010_vm13 = vweird.f32 %v5013_v14  ;;  %vm1024_vm4 = vweird.f32 %v5772_v18  ;;  %v1031_v10 = vor.u32 1.1754944e-38, %v1030_v58  ;;  %vm1029_vm6 = vcmp.eq.f32.partialorder %v1028_v55, 8.507059e+37 }
 0x115   : > { %v710_v25 = vld [vmem:[#allocation3 + $0x56] sm:$0xff]  ;;  %641 = vst.msk [vmem:[#allocation3 + $0x60] sm:$0xff] %vm613_vm2, %v536_v20  ;;  %587 = vrot.lane.b32.xlu2 %v536_v20, %s5441_s12  ;;  %v675_v27 = vmul.f32 %v5609_v28, %v658_v24  ;;  %v1188_v31 = vpack.c.bf16 %v1159_v21, %v1158_v4  ;;  %v5784_v32 = vadd.f32 %v824_v22, %v791_v23  ;;  %v1006_v40 = vsub.f32 1.0, %v1005_v26  ;;  %vm1011_vm0 = vmor %vm1009_vm14, %vm1010_vm13 }
 0x116   : > { %1175 = vst.msk [vmem:[#allocation4 + $0x28] sm:$0xff] %vm613_vm2, %v1159_v21  ;;  %v727_v36 = vmul.f32 %v5616_v30, %v710_v25  ;;  %v759_v38 = vld [vmem:[#allocation3 + $0x57] sm:$0xff] }
 0x117   : > { %v694_v41 = vadd.f32 %v5614_v29, %v675_v27  ;;  %4759 = vmatmul.msk.bf16.gmra.mxu1 %vm613_vm2, %v1188_v31  ;;  %v4742_v0 = vmul.f32 -1.442695, %v5784_v32  ;;  %v1007_v43 = vmul.f32 %v5013_v14, %v1006_v40  ;;  %v776_v50 = vmul.f32 %v5621_v35, %v759_v38  ;;  %v808_v57 = vld [vmem:[#allocation3 + $0x58] sm:$0xff] }
 0x118   : > { %v5015_v42 = vpop.eup %5014  ;;  %v825_v3 = vmul.f32 %v5625_v39, %v808_v57 }
 0x119   : > { %v743_v44 = vadd.f32 %v727_v36, %v694_v41  ;;  %v5017_v45 = vpop.eup %5016  ;;  %v1020_v46 = vmul.f32 %v5015_v42, %v5772_v18  ;;  %5018 = vpow2.f32 %v4742_v0  ;;  %v1008_v47 = vadd.f32 %v5013_v14, %v1007_v43 }
 0x11a   : > { %v5798_v49 = vadd.f32 1.0, %v5017_v45  ;;  %vm1025_vm3 = vweird.f32 %v5015_v42 }
 0x11b   : > { %v1021_v54 = vsub.f32 1.0, %v1020_v46  ;;  %v1012_v60 = vsel %vm1011_vm0, %v5013_v14, %v1008_v47  ;;  %v792_v61 = vadd.f32 %v776_v50, %v743_v44  ;;  %vm1026_vm5 = vmor %vm1024_vm4, %vm1025_vm3 }
 0x11c   : > { %v539_v52 = vpop.f32.mrf.mxu0  ;;  %v659_v56 = vld [vmem:[#allocation3 + $0x5d] sm:$0xff]  ;;  %5020 = vrcp.f32 %v5798_v49  ;;  %v1017_v62 = vsel %vm5794_vm15, %v1016_v53, %v1012_v60  ;;  %v1043_v0 = vand.u32 2147483647, %v5798_v49  ;;  %vm1039_vm8 = vweird.f32 %v5798_v49 }
 0x11d   : > { %642 = vst.msk [vmem:[#allocation3 + $0x68] sm:$0xff] %vm613_vm2, %v539_v52  ;;  %589 = vrot.lane.b32.xlu0 %v539_v52, %s5441_s12  ;;  %v711_v59 = vld [vmem:[#allocation3 + $0x5e] sm:$0xff]  ;;  %v1022_v63 = vmul.f32 %v5015_v42, %v1021_v54  ;;  %v676_v1 = vmul.f32 %v5609_v28, %v659_v56  ;;  %v1160_v2 = vmul.f32 %v1017_v62, %v5729_v51  ;;  %vm848_vm15 = vcmask 256000  }
 0x11e   : > { %v728_v7 = vmul.f32 %v5616_v30, %v711_v59  ;;  %v760_v8 = vld [vmem:[#allocation3 + $0x5f] sm:$0xff]  ;;  %v5817_v9 = vadd.f32 %v825_v3, %v792_v61  ;;  %vm1044_vm10 = vcmp.eq.f32.partialorder %v1043_v0, 8.507059e+37 }
 0x11f   : > { %v5019_v4 = vpop.eup %5018  ;;  %v1023_v5 = vadd.f32 %v5015_v42, %v1022_v63  ;;  %v695_v6 = vadd.f32 %v5614_v29, %v676_v1  ;;  %1176 = vst.msk [vmem:[#allocation4 + $0x30] sm:$0xff] %vm613_vm2, %v1160_v2  ;;  %v809_v16 = vld [vmem:[#allocation3 + $0x60] sm:$0xff]  ;;  %v777_v18 = vmul.f32 %v5621_v35, %v760_v8 }
 0x120   : > { %v5815_v12 = vadd.f32 1.0, %v5019_v4  ;;  %v826_v24 = vmul.f32 %v5625_v39, %v809_v16  ;;  %v4743_v25 = vmul.f32 -1.442695, %v5817_v9 }
 0x121   : > { %v1027_v51 = vsel %vm1026_vm5, %v5015_v42, %v1023_v5  ;;  %v744_v13 = vadd.f32 %v728_v7, %v695_v6 }
 0x122   : > { %v5021_v17 = vpop.eup %5020  ;;  %v1032_v15 = vsel %vm1029_vm6, %v1031_v10, %v1027_v51  ;;  %5022 = vrcp.f32 %v5815_v12  ;;  %v1058_v55 = vand.u32 2147483647, %v5815_v12  ;;  %v1060_v58 = vand.u32 2147483648, %v5815_v12 }
 0x123   : > { %v1161_v14 = vmul.f32 %v1032_v15, %v5745_v34  ;;  %v1035_v20 = vmul.f32 %v5021_v17, %v5798_v49  ;;  %v793_v22 = vadd.f32 %v777_v18, %v744_v13  ;;  %v1045_v34 = vand.u32 2147483648, %v5798_v49 }
 0x124   : > { %v541_v19 = vpop.f32.mrf.mxu0  ;;  %v660_v21 = vld [vmem:[#allocation3 + $0x65] sm:$0xff]  ;;  %5024 = vpow2.f32 %v4743_v25  ;;  %vm1040_vm7 = vweird.f32 %v5021_v17  ;;  %vm1054_vm12 = vweird.f32 %v5815_v12  ;;  %vm1059_vm14 = vcmp.eq.f32.partialorder %v1058_v55, 8.507059e+37 }
 0x125   : > { %v712_v23 = vld [vmem:[#allocation3 + $0x66] sm:$0xff]  ;;  %643 = vst.msk [vmem:[#allocation3 + $0x70] sm:$0xff] %vm613_vm2, %v541_v19  ;;  %591 = vrot.lane.b32.xlu1 %v541_v19, %s5441_s12  ;;  %v677_v26 = vmul.f32 %v5609_v28, %v660_v21  ;;  %v1189_v27 = vpack.c.bf16 %v1161_v14, %v1160_v2  ;;  %v1036_v31 = vsub.f32 1.0, %v1035_v20  ;;  %v5830_v33 = vadd.f32 %v826_v24, %v793_v22  ;;  %vm1041_vm9 = vmor %vm1039_vm8, %vm1040_vm7 }
 0x126   : > { %1177 = vst.msk [vmem:[#allocation4 + $0x38] sm:$0xff] %vm613_vm2, %v1161_v14  ;;  %v761_v40 = vld [vmem:[#allocation3 + $0x67] sm:$0xff]  ;;  %v729_v36 = vmul.f32 %v5616_v30, %v712_v23  ;;  %v1046_v48 = vor.u32 1.1754944e-38, %v1045_v34 }
 0x127   : > { %v696_v41 = vadd.f32 %v5614_v29, %v677_v26  ;;  %4760 = vmatmul.msk.bf16.gmra.mxu1 %vm613_vm2, %v1189_v27  ;;  %v1037_v37 = vmul.f32 %v5021_v17, %v1036_v31  ;;  %v4744_v42 = vmul.f32 -1.442695, %v5830_v33  ;;  %v778_v44 = vmul.f32 %v5621_v35, %v761_v40  ;;  %v810_v47 = vld [vmem:[#allocation3 + $0x68] sm:$0xff] }
 0x128   : > { %v5023_v38 = vpop.eup %5022  ;;  %v827_v61 = vmul.f32 %v5625_v39, %v810_v47 }
 0x129   : > { %v745_v43 = vadd.f32 %v729_v36, %v696_v41  ;;  %v1038_v45 = vadd.f32 %v5021_v17, %v1037_v37  ;;  %v1050_v46 = vmul.f32 %v5023_v38, %v5815_v12  ;;  %5026 = vpow2.f32 %v4744_v42 }
 0x12a   : > { %v5025_v60 = vpop.eup %5024  ;;  %vm1055_vm11 = vweird.f32 %v5023_v38 }
 0x12b   : > { %v794_v50 = vadd.f32 %v778_v44, %v745_v43  ;;  %v1042_v53 = vsel %vm1041_vm9, %v5021_v17, %v1038_v45  ;;  %v1051_v54 = vsub.f32 1.0, %v1050_v46  ;;  %v5847_v1 = vadd.f32 1.0, %v5025_v60  ;;  %vm1056_vm13 = vmor %vm1054_vm12, %vm1055_vm11 }
 0x12c   : > { %v544_v52 = vpop.f32.mrf.mxu0  ;;  %v661_v56 = vld [vmem:[#allocation3 + $0x6d] sm:$0xff]  ;;  %v1047_v49 = vsel %vm1044_vm10, %v1046_v48, %v1042_v53 }
 0x12d   : > { %v713_v57 = vld [vmem:[#allocation3 + $0x6e] sm:$0xff]  ;;  %644 = vst.msk [vmem:[#allocation3 + $0x78] sm:$0xff] %vm613_vm2, %v544_v52  ;;  %593 = vrot.lane.b32.xlu2 %v544_v52, %s5441_s12  ;;  %v678_v59 = vmul.f32 %v5609_v28, %v661_v56  ;;  %v1052_v62 = vmul.f32 %v5023_v38, %v1051_v54  ;;  %v1162_v63 = vmul.f32 %v1047_v49, %v5770_v11  ;;  %5028 = vrcp.f32 %v5847_v1 }
 0x12e   : > { %v762_v2 = vld [vmem:[#allocation3 + $0x6f] sm:$0xff]  ;;  %v730_v5 = vmul.f32 %v5616_v30, %v713_v57  ;;  %v5851_v6 = vadd.f32 %v827_v61, %v794_v50  ;;  %v1061_v11 = vor.u32 1.1754944e-38, %v1060_v58  ;;  %v1073_v40 = vand.u32 2147483647, %v5847_v1 }
 0x12f   : > { %v566_v3 = vpop.permute.xlu0 %565  ;;  %v697_v4 = vadd.f32 %v5614_v29, %v678_v59  ;;  %v1053_v7 = vadd.f32 %v5023_v38, %v1052_v62  ;;  %v811_v8 = vld [vmem:[#allocation3 + $0x70] sm:$0xff]  ;;  %v5027_v10 = vpop.eup %5026  ;;  %1178 = vst.msk [vmem:[#allocation4 + $0x40] sm:$0xff] %vm613_vm2, %v1162_v63  ;;  %v779_v13 = vmul.f32 %v5621_v35, %v762_v2  ;;  %v1075_v41 = vand.u32 2147483648, %v5847_v1 }
 0x130   : > { %614 = vst.msk [vmem:[#allocation6] sm:$0xff] %vm613_vm2, %v566_v3  ;;  %v4745_v16 = vmul.f32 -1.442695, %v5851_v6  ;;  %v5859_v15 = vadd.f32 1.0, %v5027_v10  ;;  %v828_v12 = vmul.f32 %v5625_v39, %v811_v8  ;;  %vm1069_vm3 = vweird.f32 %v5847_v1 }
 0x131   : > { %v746_v51 = vadd.f32 %v730_v5, %v697_v4  ;;  %v1057_v17 = vsel %vm1056_vm13, %v5023_v38, %v1053_v7  ;;  %vm5884_vm4 = vcmp.eq.f32.partialorder %v1073_v40, 8.507059e+37  ;;  %v1076_v54 = vor.u32 1.1754944e-38, %v1075_v41 }
 0x132   : > { %v1062_v18 = vsel %vm1059_vm14, %v1061_v11, %v1057_v17  ;;  %5030 = vpow2.f32 %v4745_v16  ;;  %v1088_v59 = vand.u32 2147483647, %v5859_v15  ;;  %v1090_v61 = vand.u32 2147483648, %v5859_v15 }
 0x133   : > { %v795_v19 = vadd.f32 %v779_v13, %v746_v51  ;;  %v1163_v20 = vmul.f32 %v1062_v18, %v5784_v32  ;;  %5032 = vrcp.f32 %v5859_v15  ;;  %v5029_v25 = vpop.eup %5028  ;;  %vm1084_vm7 = vweird.f32 %v5859_v15 }
 0x134   : > { %v546_v14 = vpop.f32.mrf.mxu0  ;;  %v662_v21 = vld [vmem:[#allocation3 + $0x75] sm:$0xff]  ;;  %v1065_v32 = vmul.f32 %v5029_v25, %v5847_v1  ;;  %vm1070_vm0 = vweird.f32 %v5029_v25  ;;  %vm1089_vm9 = vcmp.eq.f32.partialorder %v1088_v59, 8.507059e+37  ;;  %v1091_v18 = vor.u32 1.1754944e-38, %v1090_v61 }
 0x135   : > { %645 = vst.msk [vmem:[#allocation3 + $0x80] sm:$0xff] %vm613_vm2, %v546_v14  ;;  %595 = vrot.lane.b32.xlu0 %v546_v14, %s5441_s12  ;;  %v5866_v23 = vadd.f32 %v828_v12, %v795_v19  ;;  %v679_v22 = vmul.f32 %v5609_v28, %v662_v21  ;;  %v714_v24 = vld [vmem:[#allocation3 + $0x76] sm:$0xff]  ;;  %v1190_v26 = vpack.c.bf16 %v1163_v20, %v1162_v63  ;;  %vm1071_vm5 = vmor %vm1069_vm3, %vm1070_vm0 }
 0x136   : > { %1179 = vst.msk [vmem:[#allocation4 + $0x48] sm:$0xff] %vm613_vm2, %v1163_v20  ;;  %v731_v37 = vmul.f32 %v5616_v30, %v714_v24  ;;  %v763_v0 = vld [vmem:[#allocation3 + $0x77] sm:$0xff]  ;;  %v1066_v42 = vsub.f32 1.0, %v1065_v32 }
 0x137   : > { %v568_v27 = vpop.permute.xlu0 %567  ;;  %v574_v31 = vpop.permute.xlu2 %573  ;;  %v4746_v34 = vmul.f32 -1.442695, %v5866_v23  ;;  %4761 = vmatmul.msk.bf16.gmra.mxu1 %vm613_vm2, %v1190_v26  ;;  %v698_v36 = vadd.f32 %v5614_v29, %v679_v22  ;;  %v780_v48 = vmul.f32 %v5621_v35, %v763_v0  ;;  %v812_v50 = vld [vmem:[#allocation3 + $0x78] sm:$0xff] }
 0x138   : > { %615 = vst.msk [vmem:[#allocation6 + $0x8] sm:$0xff] %vm613_vm2, %v568_v27  ;;  %v5031_v38 = vpop.eup %5030  ;;  %v1067_v46 = vmul.f32 %v5029_v25, %v1066_v42  ;;  %v829_v63 = vmul.f32 %v5625_v39, %v812_v50 }
 0x139   : > { %618 = vst.msk [vmem:[#allocation6 + $0x20] sm:$0xff] %vm613_vm2, %v574_v31  ;;  %5034 = vpow2.f32 %v4746_v34  ;;  %v5033_v43 = vpop.eup %5032  ;;  %v5879_v44 = vadd.f32 1.0, %v5031_v38  ;;  %v747_v45 = vadd.f32 %v731_v37, %v698_v36 }
 0x13a   : > { %v1080_v47 = vmul.f32 %v5033_v43, %v5859_v15  ;;  %v1068_v56 = vadd.f32 %v5029_v25, %v1067_v46  ;;  %vm1085_vm6 = vweird.f32 %v5033_v43 }
 0x13b   : > { %5036 = vrcp.f32 %v5879_v44  ;;  %v796_v58 = vadd.f32 %v780_v48, %v747_v45  ;;  %vm1086_vm8 = vmor %vm1084_vm7, %vm1085_vm6  ;;  %v1103_v24 = vand.u32 2147483647, %v5879_v44  ;;  %vm1099_vm11 = vweird.f32 %v5879_v44 }
 0x13c   : > { %v847_v52 = vld [vmem:[#allocation3 + $0x85] sm:$0x7]  ;;  %v663_v55 = vld [vmem:[#allocation3 + $0x7d] sm:$0xff]  ;;  %v1081_v57 = vsub.f32 1.0, %v1080_v47  ;;  %v1072_v4 = vsel %vm1071_vm5, %v5029_v25, %v1068_v56  ;;  %v1105_v25 = vand.u32 2147483648, %v5879_v44 }
 0x13d   : > { %849 = vst.msk [vmem:[#allocation3 + $0x5] sm:$0x7] %vm848_vm15, %v847_v52  ;;  %v680_v60 = vmul.f32 %v5609_v28, %v663_v55  ;;  %v715_v49 = vld [vmem:[#allocation3 + $0x7e] sm:$0xff]  ;;  %v1077_v8 = vsel %vm5884_vm4, %v1076_v54, %v1072_v4  ;;  %v5901_v51 = vadd.f32 %v829_v63, %v796_v58  ;;  %vm1104_vm13 = vcmp.eq.f32.partialorder %v1103_v24, 8.507059e+37 }
 0x13e   : > { %v764_v62 = vld [vmem:[#allocation3 + $0x7f] sm:$0xff]  ;;  %v1082_v5 = vmul.f32 %v5033_v43, %v1081_v57  ;;  %v732_v28 = vmul.f32 %v5616_v30, %v715_v49  ;;  %v1164_v16 = vmul.f32 %v1077_v8, %v5817_v9  ;;  %v1106_v40 = vor.u32 1.1754944e-38, %v1105_v25 }
 0x13f   : > { %v5035_v1 = vpop.eup %5034  ;;  %v570_v2 = vpop.permute.xlu1 %569  ;;  %v699_v7 = vadd.f32 %v5614_v29, %v680_v60  ;;  %v813_v11 = vld [vmem:[#allocation3 + $0x80] sm:$0xff]  ;;  %v781_v29 = vmul.f32 %v5621_v35, %v764_v62  ;;  %v4747_v9 = vmul.f32 -1.442695, %v5901_v51 }
 0x140   : > { %v576_v3 = vpop.permute.xlu2 %575  ;;  %616 = vst.msk [vmem:[#allocation6 + $0x10] sm:$0xff] %vm613_vm2, %v570_v2  ;;  %v911_v10 = vadd.f32 1.0, %v5035_v1  ;;  %v1083_v13 = vadd.f32 %v5033_v43, %v1082_v5  ;;  %v830_v14 = vmul.f32 %v5625_v39, %v813_v11  ;;  %v1435_v5 = vld [vmem:[%s7268_s5] sm:$0xf] }
 0x141   : > { %619 = vst.msk [vmem:[#allocation6 + $0x28] sm:$0xff] %vm613_vm2, %v576_v3  ;;  %v748_v17 = vadd.f32 %v732_v28, %v699_v7  ;;  %v5037_v30 = vpop.eup %5036 }
 0x142   : > { %5038 = vrcp.f32 %v911_v10  ;;  %v1087_v19 = vsel %vm1086_vm8, %v5033_v43, %v1083_v13  ;;  %1180 = vst.msk [vmem:[#allocation4 + $0x50] sm:$0xff] %vm613_vm2, %v1164_v16  ;;  %v1095_v15 = vmul.f32 %v5037_v30, %v5879_v44  ;;  %vm1100_vm10 = vweird.f32 %v5037_v30 }
 0x143   : > { %v797_v12 = vadd.f32 %v781_v29, %v748_v17  ;;  %v1092_v20 = vsel %vm1089_vm9, %v1091_v18, %v1087_v19  ;;  %5040 = vpow2.f32 %v4747_v9  ;;  %vm1101_vm12 = vmor %vm1099_vm11, %vm1100_vm10  ;;  %v1118_v38 = vand.u32 2147483647, %v911_v10 }
 0x144   : > { %v1165_v21 = vmul.f32 %v1092_v20, %v5830_v33  ;;  %v1096_v35 = vsub.f32 1.0, %v1095_v15  ;;  %v1120_v42 = vand.u32 2147483648, %v911_v10  ;;  %vm1114_vm0 = vweird.f32 %v911_v10 }
 0x145   : > { %v5912_v22 = vadd.f32 %v830_v14, %v797_v12  ;;  %vm1119_vm4 = vcmp.eq.f32.partialorder %v1118_v38, 8.507059e+37  ;;  %vm1465_vm9 = vcmask 1043456  }
 0x146   : > { %1181 = vst.msk [vmem:[#allocation4 + $0x58] sm:$0xff] %vm613_vm2, %v1165_v21  ;;  %v1191_v27 = vpack.c.bf16 %v1165_v21, %v1164_v16  ;;  %v1097_v31 = vmul.f32 %v5037_v30, %v1096_v35  ;;  %v1121_v44 = vor.u32 1.1754944e-38, %v1120_v42  ;;  %v1467_v28 = vsel %vm1465_vm9, %v1435_v5, 0 }
 0x147   : > { %v572_v26 = vpop.permute.xlu1 %571  ;;  %v4748_v39 = vmul.f32 -1.442695, %v5912_v22  ;;  %1476 = vmatpush.bf16.msra.mxu2 %v1467_v28 }
 0x148   : > { %v5039_v32 = vpop.eup %5038  ;;  %617 = vst.msk [vmem:[#allocation6 + $0x18] sm:$0xff] %vm613_vm2, %v572_v26  ;;  %4762 = vmatmul.msk.bf16.gmra.mxu1 %vm613_vm2, %v1191_v27  ;;  %v1098_v33 = vadd.f32 %v5037_v30, %v1097_v31 }
 0x149   : > { %v1110_v34 = vmul.f32 %v5039_v32, %v911_v10  ;;  %5042 = vpow2.f32 %v4748_v39  ;;  %v5041_v37 = vpop.eup %5040  ;;  %vm1115_vm14 = vweird.f32 %v5039_v32 }
 0x14a   : > { %v1102_v41 = vsel %vm1101_vm12, %v5037_v30, %v1098_v33  ;;  %v912_v46 = vadd.f32 1.0, %v5041_v37  ;;  %vm1116_vm3 = vmor %vm1114_vm0, %vm1115_vm14  ;;  %vm1440_vm14 = vcmask 64512  }
 0x14b   : > { %v1111_v36 = vsub.f32 1.0, %v1110_v34  ;;  %v1107_v0 = vsel %vm1104_vm13, %v1106_v40, %v1102_v41 }
 0x14c   : > { %v1166_v45 = vmul.f32 %v1107_v0, %v5851_v6  ;;  %5044 = vrcp.f32 %v912_v46  ;;  %v1135_v58 = vand.u32 2147483648, %v912_v46  ;;  %v1133_v62 = vand.u32 2147483647, %v912_v46 }
 0x14d   : > { %v1112_v43 = vmul.f32 %v5039_v32, %v1111_v36  ;;  %vm1129_vm6 = vweird.f32 %v912_v46 }
 0x14e   : > { %1182 = vst.msk [vmem:[#allocation4 + $0x60] sm:$0xff] %vm613_vm2, %v1166_v45  ;;  %vm1134_vm10 = vcmp.eq.f32.partialorder %v1133_v62, 8.507059e+37 }
 0x14f   : > { %v5043_v47 = vpop.eup %5042  ;;  %v1113_v48 = vadd.f32 %v5039_v32, %v1112_v43 }
 0x150   : > { %v913_v50 = vadd.f32 1.0, %v5043_v47 }
 0x151   : > { %v1117_v52 = vsel %vm1116_vm3, %v5039_v32, %v1113_v48 }
 0x152   : > { %v1122_v53 = vsel %vm1119_vm4, %v1121_v44, %v1117_v52  ;;  %5046 = vrcp.f32 %v913_v50  ;;  %v5045_v55 = vpop.eup %5044  ;;  %v1150_v2 = vand.u32 2147483648, %v913_v50  ;;  %v1148_v4 = vand.u32 2147483647, %v913_v50 }
 0x153   : > { %v1167_v54 = vmul.f32 %v1122_v53, %v5866_v23  ;;  %v1125_v56 = vmul.f32 %v5045_v55, %v912_v46  ;;  %vm1130_vm5 = vweird.f32 %v5045_v55  ;;  %v1136_v23 = vor.u32 1.1754944e-38, %v1135_v58 }
 0x154   : > { %vm1131_vm7 = vmor %vm1129_vm6, %vm1130_vm5  ;;  %vm1144_vm11 = vweird.f32 %v913_v50  ;;  %v1151_v13 = vor.u32 1.1754944e-38, %v1150_v2  ;;  %vm1149_vm13 = vcmp.eq.f32.partialorder %v1148_v4, 8.507059e+37 }
 0x155   : > { %1183 = vst.msk [vmem:[#allocation4 + $0x68] sm:$0xff] %vm613_vm2, %v1167_v54  ;;  %v1192_v6 = vpack.c.bf16 %v1167_v54, %v1166_v45  ;;  %v1126_v49 = vsub.f32 1.0, %v1125_v56 }
 0x157   : > { %v582_v57 = vpop.permute.xlu2 %581  ;;  %v1127_v61 = vmul.f32 %v5045_v55, %v1126_v49  ;;  %v5996_v49 = vld [vmem:[%s7269_s6] ss:$0 sm:$0xff] }
 0x158   : > { %v5047_v60 = vpop.eup %5046  ;;  %622 = vst.msk [vmem:[#allocation6 + $0x40] sm:$0xff] %vm613_vm2, %v582_v57  ;;  %4763 = vmatmul.msk.bf16.gmra.mxu1 %vm613_vm2, %v1192_v6 }
 0x159   : > { %v1140_v59 = vmul.f32 %v5047_v60, %v913_v50  ;;  %v1128_v1 = vadd.f32 %v5045_v55, %v1127_v61  ;;  %vm1145_vm8 = vweird.f32 %v5047_v60 }
 0x15a   : > { %vm1146_vm12 = vmor %vm1144_vm11, %vm1145_vm8 }
 0x15b   : > { %v1141_v63 = vsub.f32 1.0, %v1140_v59  ;;  %v1132_v7 = vsel %vm1131_vm7, %v5045_v55, %v1128_v1 }
 0x15c   : > { %v1137_v10 = vsel %vm1134_vm10, %v1136_v23, %v1132_v7 }
 0x15d   : > { %v1142_v3 = vmul.f32 %v5047_v60, %v1141_v63  ;;  %v1168_v16 = vmul.f32 %v1137_v10, %v5901_v51 }
 0x15f   : > { %v578_v8 = vpop.permute.xlu0 %577  ;;  %v1143_v11 = vadd.f32 %v5047_v60, %v1142_v3  ;;  %1184 = vst.msk [vmem:[#allocation4 + $0x70] sm:$0xff] %vm613_vm2, %v1168_v16 }
 0x160   : > { %620 = vst.msk [vmem:[#allocation6 + $0x30] sm:$0xff] %vm613_vm2, %v578_v8 }
 0x161   : > { %v1147_v17 = vsel %vm1146_vm12, %v5047_v60, %v1143_v11 }
 0x162   : > { %v1152_v29 = vsel %vm1149_vm13, %v1151_v13, %v1147_v17 }
 0x163   : > { %v1169_v30 = vmul.f32 %v1152_v29, %v5912_v22 }
 0x165   : > { %1185 = vst.msk [vmem:[#allocation4 + $0x78] sm:$0xff] %vm613_vm2, %v1169_v30  ;;  %v1193_v18 = vpack.c.bf16 %v1169_v30, %v1168_v16 }
 0x167   : > { %v580_v19 = vpop.permute.xlu1 %579 }
 0x168   : > { %621 = vst.msk [vmem:[#allocation6 + $0x38] sm:$0xff] %vm613_vm2, %v580_v19  ;;  %4764 = vmatmul.msk.bf16.gmra.mxu1 %vm613_vm2, %v1193_v18 }
 0x16f   : > { %v588_v15 = vpop.permute.xlu2 %587 }
 0x170   : > { %625 = vst.msk [vmem:[#allocation6 + $0x58] sm:$0xff] %vm613_vm2, %v588_v15 }
 0x174   : > { %v1243_v12 = vpop.f32.mrf.mxu1 }
 0x175   : > { %1299 = vrot.lane.b32.xlu1 %v1243_v12, %s5442_s28  ;;  %1363 = vrot.lane.b32.xlu2 %v1243_v12, %s5443_s30 }
 0x177   : > { %v584_v51 = vpop.permute.xlu0 %583 }
 0x178   : > { %623 = vst.msk [vmem:[#allocation6 + $0x48] sm:$0xff] %vm613_vm2, %v584_v51 }
 0x17c   : > { %v1245_v14 = vpop.f32.mrf.mxu1 }
 0x17d   : > { %v1427_v20 = vpack.c.bf16 %v1245_v14, %v1243_v12  ;;  %1301 = vrot.lane.b32.xlu2 %v1245_v14, %s5442_s28  ;;  %1365 = vrot.lane.b32.xlu0 %v1245_v14, %s5443_s30 }
 0x17f   : > { %4765 = vmatmul.msk.bf16.vlgmr.msra.gmra.mxu2 %vm1440_vm14, %v1427_v20  ;;  %v586_v9 = vpop.permute.xlu1 %585 }
 0x180   : > { %624 = vst.msk [vmem:[#allocation6 + $0x50] sm:$0xff] %vm613_vm2, %v586_v9 }
 0x184   : > { %v1248_v21 = vpop.f32.mrf.mxu1 }
 0x185   : > { %1367 = vrot.lane.b32.xlu1 %v1248_v21, %s5443_s30  ;;  %1303 = vrot.lane.b32.xlu0 %v1248_v21, %s5442_s28 }
 0x187   : > { %v594_v35 = vpop.permute.xlu2 %593 }
 0x188   : > { %628 = vst.msk [vmem:[#allocation6 + $0x70] sm:$0xff] %vm613_vm2, %v594_v35 }
 0x18c   : > { %v1250_v22 = vpop.f32.mrf.mxu1 }
 0x18d   : > { %v1428_v24 = vpack.c.bf16 %v1250_v22, %v1248_v21  ;;  %1305 = vrot.lane.b32.xlu1 %v1250_v22, %s5442_s28  ;;  %1369 = vrot.lane.b32.xlu2 %v1250_v22, %s5443_s30 }
 0x18f   : > { %4766 = vmatmul.msk.bf16.gmra.mxu2 %vm1440_vm14, %v1428_v24  ;;  %v590_v25 = vpop.permute.xlu0 %589 }
 0x190   : > { %626 = vst.msk [vmem:[#allocation6 + $0x60] sm:$0xff] %vm613_vm2, %v590_v25 }
 0x194   : > { %v1253_v26 = vpop.f32.mrf.mxu1 }
 0x195   : > { %1307 = vrot.lane.b32.xlu2 %v1253_v26, %s5442_s28  ;;  %1371 = vrot.lane.b32.xlu0 %v1253_v26, %s5443_s30 }
 0x197   : > { %v592_v27 = vpop.permute.xlu1 %591 }
 0x198   : > { %627 = vst.msk [vmem:[#allocation6 + $0x68] sm:$0xff] %vm613_vm2, %v592_v27 }
 0x19c   : > { %v1255_v31 = vpop.f32.mrf.mxu1 }
 0x19d   : > { %v1429_v39 = vpack.c.bf16 %v1255_v31, %v1253_v26  ;;  %1373 = vrot.lane.b32.xlu1 %v1255_v31, %s5443_s30  ;;  %1309 = vrot.lane.b32.xlu0 %v1255_v31, %s5442_s28 }
 0x19f   : > { %4767 = vmatmul.msk.bf16.gmra.mxu2 %vm1440_vm14, %v1429_v39 }
 0x1a4   : > { %v1258_v32 = vpop.f32.mrf.mxu1 }
 0x1a5   : > { %1311 = vrot.lane.b32.xlu1 %v1258_v32, %s5442_s28  ;;  %1375 = vrot.lane.b32.xlu2 %v1258_v32, %s5443_s30 }
 0x1a7   : > { %v596_v33 = vpop.permute.xlu0 %595 }
 0x1a8   : > { %629 = vst.msk [vmem:[#allocation6 + $0x78] sm:$0xff] %vm613_vm2, %v596_v33 }
 0x1ac   : > { %v1260_v34 = vpop.f32.mrf.mxu1 }
 0x1ad   : > { %v1430_v40 = vpack.c.bf16 %v1260_v34, %v1258_v32  ;;  %1313 = vrot.lane.b32.xlu2 %v1260_v34, %s5442_s28  ;;  %1377 = vrot.lane.b32.xlu0 %v1260_v34, %s5443_s30 }
 0x1af   : > { %4768 = vmatmul.msk.bf16.gmra.mxu2 %vm1440_vm14, %v1430_v40 }
 0x1b4   : > { %v1263_v41 = vpop.f32.mrf.mxu1 }
 0x1b5   : > { %1379 = vrot.lane.b32.xlu1 %v1263_v41, %s5443_s30  ;;  %1315 = vrot.lane.b32.xlu0 %v1263_v41, %s5442_s28 }
 0x1bc   : > { %v1265_v36 = vpop.f32.mrf.mxu1 }
 0x1bd   : > { %v1431_v37 = vpack.c.bf16 %v1265_v36, %v1263_v41  ;;  %1317 = vrot.lane.b32.xlu1 %v1265_v36, %s5442_s28  ;;  %1381 = vrot.lane.b32.xlu2 %v1265_v36, %s5443_s30 }
 0x1bf   : > { %4769 = vmatmul.msk.bf16.gmra.mxu2 %vm1440_vm14, %v1431_v37 }
 0x1c5   : > { %v1268_v0 = vpop.f32.mrf.mxu1 }
 0x1c6   : > { %1319 = vrot.lane.b32.xlu2 %v1268_v0, %s5442_s28  ;;  %1383 = vrot.lane.b32.xlu0 %v1268_v0, %s5443_s30 }
 0x1cd   : > { %v1270_v38 = vpop.f32.mrf.mxu1 }
 0x1ce   : > { %v1432_v42 = vpack.c.bf16 %v1270_v38, %v1268_v0  ;;  %1385 = vrot.lane.b32.xlu1 %v1270_v38, %s5443_s30  ;;  %1321 = vrot.lane.b32.xlu0 %v1270_v38, %s5442_s28 }
 0x1cf   : > { %v1364_v43 = vpop.permute.xlu2 %1363 }
 0x1d0   : > { %1411 = vst.msk [vmem:[#allocation9] sm:$0xff] %vm475_vm1, %v1364_v43  ;;  %4770 = vmatmul.msk.bf16.gmra.mxu2 %vm1440_vm14, %v1432_v42 }
 0x1d5   : > { %v1273_v45 = vpop.f32.mrf.mxu1 }
 0x1d6   : > { %1323 = vrot.lane.b32.xlu1 %v1273_v45, %s5442_s28  ;;  %1387 = vrot.lane.b32.xlu2 %v1273_v45, %s5443_s30 }
 0x1d7   : > { %v1302_v46 = vpop.permute.xlu2 %1301 }
 0x1d8   : > { %1348 = vst.msk [vmem:[#allocation8 + $0x8] sm:$0xff] %vm475_vm1, %v1302_v46 }
 0x1dd   : > { %v1275_v47 = vpop.f32.mrf.mxu1 }
 0x1de   : > { %v1433_v48 = vpack.c.bf16 %v1275_v47, %v1273_v45  ;;  %1325 = vrot.lane.b32.xlu2 %v1275_v47, %s5442_s28 }
 0x1e0   : > { %4771 = vmatmul.msk.bf16.gmra.mxu2 %vm1440_vm14, %v1433_v48 }
 0x1e5   : > { %v1278_v44 = vpop.f32.mrf.mxu1 }
 0x1e6   : > { %1327 = vrot.lane.b32.xlu0 %v1278_v44, %s5442_s28 }
 0x1e7   : > { %v1300_v50 = vpop.permute.xlu1 %1299  ;;  %v1370_v52 = vpop.permute.xlu2 %1369 }
 0x1e8   : > { %1347 = vst.msk [vmem:[#allocation8] sm:$0xff] %vm475_vm1, %v1300_v50 }
 0x1e9   : > { %1414 = vst.msk [vmem:[#allocation9 + $0x18] sm:$0xff] %vm475_vm1, %v1370_v52 }
 0x1ed   : > { %v1280_v53 = vpop.f32.mrf.mxu1 }
 0x1ee   : > { %v1434_v54 = vpack.c.bf16 %v1280_v53, %v1278_v44  ;;  %1389 = vrot.lane.b32.xlu0 %v1275_v47, %s5443_s30  ;;  %1393 = vrot.lane.b32.xlu2 %v1280_v53, %s5443_s30 }
 0x1ef   : > { %v1366_v55 = vpop.permute.xlu0 %1365  ;;  %1329 = vrot.lane.b32.xlu1 %v1280_v53, %s5442_s28  ;;  %v1308_v6 = vpop.permute.xlu2 %1307 }
 0x1f0   : > { %1412 = vst.msk [vmem:[#allocation9 + $0x8] sm:$0xff] %vm475_vm1, %v1366_v55  ;;  %4772 = vmatmul.msk.bf16.gmra.mxu2 %vm1440_vm14, %v1434_v54 }
 0x1f1   : > { %1351 = vst.msk [vmem:[#allocation8 + $0x20] sm:$0xff] %vm475_vm1, %v1308_v6 }
 0x1f7   : > { %v1368_v56 = vpop.permute.xlu1 %1367  ;;  %v1304_v57 = vpop.permute.xlu0 %1303  ;;  %1391 = vrot.lane.b32.xlu1 %v1278_v44, %s5443_s30 }
 0x1f8   : > { %1413 = vst.msk [vmem:[#allocation9 + $0x10] sm:$0xff] %vm475_vm1, %v1368_v56 }
 0x1f9   : > { %1349 = vst.msk [vmem:[#allocation8 + $0x10] sm:$0xff] %vm475_vm1, %v1304_v57 }
 0x1ff   : > { %v1306_v60 = vpop.permute.xlu1 %1305  ;;  %v1376_v58 = vpop.permute.xlu2 %1375 }
 0x200   : > { %1350 = vst.msk [vmem:[#allocation8 + $0x18] sm:$0xff] %vm475_vm1, %v1306_v60 }
 0x201   : > { %1417 = vst.msk [vmem:[#allocation9 + $0x30] sm:$0xff] %vm475_vm1, %v1376_v58 }
 0x202   : > { %v1478_v59 = vpop.f32.mrf.mxu2 }
 0x203   : > { %v1479_v61 = vadd.f32 %v5996_v49, %v1478_v59 }
 0x205   : > { %v1566_v62 = vand.u32 2147483647, %v1479_v61  ;;  %v1518_v27 = vmax.f32 %v1479_v61, 0.0  ;;  %vm1534_vm3 = vcmp.ne.f32.partialorder %v1479_v61, %v1479_v61 }
 0x207   : > { %v1582_v63 = vsub.f32 0.0, %v1566_v62  ;;  %v1314_v1 = vpop.permute.xlu2 %1313  ;;  %v1372_v23 = vpop.permute.xlu0 %1371 }
 0x208   : > { %1354 = vst.msk [vmem:[#allocation8 + $0x38] sm:$0xff] %vm475_vm1, %v1314_v1 }
 0x209   : > { %v1598_v2 = vmul.f32 1.442695, %v1582_v63  ;;  %1415 = vst.msk [vmem:[#allocation9 + $0x20] sm:$0xff] %vm475_vm1, %v1372_v23 }
 0x20a   : > { %v1480_v3 = vpop.f32.mrf.mxu2 }
 0x20b   : > { %5048 = vpow2.f32 %v1598_v2  ;;  %v6004_v4 = vadd.f32 %v5996_v49, %v1480_v3 }
 0x20d   : > { %v1567_v5 = vand.u32 2147483647, %v6004_v4  ;;  %v1519_v44 = vmax.f32 %v6004_v4, 0.0  ;;  %vm1535_vm5 = vcmp.ne.f32.partialorder %v6004_v4, %v6004_v4 }
 0x20f   : > { %v1583_v7 = vsub.f32 0.0, %v1567_v5  ;;  %v1374_v28 = vpop.permute.xlu1 %1373  ;;  %v1310_v8 = vpop.permute.xlu0 %1309 }
 0x210   : > { %1416 = vst.msk [vmem:[#allocation9 + $0x28] sm:$0xff] %vm475_vm1, %v1374_v28 }
 0x211   : > { %v5049_v10 = vpop.eup %5048  ;;  %v1600_v11 = vmul.f32 1.442695, %v1583_v7  ;;  %1352 = vst.msk [vmem:[#allocation8 + $0x28] sm:$0xff] %vm475_vm1, %v1310_v8 }
 0x212   : > { %v1630_v13 = vadd.f32 1.0, %v5049_v10  ;;  %v1633_v16 = vmul.f32 -0.5, %v5049_v10  ;;  %v1483_v17 = vpop.f32.mrf.mxu2  ;;  %v1636_v15 = vand.u32 2147483647, %v5049_v10 }
 0x213   : > { %5050 = vpow2.f32 %v1600_v11  ;;  %v6010_v29 = vadd.f32 %v5996_v49, %v1483_v17 }
 0x214   : > { %5052 = vlog2.f32 %v1630_v13  ;;  %v1634_v18 = vadd.f32 1.0, %v1633_v16  ;;  %vm1637_vm0 = vcmp.lt.f32.partialorder %v1636_v15, 0.0004427343 }
 0x215   : > { %v1568_v30 = vand.u32 2147483647, %v6010_v29  ;;  %vm1536_vm7 = vcmp.ne.f32.partialorder %v6010_v29, %v6010_v29 }
 0x216   : > { %v1635_v21 = vmul.f32 %v5049_v10, %v1634_v18 }
 0x217   : > { %v1584_v19 = vsub.f32 0.0, %v1568_v30  ;;  %v1312_v12 = vpop.permute.xlu1 %1311  ;;  %v1382_v51 = vpop.permute.xlu2 %1381 }
 0x218   : > { %1353 = vst.msk [vmem:[#allocation8 + $0x30] sm:$0xff] %vm475_vm1, %v1312_v12 }
 0x219   : > { %v5051_v14 = vpop.eup %5050  ;;  %v1602_v20 = vmul.f32 1.442695, %v1584_v19  ;;  %1420 = vst.msk [vmem:[#allocation9 + $0x48] sm:$0xff] %vm475_vm1, %v1382_v51 }
 0x21a   : > { %v5053_v9 = vpop.eup %5052  ;;  %v1639_v35 = vadd.f32 1.0, %v5051_v14  ;;  %v1485_v22 = vpop.f32.mrf.mxu2  ;;  %v1642_v25 = vmul.f32 -0.5, %v5051_v14  ;;  %v1645_v41 = vand.u32 2147483647, %v5051_v14 }
 0x21b   : > { %v1632_v24 = vmul.f32 0.6931472, %v5053_v9  ;;  %5054 = vpow2.f32 %v1602_v20  ;;  %v6016_v26 = vadd.f32 %v5996_v49, %v1485_v22 }
 0x21c   : > { %5056 = vlog2.f32 %v1639_v35  ;;  %v1643_v33 = vadd.f32 1.0, %v1642_v25  ;;  %vm1646_vm4 = vcmp.lt.f32.partialorder %v1645_v41, 0.0004427343 }
 0x21d   : > { %v1638_v31 = vsel %vm1637_vm0, %v1635_v21, %v1632_v24  ;;  %v1569_v39 = vand.u32 2147483647, %v6016_v26  ;;  %v1521_v20 = vmax.f32 %v6016_v26, 0.0  ;;  %vm1537_vm10 = vcmp.ne.f32.partialorder %v6016_v26, %v6016_v26 }
 0x21e   : > { %v1774_v32 = vadd.f32 %v1638_v31, %v1518_v27  ;;  %v1644_v46 = vmul.f32 %v5051_v14, %v1643_v33 }
 0x21f   : > { %v1585_v34 = vsub.f32 0.0, %v1569_v39  ;;  %v1378_v36 = vpop.permute.xlu0 %1377 }
 0x220   : > { %v1790_v40 = vsel %vm1534_vm3, %v1479_v61, %v1774_v32  ;;  %v1320_v38 = vpop.permute.xlu2 %1319  ;;  %1418 = vst.msk [vmem:[#allocation9 + $0x38] sm:$0xff] %vm475_vm1, %v1378_v36 }
 0x221   : > { %v5055_v37 = vpop.eup %5054  ;;  %1806 = vst.msk [vmem:[#allocation5] sm:$0xff] %vm613_vm2, %v1790_v40  ;;  %v1604_v0 = vmul.f32 1.442695, %v1585_v34 }
 0x222   : > { %v5057_v42 = vpop.eup %5056  ;;  %v1648_v43 = vadd.f32 1.0, %v5055_v37  ;;  %1357 = vst.msk [vmem:[#allocation8 + $0x50] sm:$0xff] %vm475_vm1, %v1320_v38  ;;  %v1651_v47 = vmul.f32 -0.5, %v5055_v37  ;;  %v1488_v48 = vpop.f32.mrf.mxu2  ;;  %v1654_v56 = vand.u32 2147483647, %v5055_v37 }
 0x223   : > { %v1641_v45 = vmul.f32 0.6931472, %v5057_v42  ;;  %5058 = vpow2.f32 %v1604_v0  ;;  %v6024_v50 = vadd.f32 %v5996_v49, %v1488_v48 }
 0x224   : > { %5060 = vlog2.f32 %v1648_v43  ;;  %v1652_v54 = vadd.f32 1.0, %v1651_v47  ;;  %vm1655_vm6 = vcmp.lt.f32.partialorder %v1654_v56, 0.0004427343 }
 0x225   : > { %v1647_v52 = vsel %vm1646_vm4, %v1644_v46, %v1641_v45  ;;  %v1570_v55 = vand.u32 2147483647, %v6024_v50  ;;  %v1522_v43 = vmax.f32 %v6024_v50, 0.0  ;;  %vm1538_vm12 = vcmp.ne.f32.partialorder %v6024_v50, %v6024_v50 }
 0x226   : > { %v1775_v53 = vadd.f32 %v1647_v52, %v1519_v44  ;;  %v1653_v1 = vmul.f32 %v5055_v37, %v1652_v54 }
 0x227   : > { %v1380_v57 = vpop.permute.xlu1 %1379  ;;  %v1316_v60 = vpop.permute.xlu0 %1315  ;;  %v1586_v59 = vsub.f32 0.0, %v1570_v55 }
 0x228   : > { %v1791_v6 = vsel %vm1535_vm5, %v6004_v4, %v1775_v53  ;;  %1419 = vst.msk [vmem:[#allocation9 + $0x40] sm:$0xff] %vm475_vm1, %v1380_v57  ;;  %v1520_v4 = vmax.f32 %v6010_v29, 0.0 }
 0x229   : > { %v5059_v58 = vpop.eup %5058  ;;  %1807 = vst.msk [vmem:[#allocation5 + $0x8] sm:$0xff] %vm613_vm2, %v1791_v6  ;;  %v1606_v2 = vmul.f32 1.442695, %v1586_v59 }
 0x22a   : > { %v5061_v61 = vpop.eup %5060  ;;  %v1657_v62 = vadd.f32 1.0, %v5059_v58  ;;  %v1660_v23 = vmul.f32 -0.5, %v5059_v58  ;;  %1355 = vst.msk [vmem:[#allocation8 + $0x40] sm:$0xff] %vm475_vm1, %v1316_v60  ;;  %v1490_v3 = vpop.f32.mrf.mxu2  ;;  %v1663_v13 = vand.u32 2147483647, %v5059_v58 }
 0x22b   : > { %v1650_v63 = vmul.f32 0.6931472, %v5061_v61  ;;  %v6035_v5 = vadd.f32 %v5996_v49, %v1490_v3 }
 0x22c   : > { %5062 = vlog2.f32 %v1657_v62  ;;  %v1661_v8 = vadd.f32 1.0, %v1660_v23  ;;  %vm1664_vm8 = vcmp.lt.f32.partialorder %v1663_v13, 0.0004427343 }
 0x22d   : > { %v1656_v7 = vsel %vm1655_vm6, %v1653_v1, %v1650_v63  ;;  %5064 = vpow2.f32 %v1606_v2  ;;  %v1571_v10 = vand.u32 2147483647, %v6035_v5  ;;  %vm1539_vm0 = vcmp.ne.f32.partialorder %v6035_v5, %v6035_v5 }
 0x22e   : > { %v1776_v28 = vadd.f32 %v1656_v7, %v1520_v4  ;;  %v1662_v12 = vmul.f32 %v5059_v58, %v1661_v8 }
 0x22f   : > { %v1318_v16 = vpop.permute.xlu1 %1317  ;;  %v1587_v17 = vsub.f32 0.0, %v1571_v10 }
 0x230   : > { %v1792_v11 = vsel %vm1536_vm7, %v6010_v29, %v1776_v28  ;;  %v1388_v30 = vpop.permute.xlu2 %1387  ;;  %1356 = vst.msk [vmem:[#allocation8 + $0x48] sm:$0xff] %vm475_vm1, %v1318_v16 }
 0x231   : > { %1808 = vst.msk [vmem:[#allocation5 + $0x10] sm:$0xff] %vm613_vm2, %v1792_v11  ;;  %v1608_v51 = vmul.f32 1.442695, %v1587_v17 }
 0x232   : > { %v5063_v18 = vpop.eup %5062  ;;  %1423 = vst.msk [vmem:[#allocation9 + $0x60] sm:$0xff] %vm475_vm1, %v1388_v30  ;;  %v1493_v14 = vpop.f32.mrf.mxu2 }
 0x233   : > { %v5065_v19 = vpop.eup %5064  ;;  %v1659_v15 = vmul.f32 0.6931472, %v5063_v18  ;;  %v6046_v9 = vadd.f32 %v5996_v49, %v1493_v14  ;;  %5066 = vpow2.f32 %v1608_v51 }
 0x234   : > { %v1666_v29 = vadd.f32 1.0, %v5065_v19  ;;  %v1669_v35 = vmul.f32 -0.5, %v5065_v19  ;;  %v1672_v33 = vand.u32 2147483647, %v5065_v19 }
 0x235   : > { %v1665_v21 = vsel %vm1664_vm8, %v1662_v12, %v1659_v15  ;;  %v1572_v24 = vand.u32 2147483647, %v6046_v9  ;;  %vm1540_vm4 = vcmp.ne.f32.partialorder %v6046_v9, %v6046_v9 }
 0x236   : > { %v1777_v22 = vadd.f32 %v1665_v21, %v1521_v20  ;;  %5068 = vlog2.f32 %v1666_v29  ;;  %v1670_v27 = vadd.f32 1.0, %v1669_v35  ;;  %vm1673_vm11 = vcmp.lt.f32.partialorder %v1672_v33, 0.0004427343 }
 0x237   : > { %v1588_v31 = vsub.f32 0.0, %v1572_v24 }
 0x238   : > { %v1793_v25 = vsel %vm1537_vm10, %v6016_v26, %v1777_v22  ;;  %v1326_v39 = vpop.permute.xlu2 %1325  ;;  %v1384_v32 = vpop.permute.xlu0 %1383  ;;  %v1671_v38 = vmul.f32 %v5065_v19, %v1670_v27 }
 0x239   : > { %1809 = vst.msk [vmem:[#allocation5 + $0x18] sm:$0xff] %vm613_vm2, %v1793_v25  ;;  %v5067_v34 = vpop.eup %5066  ;;  %v1610_v40 = vmul.f32 1.442695, %v1588_v31 }
 0x23a   : > { %1360 = vst.msk [vmem:[#allocation8 + $0x68] sm:$0xff] %vm475_vm1, %v1326_v39  ;;  %v1495_v41 = vpop.f32.mrf.mxu2  ;;  %v1675_v37 = vadd.f32 1.0, %v5067_v34  ;;  %v1678_v42 = vmul.f32 -0.5, %v5067_v34  ;;  %v1681_v55 = vand.u32 2147483647, %v5067_v34 }
 0x23b   : > { %1421 = vst.msk [vmem:[#allocation9 + $0x50] sm:$0xff] %vm475_vm1, %v1384_v32  ;;  %v6056_v0 = vadd.f32 %v5996_v49, %v1495_v41  ;;  %5070 = vpow2.f32 %v1610_v40 }
 0x23c   : > { %v5069_v36 = vpop.eup %5068  ;;  %5072 = vlog2.f32 %v1675_v37  ;;  %v1679_v48 = vadd.f32 1.0, %v1678_v42  ;;  %vm1682_vm13 = vcmp.lt.f32.partialorder %v1681_v55, 0.0004427343 }
 0x23d   : > { %v1668_v26 = vmul.f32 0.6931472, %v5069_v36  ;;  %v1573_v46 = vand.u32 2147483647, %v6056_v0  ;;  %v1525_v41 = vmax.f32 %v6056_v0, 0.0  ;;  %vm1541_vm6 = vcmp.ne.f32.partialorder %v6056_v0, %v6056_v0 }
 0x23e   : > { %v1680_v62 = vmul.f32 %v5067_v34, %v1679_v48 }
 0x23f   : > { %v1674_v45 = vsel %vm1673_vm11, %v1671_v38, %v1668_v26  ;;  %v1589_v44 = vsub.f32 0.0, %v1573_v46 }
 0x240   : > { %v1778_v47 = vadd.f32 %v1674_v45, %v1522_v43  ;;  %v1386_v52 = vpop.permute.xlu1 %1385  ;;  %v1322_v53 = vpop.permute.xlu0 %1321 }
 0x241   : > { %1422 = vst.msk [vmem:[#allocation9 + $0x58] sm:$0xff] %vm475_vm1, %v1386_v52  ;;  %v5071_v6 = vpop.eup %5070  ;;  %v1612_v56 = vmul.f32 1.442695, %v1589_v44 }
 0x242   : > { %v1794_v54 = vsel %vm1538_vm12, %v6024_v50, %v1778_v47  ;;  %v1498_v57 = vpop.f32.mrf.mxu2  ;;  %v5073_v60 = vpop.eup %5072  ;;  %v1684_v58 = vadd.f32 1.0, %v5071_v6  ;;  %1358 = vst.msk [vmem:[#allocation8 + $0x58] sm:$0xff] %vm475_vm1, %v1322_v53  ;;  %v1687_v63 = vmul.f32 -0.5, %v5071_v6  ;;  %v1523_v50 = vmax.f32 %v6035_v5, 0.0 }
 0x243   : > { %1810 = vst.msk [vmem:[#allocation5 + $0x20] sm:$0xff] %vm613_vm2, %v1794_v54  ;;  %v6067_v59 = vadd.f32 %v5996_v49, %v1498_v57  ;;  %v1677_v61 = vmul.f32 0.6931472, %v5073_v60  ;;  %5074 = vpow2.f32 %v1612_v56  ;;  %v1690_v10 = vand.u32 2147483647, %v5071_v6 }
 0x244   : > { %5076 = vlog2.f32 %v1684_v58  ;;  %v1688_v3 = vadd.f32 1.0, %v1687_v63 }
 0x245   : > { %v1683_v1 = vsel %vm1682_vm13, %v1680_v62, %v1677_v61  ;;  %v1574_v23 = vand.u32 2147483647, %v6067_v59  ;;  %vm1691_vm3 = vcmp.lt.f32.partialorder %v1690_v10, 0.0004427343  ;;  %v1526_v56 = vmax.f32 %v6067_v59, 0.0 }
 0x246   : > { %v1779_v2 = vadd.f32 %v1683_v1, %v1523_v50  ;;  %v1689_v15 = vmul.f32 %v5071_v6, %v1688_v3  ;;  %vm1542_vm8 = vcmp.ne.f32.partialorder %v6067_v59, %v6067_v59 }
 0x247   : > { %v1590_v4 = vsub.f32 0.0, %v1574_v23 }
 0x248   : > { %v1324_v7 = vpop.permute.xlu1 %1323  ;;  %v1394_v28 = vpop.permute.xlu2 %1393  ;;  %v1795_v8 = vsel %vm1539_vm0, %v6035_v5, %v1779_v2  ;;  %v1524_v5 = vmax.f32 %v6046_v9, 0.0 }
 0x249   : > { %1359 = vst.msk [vmem:[#allocation8 + $0x60] sm:$0xff] %vm475_vm1, %v1324_v7  ;;  %v5075_v11 = vpop.eup %5074  ;;  %v1614_v13 = vmul.f32 1.442695, %v1590_v4 }
 0x24a   : > { %1811 = vst.msk [vmem:[#allocation5 + $0x28] sm:$0xff] %vm613_vm2, %v1795_v8  ;;  %v1500_v16 = vpop.f32.mrf.mxu2  ;;  %v5077_v17 = vpop.eup %5076  ;;  %v1693_v30 = vadd.f32 1.0, %v5075_v11  ;;  %v1696_v12 = vmul.f32 -0.5, %v5075_v11  ;;  %v1699_v22 = vand.u32 2147483647, %v5075_v11 }
 0x24b   : > { %1426 = vst.msk [vmem:[#allocation9 + $0x78] sm:$0xff] %vm475_vm1, %v1394_v28  ;;  %v6078_v18 = vadd.f32 %v5996_v49, %v1500_v16  ;;  %v1686_v19 = vmul.f32 0.6931472, %v5077_v17  ;;  %5078 = vpow2.f32 %v1614_v13 }
 0x24c   : > { %5080 = vlog2.f32 %v1693_v30  ;;  %v1697_v29 = vadd.f32 1.0, %v1696_v12  ;;  %vm1700_vm5 = vcmp.lt.f32.partialorder %v1699_v22, 0.0004427343 }
 0x24d   : > { %v1692_v51 = vsel %vm1691_vm3, %v1689_v15, %v1686_v19  ;;  %v1575_v14 = vand.u32 2147483647, %v6078_v18  ;;  %vm1543_vm11 = vcmp.ne.f32.partialorder %v6078_v18, %v6078_v18 }
 0x24e   : > { %v1780_v20 = vadd.f32 %v1692_v51, %v1524_v5  ;;  %v1698_v34 = vmul.f32 %v5075_v11, %v1697_v29 }
 0x24f   : > { %v1591_v21 = vsub.f32 0.0, %v1575_v14 }
 0x250   : > { %v1796_v35 = vsel %vm1540_vm4, %v6046_v9, %v1780_v20 }
 0x251   : > { %v5079_v24 = vpop.eup %5078  ;;  %1812 = vst.msk [vmem:[#allocation5 + $0x30] sm:$0xff] %vm613_vm2, %v1796_v35  ;;  %v1616_v25 = vmul.f32 1.442695, %v1591_v21 }
 0x252   : > { %v5081_v27 = vpop.eup %5080  ;;  %v1702_v31 = vadd.f32 1.0, %v5079_v24  ;;  %v1705_v39 = vmul.f32 -0.5, %v5079_v24  ;;  %v1708_v45 = vand.u32 2147483647, %v5079_v24 }
 0x253   : > { %v1503_v32 = vpop.f32.mrf.mxu2  ;;  %v1695_v33 = vmul.f32 0.6931472, %v5081_v27  ;;  %5082 = vpow2.f32 %v1616_v25 }
 0x254   : > { %v6087_v40 = vadd.f32 %v5996_v49, %v1503_v32  ;;  %5084 = vlog2.f32 %v1702_v31  ;;  %v1706_v26 = vadd.f32 1.0, %v1705_v39  ;;  %vm1709_vm7 = vcmp.lt.f32.partialorder %v1708_v45, 0.0004427343 }
 0x255   : > { %v1701_v9 = vsel %vm1700_vm5, %v1698_v34, %v1695_v33 }
 0x256   : > { %v1576_v36 = vand.u32 2147483647, %v6087_v40  ;;  %v1781_v37 = vadd.f32 %v1701_v9, %v1525_v41  ;;  %v1707_v44 = vmul.f32 %v5079_v24, %v1706_v26  ;;  %vm1544_vm13 = vcmp.ne.f32.partialorder %v6087_v40, %v6087_v40 }
 0x258   : > { %v1592_v38 = vsub.f32 0.0, %v1576_v36  ;;  %v1328_v42 = vpop.permute.xlu0 %1327  ;;  %v1797_v43 = vsel %vm1541_vm6, %v6056_v0, %v1781_v37 }
 0x259   : > { %1361 = vst.msk [vmem:[#allocation8 + $0x70] sm:$0xff] %vm475_vm1, %v1328_v42  ;;  %v5083_v46 = vpop.eup %5082 }
 0x25a   : > { %1813 = vst.msk [vmem:[#allocation5 + $0x38] sm:$0xff] %vm613_vm2, %v1797_v43  ;;  %v1618_v47 = vmul.f32 1.442695, %v1592_v38  ;;  %v5085_v48 = vpop.eup %5084  ;;  %v1711_v52 = vadd.f32 1.0, %v5083_v46  ;;  %v1714_v55 = vmul.f32 -0.5, %v5083_v46 }
 0x25b   : > { %v1505_v53 = vpop.f32.mrf.mxu2  ;;  %v1704_v54 = vmul.f32 0.6931472, %v5085_v48  ;;  %v1717_v50 = vand.u32 2147483647, %v5083_v46 }
 0x25c   : > { %5086 = vpow2.f32 %v1618_v47  ;;  %v6097_v6 = vadd.f32 %v5996_v49, %v1505_v53  ;;  %v1715_v58 = vadd.f32 1.0, %v1714_v55 }
 0x25d   : > { %5088 = vlog2.f32 %v1711_v52  ;;  %v1710_v0 = vsel %vm1709_vm7, %v1707_v44, %v1704_v54  ;;  %vm1718_vm10 = vcmp.lt.f32.partialorder %v1717_v50, 0.0004427343  ;;  %v6150_v50 = vld [vmem:[%s7271_s8] sm:$0x1] }
 0x25e   : > { %v1577_v57 = vand.u32 2147483647, %v6097_v6  ;;  %v1782_v60 = vadd.f32 %v1710_v0, %v1526_v56  ;;  %v1716_v10 = vmul.f32 %v5083_v46, %v1715_v58  ;;  %v1529_v47 = vmax.f32 %v6097_v6, 0.0  ;;  %v6145_v58 = vld [vmem:[#allocation2] sm:$0xff]  }
 0x25f   : > { %vm1545_vm3 = vcmp.ne.f32.partialorder %v6097_v6, %v6097_v6 }
 0x260   : > { %v1593_v61 = vsub.f32 0.0, %v1577_v57  ;;  %v1390_v62 = vpop.permute.xlu0 %1389  ;;  %v1798_v63 = vsel %vm1542_vm8, %v6067_v59, %v1782_v60  ;;  %v1527_v59 = vmax.f32 %v6078_v18, 0.0  ;;  %v6138_v57 = vld [vmem:[%s7270_s7] sm:$0xff]  ;;  %v6143_v60 = vld [vmem:[%s7270_s7 + $0x8] sm:$0xff] }
 0x261   : > { %1424 = vst.msk [vmem:[#allocation9 + $0x68] sm:$0xff] %vm475_vm1, %v1390_v62  ;;  %v1330_v1 = vpop.permute.xlu1 %1329 }
 0x262   : > { %v5087_v23 = vpop.eup %5086  ;;  %1814 = vst.msk [vmem:[#allocation5 + $0x40] sm:$0xff] %vm613_vm2, %v1798_v63  ;;  %v1620_v2 = vmul.f32 1.442695, %v1593_v61 }
 0x263   : > { %v5089_v3 = vpop.eup %5088  ;;  %v1720_v4 = vadd.f32 1.0, %v5087_v23  ;;  %v1723_v7 = vmul.f32 -0.5, %v5087_v23  ;;  %1362 = vst.msk [vmem:[#allocation8 + $0x78] sm:$0xff] %vm475_vm1, %v1330_v1  ;;  %v1508_v28 = vpop.f32.mrf.mxu2  ;;  %v1726_v12 = vand.u32 2147483647, %v5087_v23 }
 0x264   : > { %v1713_v8 = vmul.f32 0.6931472, %v5089_v3  ;;  %5090 = vpow2.f32 %v1620_v2  ;;  %v6108_v11 = vadd.f32 %v5996_v49, %v1508_v28  ;;  %v1826_v3 = vld [vmem:[#allocation2 + $0x8] sm:$0xff]  }
 0x265   : > { %5092 = vlog2.f32 %v1720_v4  ;;  %v1724_v30 = vadd.f32 1.0, %v1723_v7  ;;  %vm1727_vm12 = vcmp.lt.f32.partialorder %v1726_v12, 0.0004427343 }
 0x266   : > { %v1719_v13 = vsel %vm1718_vm10, %v1716_v10, %v1713_v8  ;;  %v1578_v16 = vand.u32 2147483647, %v6108_v11  ;;  %v1530_v4 = vmax.f32 %v6108_v11, 0.0  ;;  %vm1546_vm5 = vcmp.ne.f32.partialorder %v6108_v11, %v6108_v11 }
 0x267   : > { %v1783_v17 = vadd.f32 %v1719_v13, %v1527_v59  ;;  %v1725_v29 = vmul.f32 %v5087_v23, %v1724_v30 }
 0x268   : > { %v1594_v19 = vsub.f32 0.0, %v1578_v16 }
 0x269   : > { %v1799_v15 = vsel %vm1543_vm11, %v6078_v18, %v1783_v17  ;;  %v1392_v5 = vpop.permute.xlu1 %1391  ;;  %v1528_v18 = vmax.f32 %v6087_v40, 0.0 }
 0x26a   : > { %v5091_v51 = vpop.eup %5090  ;;  %1815 = vst.msk [vmem:[#allocation5 + $0x48] sm:$0xff] %vm613_vm2, %v1799_v15  ;;  %v1622_v14 = vmul.f32 1.442695, %v1594_v19 }
 0x26b   : > { %v5093_v20 = vpop.eup %5092  ;;  %v1729_v21 = vadd.f32 1.0, %v5091_v51  ;;  %1425 = vst.msk [vmem:[#allocation9 + $0x70] sm:$0xff] %vm475_vm1, %v1392_v5  ;;  %v1510_v35 = vpop.f32.mrf.mxu2  ;;  %v1732_v24 = vmul.f32 -0.5, %v5091_v51  ;;  %v1735_v41 = vand.u32 2147483647, %v5091_v51 }
 0x26c   : > { %v1722_v22 = vmul.f32 0.6931472, %v5093_v20  ;;  %5094 = vpow2.f32 %v1622_v14  ;;  %v6118_v25 = vadd.f32 %v5996_v49, %v1510_v35 }
 0x26d   : > { %5096 = vlog2.f32 %v1729_v21  ;;  %v1733_v32 = vadd.f32 1.0, %v1732_v24  ;;  %vm1736_vm0 = vcmp.lt.f32.partialorder %v1735_v41, 0.0004427343 }
 0x26e   : > { %v1728_v27 = vsel %vm1727_vm12, %v1725_v29, %v1722_v22  ;;  %v1579_v31 = vand.u32 2147483647, %v6118_v25  ;;  %vm1547_vm7 = vcmp.ne.f32.partialorder %v6118_v25, %v6118_v25 }
 0x26f   : > { %v1784_v39 = vadd.f32 %v1728_v27, %v1528_v18  ;;  %v1734_v45 = vmul.f32 %v5091_v51, %v1733_v32  ;;  %v1531_v51 = vmax.f32 %v6118_v25, 0.0 }
 0x270   : > { %v1595_v33 = vsub.f32 0.0, %v1579_v31 }
 0x271   : > { %v1800_v34 = vsel %vm1544_vm13, %v6087_v40, %v1784_v39 }
 0x272   : > { %v5095_v9 = vpop.eup %5094  ;;  %1816 = vst.msk [vmem:[#allocation5 + $0x50] sm:$0xff] %vm613_vm2, %v1800_v34  ;;  %v1624_v36 = vmul.f32 1.442695, %v1595_v33 }
 0x273   : > { %v5097_v37 = vpop.eup %5096  ;;  %v1738_v26 = vadd.f32 1.0, %v5095_v9  ;;  %v1741_v38 = vmul.f32 -0.5, %v5095_v9  ;;  %v1513_v42 = vpop.f32.mrf.mxu2  ;;  %v1744_v55 = vand.u32 2147483647, %v5095_v9 }
 0x274   : > { %v1731_v43 = vmul.f32 0.6931472, %v5097_v37  ;;  %5098 = vpow2.f32 %v1624_v36  ;;  %v6127_v46 = vadd.f32 %v5996_v49, %v1513_v42 }
 0x275   : > { %5100 = vlog2.f32 %v1738_v26  ;;  %v1742_v52 = vadd.f32 1.0, %v1741_v38  ;;  %vm1745_vm4 = vcmp.lt.f32.partialorder %v1744_v55, 0.0004427343 }
 0x276   : > { %v1737_v40 = vsel %vm1736_vm0, %v1734_v45, %v1731_v43  ;;  %v1580_v48 = vand.u32 2147483647, %v6127_v46  ;;  %v1532_v39 = vmax.f32 %v6127_v46, 0.0  ;;  %vm1548_vm10 = vcmp.ne.f32.partialorder %v6127_v46, %v6127_v46 }
 0x277   : > { %v1785_v44 = vadd.f32 %v1737_v40, %v1529_v47  ;;  %v1743_v62 = vmul.f32 %v5095_v9, %v1742_v52 }
 0x278   : > { %v1596_v53 = vsub.f32 0.0, %v1580_v48 }
 0x279   : > { %v1801_v54 = vsel %vm1545_vm3, %v6097_v6, %v1785_v44 }
 0x27a   : > { %v5099_v56 = vpop.eup %5098  ;;  %1817 = vst.msk [vmem:[#allocation5 + $0x58] sm:$0xff] %vm613_vm2, %v1801_v54  ;;  %v1626_v0 = vmul.f32 1.442695, %v1596_v53 }
 0x27b   : > { %v5101_v61 = vpop.eup %5100  ;;  %v1747_v6 = vadd.f32 1.0, %v5099_v56  ;;  %v1515_v63 = vpop.f32.mrf.mxu2  ;;  %v1750_v23 = vmul.f32 -0.5, %v5099_v56  ;;  %v1753_v16 = vand.u32 2147483647, %v5099_v56 }
 0x27c   : > { %v1740_v1 = vmul.f32 0.6931472, %v5101_v61  ;;  %5102 = vpow2.f32 %v1626_v0  ;;  %v1516_v2 = vadd.f32 %v5996_v49, %v1515_v63 }
 0x27d   : > { %5104 = vlog2.f32 %v1747_v6  ;;  %v1751_v10 = vadd.f32 1.0, %v1750_v23  ;;  %vm1754_vm6 = vcmp.lt.f32.partialorder %v1753_v16, 0.0004427343 }
 0x27e   : > { %v1746_v7 = vsel %vm1745_vm4, %v1743_v62, %v1740_v1  ;;  %v1581_v28 = vand.u32 2147483647, %v1516_v2  ;;  %v1533_v26 = vmax.f32 %v1516_v2, 0.0  ;;  %vm1549_vm12 = vcmp.ne.f32.partialorder %v1516_v2, %v1516_v2 }
 0x27f   : > { %v1786_v8 = vadd.f32 %v1746_v7, %v1530_v4  ;;  %v1752_v12 = vmul.f32 %v5099_v56, %v1751_v10 }
 0x280   : > { %v1597_v59 = vsub.f32 0.0, %v1581_v28 }
 0x281   : > { %v1802_v13 = vsel %vm1546_vm5, %v6108_v11, %v1786_v8 }
 0x282   : > { %v5103_v17 = vpop.eup %5102  ;;  %1818 = vst.msk [vmem:[#allocation5 + $0x60] sm:$0xff] %vm613_vm2, %v1802_v13  ;;  %v1628_v49 = vmul.f32 1.442695, %v1597_v59 }
 0x283   : > { %v5105_v30 = vpop.eup %5104  ;;  %v1756_v19 = vadd.f32 1.0, %v5103_v17  ;;  %v1759_v5 = vmul.f32 -0.5, %v5103_v17  ;;  %v1762_v21 = vand.u32 2147483647, %v5103_v17 }
 0x284   : > { %v1749_v15 = vmul.f32 0.6931472, %v5105_v30  ;;  %5106 = vpow2.f32 %v1628_v49 }
 0x285   : > { %5108 = vlog2.f32 %v1756_v19  ;;  %v1760_v11 = vadd.f32 1.0, %v1759_v5  ;;  %vm1763_vm8 = vcmp.lt.f32.partialorder %v1762_v21, 0.0004427343 }
 0x286   : > { %v1755_v14 = vsel %vm1754_vm6, %v1752_v12, %v1749_v15 }
 0x287   : > { %v1787_v20 = vadd.f32 %v1755_v14, %v1531_v51  ;;  %v1761_v27 = vmul.f32 %v5103_v17, %v1760_v11 }
 0x289   : > { %v1803_v29 = vsel %vm1547_vm7, %v6118_v25, %v1787_v20 }
 0x28a   : > { %v5107_v35 = vpop.eup %5106  ;;  %1819 = vst.msk [vmem:[#allocation5 + $0x68] sm:$0xff] %vm613_vm2, %v1803_v29 }
 0x28b   : > { %v5109_v22 = vpop.eup %5108  ;;  %v1765_v24 = vadd.f32 1.0, %v5107_v35  ;;  %v1768_v31 = vmul.f32 -0.5, %v5107_v35  ;;  %v1771_v41 = vand.u32 2147483647, %v5107_v35 }
 0x28c   : > { %v1758_v18 = vmul.f32 0.6931472, %v5109_v22 }
 0x28d   : > { %5110 = vlog2.f32 %v1765_v24  ;;  %v1769_v34 = vadd.f32 1.0, %v1768_v31  ;;  %vm1772_vm11 = vcmp.lt.f32.partialorder %v1771_v41, 0.0004427343 }
 0x28e   : > { %v1764_v32 = vsel %vm1763_vm8, %v1761_v27, %v1758_v18 }
 0x28f   : > { %v1788_v33 = vadd.f32 %v1764_v32, %v1532_v39  ;;  %v1770_v37 = vmul.f32 %v5107_v35, %v1769_v34 }
 0x291   : > { %v1804_v25 = vsel %vm1548_vm10, %v6127_v46, %v1788_v33 }
 0x292   : > { %1820 = vst.msk [vmem:[#allocation5 + $0x70] sm:$0xff] %vm613_vm2, %v1804_v25 }
 0x293   : > { %v5111_v9 = vpop.eup %5110 }
 0x294   : > { %v1767_v36 = vmul.f32 0.6931472, %v5111_v9 }
 0x296   : > { %v1773_v38 = vsel %vm1772_vm11, %v1770_v37, %v1767_v36 }
 0x297   : > { %v1789_v42 = vadd.f32 %v1773_v38, %v1533_v26 }
 0x299   : > { %v1805_v43 = vsel %vm1549_vm12, %v1516_v2, %v1789_v42 }
 0x29a   : > { %1821 = vst.msk [vmem:[#allocation5 + $0x78] sm:$0xff] %vm613_vm2, %v1805_v43 }
 0x29b LB: >> { %v1928_v45 = vlaneseq  ;;  %s6188_s26 = sshll.u32 %s5426_s25, 3  ;;  %vm2368_vm5 = vcmask 1041409   ;;  %vm2371_vm6 = vcmask 1042434   ;;  %vm2374_vm7 = vcmask 1043459   ;;  %s1832_s25 = sadd.s32 1, %s5426_s25   ;;  %s5426_s25 = sphi %s6174_s25, %s1832_s25   ;;  %v5422_v58 = vphi %v6145_v58, %v7286_v58   ;;  %v5418_v3 = vphi %v1826_v3, %v7285_v3  }
 0x29c   : >> { %s1840_s27 = scalar_lea.vmem [#allocation8], %s6188_s26  ;;  %s1842_s11 = scalar_lea.vmem [#allocation9], %s6188_s26  ;;  %vm2377_vm8 = vcmask 1044484   ;;  %vm7276_vm10 = vcmask 1045509   ;;  %vm7275_vm11 = vcmask 1046534   ;;  %vm7274_vm12 = vcmask 1047559  }
 0x29d   : >> { %v6185_v46 = vshrl.u32 %v1928_v45, 7  ;;  %v1841_v47 = vld [vmem:[%s1840_s27] sm:$0xff]  ;;  %s1836_s13 = scalar_lea.vmem [#allocation5], %s6188_s26  ;;  %s1838_s14 = scalar_lea.vmem [#allocation4], %s6188_s26 }
 0x29e   : >> { %v1953_v40 = vperm.slane %v1841_v47, 2  ;;  %v1940_v48 = vperm.slane %v1841_v47, 1  ;;  %v1927_v44 = vperm.slane %v1841_v47, 0  ;;  %v1966_v53 = vperm.slane %v1841_v47, 3  ;;  %v6202_v55 = vld [vmem:[%s1842_s11] sm:$0xff]  ;;  %s1844_s20 = scalar_lea.vmem [#allocation6], %s6188_s26 }
 0x29f   : >> { %5115 = vset.pattern.permute.xlu2 %v6185_v46  ;;  %5114 = vset.pattern.permute.xlu1 %v6185_v46  ;;  %v6195_v52 = vadd.s32 8, %v6185_v46  ;;  %v2005_v54 = vperm.slane %v1841_v47, 6  ;;  %v2134_v56 = vperm.slane %v6202_v55, 3  ;;  %v1992_v0 = vperm.slane %v1841_v47, 5  ;;  %v6229_v17 = vld [vmem:[%s1838_s14] sm:$0xff]  ;;  %s2389_s21 = scalar_lea.vmem [#allocation7], %s6188_s26 }
 0x2a0   : >> { %5112 = vset.pattern.permute.xlu0 %v6185_v46  ;;  %v1979_v61 = vperm.slane %v1841_v47, 4  ;;  %v2108_v62 = vperm.slane %v6202_v55, 1  ;;  %v2018_v6 = vperm.slane %v1841_v47, 7  ;;  %v2173_v63 = vperm.slane %v6202_v55, 6  ;;  %p1829_p8 = scmp.ge.s32.totalorder %s1832_s25, 16  }
 0x2a1   : >> { %v2095_v1 = vperm.slane %v6202_v55, 0  ;;  %v2121_v23 = vperm.slane %v6202_v55, 2  ;;  %v6220_v2 = vld [vmem:[%s1836_s13] sm:$0xff]  ;;  %v2147_v19 = vperm.slane %v6202_v55, 4  ;;  %v2160_v24 = vperm.slane %v6202_v55, 5 }
 0x2a2   : >> { %v1854_v4 = vperm.slane %v6220_v2, 0  ;;  %v1847_v7 = vrot.slane %v6220_v2, 1  ;;  %v1848_v10 = vrot.slane %v6220_v2, 2  ;;  %v6235_v15 = vmul.f32 %v6229_v17, %v6220_v2 }
 0x2a3   : >> { %v2186_v37 = vperm.slane %v6202_v55, 7 }
 0x2a4   : >> { %v1870_v28 = vmul.f32 %v1854_v4, %v6138_v57  ;;  %v1855_v8 = vperm.slane %v1847_v7, 0  ;;  %v1856_v16 = vperm.slane %v1848_v10, 0  ;;  %v1920_v51 = vrot.slane %v6235_v15, 1 }
 0x2a5   : >> { %v2031_v14 = vperm.slane %v6235_v15, 0  ;;  %v1921_v11 = vrot.slane %v6235_v15, 2  ;;  %v1871_v42 = vmul.f32 %v1854_v4, %v6143_v60 }
 0x2a6   : >> { %v1886_v59 = vmul.f32 1.442695, %v1870_v28  ;;  %v1872_v13 = vmul.f32 %v1855_v8, %v6138_v57  ;;  %v1874_v30 = vmul.f32 %v1856_v16, %v6138_v57  ;;  %v2032_v35 = vperm.slane %v1920_v51, 0 }
 0x2a7   : >> { %1958 = vperm.xlu2 %5115, %v1953_v40   ;;  %1945 = vperm.xlu1 %5114, %v1940_v48   ;;  %v2033_v39 = vperm.slane %v1921_v11, 0  ;;  %v1888_v45 = vmul.f32 1.442695, %v1871_v42  ;;  %v1875_v55 = vmul.f32 %v1856_v16, %v6143_v60 }
 0x2a8   : >> { %1932 = vperm.xlu0 %5112, %v1927_v44   ;;  %5131 = vpow2.f32 %v1886_v59  ;;  %v1890_v49 = vmul.f32 1.442695, %v1872_v13  ;;  %v1894_v5 = vmul.f32 1.442695, %v1874_v30 }
 0x2aa   : >> { %5133 = vpow2.f32 %v1890_v49 }
 0x2ab   : >> { %5135 = vpow2.f32 %v1894_v5 }
 0x2ac   : >> { %5137 = vpow2.f32 %v1888_v45 }
 0x2ae   : >> { %v5132_v12 = vpop.eup %5131 }
 0x2af   : >> { %5118 = vset.pattern.permute.xlu2 %v6195_v52  ;;  %5116 = vset.pattern.permute.xlu1 %v6195_v52  ;;  %v2063_v20 = vmul.f32 %v5422_v58, %v5132_v12 }
 0x2b0   : >> { %5113 = vset.pattern.permute.xlu0 %v6195_v52  ;;  %v5134_v18 = vpop.eup %5133 }
 0x2b1   : >> { %v5136_v58 = vpop.eup %5135 }
 0x2b7   : >> { %1964 = vperm.xlu2 %5118, %v1953_v40   ;;  %1951 = vperm.xlu1 %5116, %v1940_v48   ;;  %v1873_v40 = vmul.f32 %v1855_v8, %v6143_v60 }
 0x2b8   : >> { %1938 = vperm.xlu0 %5113, %v1927_v44  }
 0x2b9   : >> { %v1892_v44 = vmul.f32 1.442695, %v1873_v40 }
 0x2bb   : >> { %5139 = vpow2.f32 %v1892_v44 }
 0x2bf   : >> { %1977 = vperm.xlu2 %5118, %v1966_v53   ;;  %5117 = vset.pattern.permute.xlu1 %v6185_v46 }
 0x2c0   : >> { %2016 = vperm.xlu0 %5113, %v2005_v54  }
 0x2c7   : >> { %5120 = vset.pattern.permute.xlu2 %v6185_v46  ;;  %1971 = vperm.xlu1 %5117, %v1966_v53   ;;  %v5138_v53 = vpop.eup %5137 }
 0x2c8   : >> { %2145 = vperm.xlu0 %5113, %v2134_v56   ;;  %v5140_v4 = vpop.eup %5139 }
 0x2cf   : >> { %1997 = vperm.xlu2 %5120, %v1992_v0   ;;  %5119 = vset.pattern.permute.xlu1 %v6195_v52 }
 0x2d0   : >> { %5125 = vset.pattern.permute.xlu0 %v6185_v46 }
 0x2d7   : >> { %2010 = vperm.xlu2 %5120, %v2005_v54   ;;  %1990 = vperm.xlu1 %5119, %v1979_v61  }
 0x2d8   : >> { %1984 = vperm.xlu0 %5125, %v1979_v61   ;;  %v2064_v61 = vmul.f32 %v5418_v3, %v5138_v53 }
 0x2df   : >> { %5122 = vset.pattern.permute.xlu2 %v6195_v52  ;;  %2003 = vperm.xlu1 %5119, %v1992_v0  }
 0x2e0   : >> { %2113 = vperm.xlu0 %5125, %v2108_v62  }
 0x2e7   : >> { %2029 = vperm.xlu2 %5122, %v2018_v6   ;;  %5121 = vset.pattern.permute.xlu1 %v6185_v46 }
 0x2e8   : >> { %2178 = vperm.xlu0 %5125, %v2173_v63  }
 0x2ef   : >> { %2106 = vperm.xlu2 %5122, %v2095_v1   ;;  %2023 = vperm.xlu1 %5121, %v2018_v6  }
 0x2f0   : >> { %5130 = vset.pattern.permute.xlu0 %v6195_v52 }
 0x2f7   : >> { %5124 = vset.pattern.permute.xlu2 %v6185_v46  ;;  %2100 = vperm.xlu1 %5121, %v2095_v1   ;;  %v1896_v1 = vmul.f32 1.442695, %v1875_v55 }
 0x2f9   : >> { %5141 = vpow2.f32 %v1896_v1 }
 0x2ff   : >> { %2126 = vperm.xlu2 %5124, %v2121_v23   ;;  %5123 = vset.pattern.permute.xlu1 %v6195_v52  ;;  %v5142_v12 = vpop.eup %5141 }
 0x301   : >> { %v1959_v21 = vpop.permute.xlu2 %1958 }
 0x302   : >> { %v2051_v34 = vmul.f32 %v2033_v39, %v1959_v21 }
 0x307   : >> { %2139 = vperm.xlu2 %5124, %v2134_v56   ;;  %2119 = vperm.xlu1 %5123, %v2108_v62   ;;  %v1849_v62 = vrot.slane %v6220_v2, 3 }
 0x309   : >> { %v1857_v7 = vperm.slane %v1849_v62, 0 }
 0x30b   : >> { %v1877_v8 = vmul.f32 %v1857_v7, %v6143_v60  ;;  %v1876_v3 = vmul.f32 %v1857_v7, %v6138_v57 }
 0x30d   : >> { %v1900_v49 = vmul.f32 1.442695, %v1877_v8  ;;  %v1898_v5 = vmul.f32 1.442695, %v1876_v3 }
 0x30f   : >> { %5127 = vset.pattern.permute.xlu2 %v6195_v52  ;;  %2132 = vperm.xlu1 %5123, %v2121_v23  }
 0x311   : >> { %v1965_v9 = vpop.permute.xlu2 %1964 }
 0x317   : >> { %2158 = vperm.xlu2 %5127, %v2147_v19   ;;  %5126 = vset.pattern.permute.xlu1 %v6185_v46 }
 0x319   : >> { %v1946_v27 = vpop.permute.xlu1 %1945  ;;  %v1978_v26 = vpop.permute.xlu2 %1977 }
 0x31a   : >> { %v1933_v29 = vpop.permute.xlu0 %1932  ;;  %v2049_v32 = vmul.f32 %v2032_v35, %v1946_v27 }
 0x31b   : >> { %v2047_v22 = vmul.f32 %v2031_v14, %v1933_v29 }
 0x31d   : >> { %v6243_v31 = vadd.f32 %v2063_v20, %v2047_v22  ;;  %v1922_v20 = vrot.slane %v6235_v15, 3 }
 0x31f   : >> { %v2067_v33 = vmul.f32 %v5134_v18, %v6243_v31  ;;  %2171 = vperm.xlu2 %5127, %v2160_v24   ;;  %2152 = vperm.xlu1 %5126, %v2147_v19  }
 0x321   : >> { %v6246_v25 = vadd.f32 %v2067_v33, %v2049_v32 }
 0x323   : >> { %v2071_v41 = vmul.f32 %v5136_v58, %v6246_v25 }
 0x325   : >> { %v6249_v36 = vadd.f32 %v2071_v41, %v2051_v34 }
 0x327   : >> { %5129 = vset.pattern.permute.xlu2 %v6185_v46  ;;  %2165 = vperm.xlu1 %5126, %v2160_v24  }
 0x329   : >> { %v6256_v38 = vpop.permute.xlu2 %1997  ;;  %v1952_v43 = vpop.permute.xlu1 %1951 }
 0x32a   : >> { %v1939_v54 = vpop.permute.xlu0 %1938  ;;  %v2050_v13 = vmul.f32 %v2032_v35, %v1952_v43  ;;  %v2034_v35 = vperm.slane %v1922_v20, 0 }
 0x32b   : >> { %v2048_v0 = vmul.f32 %v2031_v14, %v1939_v54  ;;  %v2052_v14 = vmul.f32 %v2033_v39, %v1965_v9  ;;  %v1850_v54 = vrot.slane %v6220_v2, 4 }
 0x32c   : >> { %v2054_v33 = vmul.f32 %v2034_v35, %v1978_v26 }
 0x32d   : >> { %v2066_v23 = vadd.f32 %v2064_v61, %v2048_v0  ;;  %v1858_v7 = vperm.slane %v1850_v54, 0  ;;  %v1923_v54 = vrot.slane %v6235_v15, 4 }
 0x32f   : >> { %2191 = vperm.xlu2 %5129, %v2186_v37   ;;  %5128 = vset.pattern.permute.xlu1 %v6195_v52  ;;  %v2068_v59 = vmul.f32 %v5140_v4, %v2066_v23  ;;  %v1879_v3 = vmul.f32 %v1858_v7, %v6143_v60  ;;  %v1878_v20 = vmul.f32 %v1858_v7, %v6138_v57 }
 0x331   : >> { %v6259_v47 = vpop.permute.xlu2 %2010  ;;  %v2070_v19 = vadd.f32 %v2068_v59, %v2050_v13 }
 0x332   : >> { %v6275_v16 = vpop.permute.xlu0 %2016 }
 0x333   : >> { %v2072_v11 = vmul.f32 %v5142_v12, %v2070_v19 }
 0x335   : >> { %v6282_v18 = vadd.f32 %v2072_v11, %v2052_v14 }
 0x337   : >> { %2184 = vperm.xlu1 %5128, %v2173_v63   ;;  %v6270_v63 = vld [vmem:[%s1844_s20] sm:$0xff] }
 0x338   : >> { %v4774_v28 = vmul.f32 -1.442695, %v6270_v63 }
 0x339   : >> { %v1972_v48 = vpop.permute.xlu1 %1971 }
 0x33a   : >> { %5143 = vpow2.f32 %v4774_v28  ;;  %v2146_v24 = vpop.permute.xlu0 %2145  ;;  %v2053_v58 = vmul.f32 %v2034_v35, %v1972_v48 }
 0x33b   : >> { %5145 = vpow2.f32 %v1900_v49 }
 0x33c   : >> { %5147 = vpow2.f32 %v1898_v5 }
 0x33f   : >> { %2197 = vperm.xlu1 %5128, %v2186_v37  }
 0x340   : >> { %v5144_v51 = vpop.eup %5143 }
 0x341   : >> { %v6262_v56 = vpop.permute.xlu2 %2029  ;;  %v2318_v21 = vadd.f32 1.0, %v5144_v51  ;;  %v5146_v27 = vpop.eup %5145 }
 0x342   : >> { %v5148_v32 = vpop.eup %5147  ;;  %v2076_v34 = vmul.f32 %v5146_v27, %v6282_v18 }
 0x343   : >> { %5149 = vrcp.f32 %v2318_v21  ;;  %v2075_v39 = vmul.f32 %v5148_v32, %v6249_v36  ;;  %vm2324_vm13 = vweird.f32 %v2318_v21  ;;  %v2328_v51 = vand.u32 2147483647, %v2318_v21 }
 0x344   : >> { %v6288_v37 = vadd.f32 %v2076_v34, %v2054_v33  ;;  %v2330_v14 = vand.u32 2147483648, %v2318_v21  ;;  %v1904_v32 = vmul.f32 1.442695, %v1879_v3 }
 0x345   : >> { %v6286_v9 = vadd.f32 %v2075_v39, %v2053_v58  ;;  %vm6310_vm4 = vcmp.eq.f32.partialorder %v2328_v51, 8.507059e+37 }
 0x346   : >> { %v2206_v53 = vmul.f32 %v2146_v24, %v6288_v37  ;;  %5151 = vpow2.f32 %v1904_v32 }
 0x348   : >> { %v2243_v61 = vsel %vm613_vm2, %v2206_v53, 0.0 }
 0x349   : >> { %v6267_v6 = vpop.permute.xlu1 %1990  ;;  %v2107_v10 = vpop.permute.xlu2 %2106 }
 0x34a   : >> { %v6290_v42 = vpop.permute.xlu0 %1984  ;;  %v5150_v43 = vpop.eup %5149  ;;  %v2200_v26 = vmul.f32 %v2107_v10, %v2066_v23 }
 0x34b   : >> { %v2320_v44 = vmul.f32 %v5150_v43, %v2318_v21  ;;  %vm2325_vm0 = vweird.f32 %v5150_v43  ;;  %v2331_v21 = vor.u32 1.1754944e-38, %v2330_v14 }
 0x34c   : >> { %v2216_v62 = vsel %vm613_vm2, %v2200_v26, 0.0  ;;  %vm6306_vm3 = vmor %vm2324_vm13, %vm2325_vm0 }
 0x34d   : >> { %v2321_v0 = vsub.f32 1.0, %v2320_v44  ;;  %v2288_v44 = vperm.slane %v6150_v50, 0 }
 0x34f   : >> { %v2322_v59 = vmul.f32 %v5150_v43, %v2321_v0 }
 0x351   : >> { %v6277_v30 = vpop.permute.xlu1 %2003  ;;  %v2323_v5 = vadd.f32 %v5150_v43, %v2322_v59  ;;  %v2035_v59 = vperm.slane %v1923_v54, 0 }
 0x352   : >> { %v2114_v28 = vpop.permute.xlu0 %2113 }
 0x353   : >> { %v2201_v23 = vmul.f32 %v2114_v28, %v6246_v25  ;;  %v2327_v39 = vsel %vm6306_vm3, %v5150_v43, %v2323_v5  ;;  %v1852_v5 = vrot.slane %v6220_v2, 6 }
 0x355   : >> { %v2224_v11 = vsel %vm613_vm2, %v2201_v23, 0.0 }
 0x359   : >> { %v2127_v29 = vpop.permute.xlu2 %2126 }
 0x361   : >> { %v6280_v22 = vpop.permute.xlu1 %2023  ;;  %v2140_v41 = vpop.permute.xlu2 %2139 }
 0x362   : >> { %v2205_v40 = vmul.f32 %v2140_v41, %v6286_v9  ;;  %v1902_v41 = vmul.f32 1.442695, %v1878_v20 }
 0x364   : >> { %v2242_v55 = vsel %vm613_vm2, %v2205_v40, 0.0  ;;  %5153 = vpow2.f32 %v1902_v41 }
 0x365   : >> { %v2244_v4 = vadd.f32 %v2243_v61, %v2242_v55 }
 0x367   : >> { %v2245_v10 = vrot.slane %v2244_v4, 4 }
 0x369   : >> { %v2101_v45 = vpop.permute.xlu1 %2100  ;;  %v2246_v35 = vadd.f32 %v2245_v10, %v2244_v4 }
 0x36a   : >> { %v2199_v48 = vmul.f32 %v2101_v45, %v6243_v31  ;;  %v1851_v31 = vrot.slane %v6220_v2, 5  ;;  %v2203_v45 = vmul.f32 %v2127_v29, %v6249_v36 }
 0x36b   : >> { %v2247_v40 = vrot.slane %v2246_v35, 2 }
 0x36c   : >> { %v2215_v1 = vsel %vm613_vm2, %v2199_v48, 0.0  ;;  %v1859_v27 = vperm.slane %v1851_v31, 0  ;;  %v2233_v43 = vsel %vm613_vm2, %v2203_v45, 0.0 }
 0x36d   : >> { %v2217_v8 = vadd.f32 %v2216_v62, %v2215_v1  ;;  %v2248_v36 = vadd.f32 %v2247_v40, %v2246_v35  ;;  %v2332_v1 = vsel %vm6310_vm4, %v2331_v21, %v2327_v39 }
 0x36e   : >> { %v1880_v53 = vmul.f32 %v1859_v27, %v6138_v57  ;;  %v1881_v0 = vmul.f32 %v1859_v27, %v6143_v60 }
 0x36f   : >> { %v2218_v49 = vrot.slane %v2217_v8, 4 }
 0x370   : >> { %v1906_v4 = vmul.f32 1.442695, %v1880_v53  ;;  %v1908_v10 = vmul.f32 1.442695, %v1881_v0 }
 0x371   : >> { %v2219_v58 = vadd.f32 %v2218_v49, %v2217_v8  ;;  %v6327_v8 = vmul.f32 %v2288_v44, %v6229_v17  ;;  %v2249_v49 = vrot.slane %v2248_v36, 1  ;;  %v1924_v17 = vrot.slane %v6235_v15, 5  ;;  %v2159_v24 = vpop.permute.xlu2 %2158 }
 0x372   : >> { %5155 = vpow2.f32 %v1906_v4 }
 0x373   : >> { %v2220_v55 = vrot.slane %v2219_v58, 2  ;;  %5157 = vpow2.f32 %v1908_v10  ;;  %v2250_v32 = vadd.f32 %v2249_v49, %v2248_v36  ;;  %v2036_v41 = vperm.slane %v1924_v17, 0 }
 0x374   : >> { %v2293_v53 = vrot.slane %v6327_v8, 2 }
 0x375   : >> { %v2221_v23 = vadd.f32 %v2220_v55, %v2219_v58  ;;  %v2057_v36 = vmul.f32 %v2036_v41, %v6256_v38 }
 0x377   : >> { %v2222_v35 = vrot.slane %v2221_v23, 1 }
 0x379   : >> { %v2120_v13 = vpop.permute.xlu1 %2119  ;;  %v2172_v49 = vpop.permute.xlu2 %2171 }
 0x37a   : >> { %v2202_v12 = vmul.f32 %v2120_v13, %v2070_v19  ;;  %v6330_v13 = vmul.f32 %v2332_v1, %v6270_v63 }
 0x37c   : >> { %v2225_v25 = vsel %vm613_vm2, %v2202_v12, 0.0  ;;  %v2292_v12 = vrot.slane %v6327_v8, 1  ;;  %v2336_v58 = vrot.slane %v6330_v13, 1 }
 0x37d   : >> { %v2226_v33 = vadd.f32 %v2225_v25, %v2224_v11  ;;  %v2056_v11 = vmul.f32 %v2035_v59, %v6267_v6  ;;  %v2055_v25 = vmul.f32 %v2035_v59, %v6290_v42  ;;  %v2223_v6 = vadd.f32 %v2222_v35, %v2221_v23 }
 0x37f   : >> { %v2227_v34 = vrot.slane %v2226_v33, 4  ;;  %v2307_v1 = vadd.f32 %v6327_v8, %v2223_v6 }
 0x381   : >> { %v2228_v26 = vadd.f32 %v2227_v34, %v2226_v33  ;;  %v2133_v48 = vpop.permute.xlu1 %2132  ;;  %v2294_v33 = vrot.slane %v6327_v8, 3  ;;  %v1860_v34 = vperm.slane %v1852_v5, 0 }
 0x382   : >> { %v2204_v61 = vmul.f32 %v2133_v48, %v6282_v18  ;;  %v5152_v18 = vpop.eup %5151 }
 0x383   : >> { %v2229_v62 = vrot.slane %v2228_v26, 2  ;;  %v5154_v20 = vpop.eup %5153  ;;  %v2080_v63 = vmul.f32 %v5152_v18, %v6288_v37  ;;  %v2310_v48 = vadd.f32 %v2294_v33, %v2250_v32  ;;  %v1882_v0 = vmul.f32 %v1860_v34, %v6138_v57 }
 0x384   : >> { %v2234_v29 = vsel %vm613_vm2, %v2204_v61, 0.0  ;;  %v2079_v21 = vmul.f32 %v5154_v20, %v6286_v9  ;;  %v5156_v40 = vpop.eup %5155  ;;  %v2337_v9 = vrot.slane %v6330_v13, 2  ;;  %v1883_v23 = vmul.f32 %v1860_v34, %v6143_v60 }
 0x385   : >> { %v2230_v7 = vadd.f32 %v2229_v62, %v2228_v26  ;;  %v2235_v28 = vadd.f32 %v2234_v29, %v2233_v43  ;;  %v2082_v45 = vadd.f32 %v2080_v63, %v2056_v11  ;;  %v5158_v37 = vpop.eup %5157  ;;  %v2338_v26 = vrot.slane %v6330_v13, 3 }
 0x386   : >> { %v2081_v44 = vadd.f32 %v2079_v21, %v2055_v25  ;;  %v1853_v62 = vrot.slane %v6220_v2, 7  ;;  %v2058_v29 = vmul.f32 %v2036_v41, %v6277_v30  ;;  %v1910_v2 = vmul.f32 1.442695, %v1882_v0 }
 0x387   : >> { %v2231_v31 = vrot.slane %v2230_v7, 1  ;;  %v2236_v3 = vrot.slane %v2235_v28, 4  ;;  %v2208_v54 = vmul.f32 %v2159_v24, %v2082_v45  ;;  %v2354_v10 = vmul.f32 %v2338_v26, %v2310_v48 }
 0x388   : >> { %v2351_v30 = vmul.f32 %v6330_v13, %v2307_v1  ;;  %v1912_v17 = vmul.f32 1.442695, %v1883_v23  ;;  %5159 = vpow2.f32 %v1910_v2  ;;  %v1925_v33 = vrot.slane %v6235_v15, 6 }
 0x389   : >> { %v2232_v51 = vadd.f32 %v2231_v31, %v2230_v7  ;;  %v2237_v14 = vadd.f32 %v2236_v3, %v2235_v28  ;;  %v2083_v7 = vmul.f32 %v5156_v40, %v2081_v44  ;;  %v2084_v28 = vmul.f32 %v5158_v37, %v2082_v45 }
 0x38a   : >> { %v2252_v18 = vsel %vm613_vm2, %v2208_v54, 0.0  ;;  %v2373_v35 = vrot.slane %v2354_v10, 5  ;;  %5161 = vpow2.f32 %v1912_v17  ;;  %v2295_v26 = vrot.slane %v6327_v8, 4 }
 0x38b   : >> { %v2238_v27 = vrot.slane %v2237_v14, 2  ;;  %v2308_v19 = vadd.f32 %v2292_v12, %v2232_v51  ;;  %v2086_v5 = vadd.f32 %v2084_v28, %v2058_v29  ;;  %v1861_v51 = vperm.slane %v1853_v62, 0  ;;  %v2179_v28 = vpop.permute.xlu0 %2178 }
 0x38c   : >> { %v2085_v11 = vadd.f32 %v2083_v7, %v2057_v36  ;;  %v2339_v0 = vrot.slane %v6330_v13, 4  ;;  %v1926_v36 = vrot.slane %v6235_v15, 7 }
 0x38d   : >> { %v2239_v39 = vadd.f32 %v2238_v27, %v2237_v14  ;;  %v2352_v55 = vmul.f32 %v2336_v58, %v2308_v19  ;;  %v2210_v25 = vmul.f32 %v2172_v49, %v2086_v5  ;;  %v1884_v58 = vmul.f32 %v1861_v51, %v6138_v57 }
 0x38f   : >> { %v2240_v42 = vrot.slane %v2239_v39, 1  ;;  %v2367_v31 = vrot.slane %v2352_v55, 7  ;;  %v2261_v41 = vsel %vm613_vm2, %v2210_v25, 0.0 }
 0x391   : >> { %v2241_v61 = vadd.f32 %v2240_v42, %v2239_v39  ;;  %v2153_v43 = vpop.permute.xlu1 %2152  ;;  %v2369_v24 = vsel %vm2368_vm5, %v2367_v31, %v2351_v30  ;;  %v1885_v39 = vmul.f32 %v1861_v51, %v6143_v60  ;;  %v1914_v42 = vmul.f32 1.442695, %v1884_v58 }
 0x392   : >> { %v2207_v4 = vmul.f32 %v2153_v43, %v2081_v44  ;;  %v2037_v44 = vperm.slane %v1925_v33, 0  ;;  %v2340_v30 = vrot.slane %v6330_v13, 5 }
 0x393   : >> { %v2309_v59 = vadd.f32 %v2293_v53, %v2241_v61  ;;  %v5160_v53 = vpop.eup %5159  ;;  %v1916_v54 = vmul.f32 1.442695, %v1885_v39  ;;  %5163 = vpow2.f32 %v1914_v42 }
 0x394   : >> { %v2251_v3 = vsel %vm613_vm2, %v2207_v4, 0.0  ;;  %v5162_v55 = vpop.eup %5161  ;;  %v2059_v62 = vmul.f32 %v2037_v44, %v6259_v47  ;;  %v2087_v43 = vmul.f32 %v5160_v53, %v2085_v11  ;;  %v2060_v4 = vmul.f32 %v2037_v44, %v6275_v16 }
 0x395   : >> { %v2353_v38 = vmul.f32 %v2337_v9, %v2309_v59  ;;  %v2253_v12 = vadd.f32 %v2252_v18, %v2251_v3  ;;  %5165 = vpow2.f32 %v1916_v54  ;;  %v2088_v7 = vmul.f32 %v5162_v55, %v2086_v5 }
 0x396   : >> { %v2089_v10 = vadd.f32 %v2087_v43, %v2059_v62  ;;  %v2038_v18 = vperm.slane %v1926_v36, 0  ;;  %v2296_v47 = vrot.slane %v6327_v8, 5 }
 0x397   : >> { %v2370_v14 = vrot.slane %v2353_v38, 6  ;;  %v2254_v20 = vrot.slane %v2253_v12, 4  ;;  %v2090_v38 = vadd.f32 %v2088_v7, %v2060_v4  ;;  %v2342_v4 = vrot.slane %v6330_v13, 7 }
 0x398   : >> { %v2211_v49 = vmul.f32 %v2179_v28, %v2089_v10  ;;  %v2061_v51 = vmul.f32 %v2038_v18, %v6280_v22 }
 0x399   : >> { %v2372_v63 = vsel %vm2371_vm6, %v2370_v14, %v2369_v24  ;;  %v2255_v27 = vadd.f32 %v2254_v20, %v2253_v12  ;;  %v2166_v32 = vpop.permute.xlu1 %2165  ;;  %v5164_v2 = vpop.eup %5163  ;;  %v2062_v20 = vmul.f32 %v2038_v18, %v6262_v56 }
 0x39a   : >> { %v2375_v19 = vsel %vm2374_vm7, %v2373_v35, %v2372_v63  ;;  %v2209_v21 = vmul.f32 %v2166_v32, %v2085_v11  ;;  %v2269_v11 = vsel %vm613_vm2, %v2211_v49, 0.0  ;;  %v2091_v35 = vmul.f32 %v5164_v2, %v2089_v10  ;;  %v2192_v63 = vpop.permute.xlu2 %2191 }
 0x39b   : >> { %v2256_v34 = vrot.slane %v2255_v27, 2  ;;  %v5166_v15 = vpop.eup %5165 }
 0x39c   : >> { %v2260_v6 = vsel %vm613_vm2, %v2209_v21, 0.0  ;;  %v2092_v24 = vmul.f32 %v5166_v15, %v2090_v38  ;;  %v2093_v33 = vadd.f32 %v2091_v35, %v2061_v51  }
 0x39d   : >> { %v2257_v45 = vadd.f32 %v2256_v34, %v2255_v27  ;;  %v2262_v40 = vadd.f32 %v2261_v41, %v2260_v6 }
 0x39e   : >> { %v2213_v21 = vmul.f32 %v2192_v63, %v2093_v33  ;;  %v2094_v34 = vadd.f32 %v2092_v24, %v2062_v20   ;;  %2391 = vst.msk [vmem:[#allocation2] sm:$0xff] (%p1829_p8), %vm613_vm2, %v2093_v33  ;;  %v4885_v63 = vld [vmem:[%s7264_s1 + $0x8] sm:$0xff] (%p1829_p8) }
 0x39f   : >> { %v2258_v37 = vrot.slane %v2257_v45, 1  ;;  %v2263_v48 = vrot.slane %v2262_v40, 4  ;;  %2554 = vmatpush.bf16.msrb.mxu0 (%p1829_p8), %v4885_v63 }
 0x3a0   : > { %2392 = vst.msk [vmem:[#allocation2 + $0x8] sm:$0xff] (%p1829_p8), %vm613_vm2, %v2094_v34 }
 0x3a1   : >> { %v2259_v9 = vadd.f32 %v2258_v37, %v2257_v45  ;;  %v2264_v61 = vadd.f32 %v2263_v48, %v2262_v40  ;;  %v2278_v45 = vsel %vm613_vm2, %v2213_v21, 0.0  ;;  %v2297_v37 = vrot.slane %v6327_v8, 6 }
 0x3a2   : >> { %v2341_v48 = vrot.slane %v6330_v13, 6  ;;  %v4883_v13 = vld [vmem:[%s7272_s9] sm:$0xff] (%p1829_p8) }
 0x3a3   : >> { %v2311_v29 = vadd.f32 %v2295_v26, %v2259_v9  ;;  %v2265_v1 = vrot.slane %v2264_v61, 2 }
 0x3a5   : >> { %v2355_v59 = vmul.f32 %v2339_v0, %v2311_v29  ;;  %v2266_v23 = vadd.f32 %v2265_v1, %v2264_v61  ;;  %v2298_v29 = vrot.slane %v6327_v8, 7  ;;  %v4884_v8 = vld [vmem:[%s7272_s9 + $0x8] sm:$0xff] (%p1829_p8) }
 0x3a6   : > { %2463 = vmatpush.bf16.msra.mxu3 (%p1829_p8), %v4884_v8 }
 0x3a7   : >> { %v2376_v31 = vrot.slane %v2355_v59, 4  ;;  %v2267_v3 = vrot.slane %v2266_v23, 1 }
 0x3a9   : >> { %v2378_v12 = vsel %vm2377_vm8, %v2376_v31, %v2375_v19  ;;  %v2268_v16 = vadd.f32 %v2267_v3, %v2266_v23  ;;  %v2185_v5 = vpop.permute.xlu1 %2184  ;;  %v7285_v3 = vmov %v2094_v34 }
 0x3aa   : >> { %v2212_v14 = vmul.f32 %v2185_v5, %v2090_v38  ;;  %2464 = vmatpush.bf16.msra.mxu3 (%p1829_p8), %v4883_v13 }
 0x3ab   : >> { %v2312_v17 = vadd.f32 %v2296_v47, %v2268_v16 }
 0x3ac   : >> { %v2270_v25 = vsel %vm613_vm2, %v2212_v14, 0.0 }
 0x3ad   : >> { %v2356_v27 = vmul.f32 %v2340_v30, %v2312_v17  ;;  %v2271_v32 = vadd.f32 %v2270_v25, %v2269_v11 }
 0x3af   : >> { %v2379_v58 = vrot.slane %v2356_v27, 3  ;;  %v2272_v19 = vrot.slane %v2271_v32, 4 }
 0x3b1   : >> { %v2381_v22 = vsel %vm7276_vm10, %v2379_v58, %v2378_v12  ;;  %v2273_v39 = vadd.f32 %v2272_v19, %v2271_v32  ;;  %v2198_v56 = vpop.permute.xlu1 %2197  ;;  %v7286_v58 = vmov %v2093_v33 }
 0x3b2   : >> { %v2214_v41 = vmul.f32 %v2198_v56, %v2094_v34 }
 0x3b3   : >> { %v2274_v6 = vrot.slane %v2273_v39, 2 }
 0x3b4   : >> { %v2279_v40 = vsel %vm613_vm2, %v2214_v41, 0.0 }
 0x3b5   : >> { %v2275_v44 = vadd.f32 %v2274_v6, %v2273_v39  ;;  %v2280_v42 = vadd.f32 %v2279_v40, %v2278_v45 }
 0x3b7   : >> { %v2276_v53 = vrot.slane %v2275_v44, 1  ;;  %v2281_v26 = vrot.slane %v2280_v42, 4 }
 0x3b9   : >> { %v2277_v54 = vadd.f32 %v2276_v53, %v2275_v44  ;;  %v2282_v55 = vadd.f32 %v2281_v26, %v2280_v42 }
 0x3bb   : >> { %v2313_v0 = vadd.f32 %v2297_v37, %v2277_v54  ;;  %v2283_v9 = vrot.slane %v2282_v55, 2 }
 0x3bd   : >> { %v2357_v61 = vmul.f32 %v2341_v48, %v2313_v0  ;;  %v2284_v62 = vadd.f32 %v2283_v9, %v2282_v55 }
 0x3bf   : >> { %v2382_v43 = vrot.slane %v2357_v61, 2  ;;  %v2285_v36 = vrot.slane %v2284_v62, 1 }
 0x3c1   : >> { %v2384_v1 = vsel %vm7275_vm11, %v2382_v43, %v2381_v22  ;;  %v2286_v7 = vadd.f32 %v2285_v36, %v2284_v62  ;;  %v4805_v43 = vld [vmem:[%s7265_s2 + $0x4] sm:$0xf] (%p1829_p8) }
 0x3c2   : > { %v6423_v36 = vperm.slane (%p1829_p8), %v4805_v43, 0 }
 0x3c3   : >> { %v2314_v28 = vadd.f32 %v2298_v29, %v2286_v7  ;;  %v6428_v29 = vld [vmem:[%s7266_s3 + $0x1] ss:$0 sm:$0xff] (%p1829_p8) }
 0x3c5   : >> { %v2358_v59 = vmul.f32 %v2342_v4, %v2314_v28 }
 0x3c6   : > { %1831 = sbr.rel (!%p1829_p8) target bundleno = 667 (0x29b), region = 129 }
 0x3c7   : >> { %v2385_v23 = vrot.slane %v2358_v59, 1 }
 0x3c9   : >> { %v2387_v10 = vsel %vm7274_vm12, %v2385_v23, %v2384_v1  ;;  %v6430_v1 = vperm.slane (%p1829_p8), %v4805_v43, 1  ;;  %v6435_v23 = vperm.slane (%p1829_p8), %v4805_v43, 2 }
 0x3ca   : >> { %2390 = vst.msk [vmem:[%s2389_s21] sm:$0xff] %vm613_vm2, %v2387_v10  ;;  %s6988_s21 = smov (%p1829_p8), 0  }
 0x3d1   : > { %v2393_v18 = vld [vmem:[#allocation7] sm:$0xff]  ;;  %v2394_v31 = vld [vmem:[#allocation7 + $0x8] sm:$0xff]  ;;  %v2395_v2 = vld [vmem:[#allocation7 + $0x10] sm:$0xff] }
 0x3d2   : > { %v2409_v47 = vpack.c.bf16 %v2394_v31, %v2393_v18  ;;  %v2396_v57 = vld [vmem:[#allocation7 + $0x18] sm:$0xff]  ;;  %v2397_v50 = vld [vmem:[#allocation7 + $0x20] sm:$0xff]  ;;  %v2398_v3 = vld [vmem:[#allocation7 + $0x28] sm:$0xff]  ;;  %v6439_v18 = vperm.slane %v4805_v43, 3 }
 0x3d3   : > { %v2410_v60 = vpack.c.bf16 %v2396_v57, %v2395_v2  ;;  %v2411_v49 = vpack.c.bf16 %v2398_v3, %v2397_v50  ;;  %v2399_v38 = vld [vmem:[#allocation7 + $0x30] sm:$0xff]  ;;  %v2400_v15 = vld [vmem:[#allocation7 + $0x38] sm:$0xff]  ;;  %v2401_v30 = vld [vmem:[#allocation7 + $0x40] sm:$0xff] }
 0x3d4   : > { %4783 = vmatmul.msk.bf16.vlgmr.msra.gmra.mxu3 %vm613_vm2, %v2409_v47  ;;  %v2412_v12 = vpack.c.bf16 %v2400_v15, %v2399_v38  ;;  %v2402_v16 = vld [vmem:[#allocation7 + $0x48] sm:$0xff]  ;;  %v2403_v51 = vld [vmem:[#allocation7 + $0x50] sm:$0xff]  ;;  %v2404_v14 = vld [vmem:[#allocation7 + $0x58] sm:$0xff] }
 0x3d5   : > { %v2413_v5 = vpack.c.bf16 %v2402_v16, %v2401_v30  ;;  %v2414_v20 = vpack.c.bf16 %v2404_v14, %v2403_v51  ;;  %v2405_v17 = vld [vmem:[#allocation7 + $0x60] sm:$0xff]  ;;  %v2406_v11 = vld [vmem:[#allocation7 + $0x68] sm:$0xff]  ;;  %v2407_v25 = vld [vmem:[#allocation7 + $0x70] sm:$0xff] }
 0x3d6   : > { %v2415_v35 = vpack.c.bf16 %v2406_v11, %v2405_v17  ;;  %v2408_v24 = vld [vmem:[#allocation7 + $0x78] sm:$0xff]  ;;  %v4887_v38 = vld [vmem:[%s7267_s4 + $0x18] sm:$0xff]  ;;  %v4886_v11 = vld [vmem:[%s7267_s4 + $0x10] sm:$0xff] }
 0x3d7   : > { %v2416_v27 = vpack.c.bf16 %v2408_v24, %v2407_v25  ;;  %3288 = vmatpush.bf16.msrb.mxu2 %v4887_v38 }
 0x3db   : > { %3289 = vmatpush.bf16.msrb.mxu2 %v4886_v11 }
 0x3e4   : > { %4784 = vmatmul.msk.bf16.gmra.mxu3 %vm613_vm2, %v2410_v60 }
 0x3f4   : > { %4785 = vmatmul.msk.bf16.gmra.mxu3 %vm613_vm2, %v2411_v49 }
 0x404   : > { %4786 = vmatmul.msk.bf16.gmra.mxu3 %vm613_vm2, %v2412_v12 }
 0x414   : > { %4787 = vmatmul.msk.bf16.gmra.mxu3 %vm613_vm2, %v2413_v5 }
 0x424   : > { %4788 = vmatmul.msk.bf16.gmra.mxu3 %vm613_vm2, %v2414_v20 }
 0x434   : > { %4789 = vmatmul.msk.bf16.gmra.mxu3 %vm613_vm2, %v2415_v35 }
 0x444   : > { %4790 = vmatmul.msk.bf16.gmra.mxu3 %vm613_vm2, %v2416_v27 }
 0x457   : > { %v2466_v32 = vpop.f32.mrf.mxu3 }
 0x45f   : > { %v2468_v33 = vpop.f32.mrf.mxu3 }
 0x460   : > { %v2506_v58 = vpack.c.bf16 %v2468_v33, %v2466_v32 }
 0x462   : > { %4797 = vmatmul.msk.bf16.vlgmr.msrb.gmra.mxu0 %vm475_vm1, %v2506_v58 }
 0x467   : > { %v2471_v19 = vpop.f32.mrf.mxu3 }
 0x46f   : > { %v2473_v21 = vpop.f32.mrf.mxu3 }
 0x470   : > { %v2507_v34 = vpack.c.bf16 %v2473_v21, %v2471_v19 }
 0x472   : > { %4798 = vmatmul.msk.bf16.gmra.mxu0 %vm475_vm1, %v2507_v34 }
 0x477   : > { %v2476_v22 = vpop.f32.mrf.mxu3 }
 0x47f   : > { %v2478_v39 = vpop.f32.mrf.mxu3 }
 0x480   : > { %v2508_v56 = vpack.c.bf16 %v2478_v39, %v2476_v22 }
 0x482   : > { %4799 = vmatmul.msk.bf16.gmra.mxu0 %vm475_vm1, %v2508_v56 }
 0x487   : > { %v2481_v41 = vpop.f32.mrf.mxu3 }
 0x48f   : > { %v2483_v6 = vpop.f32.mrf.mxu3 }
 0x490   : > { %v2509_v45 = vpack.c.bf16 %v2483_v6, %v2481_v41 }
 0x492   : > { %4800 = vmatmul.msk.bf16.gmra.mxu0 %vm475_vm1, %v2509_v45 }
 0x497   : > { %v2486_v40 = vpop.f32.mrf.mxu3 }
 0x49f   : > { %v2488_v44 = vpop.f32.mrf.mxu3 }
 0x4a0   : > { %v2510_v42 = vpack.c.bf16 %v2488_v44, %v2486_v40 }
 0x4a2   : > { %4801 = vmatmul.msk.bf16.gmra.mxu0 %vm475_vm1, %v2510_v42 }
 0x4a7   : > { %v2491_v53 = vpop.f32.mrf.mxu3 }
 0x4af   : > { %v2493_v37 = vpop.f32.mrf.mxu3 }
 0x4b0   : > { %v2511_v26 = vpack.c.bf16 %v2493_v37, %v2491_v53 }
 0x4b2   : > { %4802 = vmatmul.msk.bf16.gmra.mxu0 %vm475_vm1, %v2511_v26 }
 0x4b7   : > { %v2496_v48 = vpop.f32.mrf.mxu3 }
 0x4bf   : > { %v2498_v54 = vpop.f32.mrf.mxu3 }
 0x4c0   : > { %v2512_v55 = vpack.c.bf16 %v2498_v54, %v2496_v48 }
 0x4c2   : > { %4803 = vmatmul.msk.bf16.gmra.mxu0 %vm475_vm1, %v2512_v55 }
 0x4c7   : > { %v2501_v0 = vpop.f32.mrf.mxu3 }
 0x4cf   : > { %v2503_v9 = vpop.f32.mrf.mxu3 }
 0x4d0   : > { %v2513_v61 = vpack.c.bf16 %v2503_v9, %v2501_v0 }
 0x4d2   : > { %4804 = vmatmul.msk.bf16.gmra.mxu0 %vm475_vm1, %v2513_v61 }
 0x4df   : > { %v2556_v62 = vpop.f32.mrf.mxu0 }
 0x4e0   : > { %2676 = vst.msk [vmem:[#allocation3 + $0x90] sm:$0xff] %vm613_vm2, %v2556_v62  ;;  %2612 = vrot.lane.b32.xlu0 %v2556_v62, %s5441_s12 }
 0x4e7   : > { %v2558_v4 = vpop.f32.mrf.mxu0  ;;  %v2696_v7 = vld [vmem:[#allocation3 + $0x8d] sm:$0xff] }
 0x4e8   : > { %v2748_v28 = vld [vmem:[#allocation3 + $0x8e] sm:$0xff]  ;;  %2677 = vst.msk [vmem:[#allocation3 + $0x98] sm:$0xff] %vm613_vm2, %v2558_v4  ;;  %2614 = vrot.lane.b32.xlu0 %v2558_v4, %s5441_s12  ;;  %v2713_v59 = vmul.f32 %v6423_v36, %v2696_v7 }
 0x4e9   : > { %v2797_v10 = vld [vmem:[#allocation3 + $0x8f] sm:$0xff]  ;;  %v2765_v13 = vmul.f32 %v6430_v1, %v2748_v28 }
 0x4ea   : > { %v2732_v8 = vadd.f32 %v6428_v29, %v2713_v59  ;;  %v2814_v47 = vmul.f32 %v6435_v23, %v2797_v10  ;;  %v2846_v2 = vld [vmem:[#allocation3 + $0x90] sm:$0xff] }
 0x4eb   : > { %v2863_v49 = vmul.f32 %v6439_v18, %v2846_v2 }
 0x4ec   : > { %v2781_v31 = vadd.f32 %v2765_v13, %v2732_v8 }
 0x4ee   : > { %v2830_v57 = vadd.f32 %v2814_v47, %v2781_v31 }
 0x4ef   : > { %v2561_v60 = vpop.f32.mrf.mxu0  ;;  %v2697_v50 = vld [vmem:[#allocation3 + $0x95] sm:$0xff] }
 0x4f0   : > { %v2749_v3 = vld [vmem:[#allocation3 + $0x96] sm:$0xff]  ;;  %2678 = vst.msk [vmem:[#allocation3 + $0xa0] sm:$0xff] %vm613_vm2, %v2561_v60  ;;  %2616 = vrot.lane.b32.xlu1 %v2561_v60, %s5441_s12  ;;  %v2714_v15 = vmul.f32 %v6423_v36, %v2697_v50  ;;  %v6449_v30 = vadd.f32 %v2863_v49, %v2830_v57 }
 0x4f1   : > { %v2798_v12 = vld [vmem:[#allocation3 + $0x97] sm:$0xff]  ;;  %v2766_v5 = vmul.f32 %v6430_v1, %v2749_v3 }
 0x4f2   : > { %v2733_v16 = vadd.f32 %v6428_v29, %v2714_v15  ;;  %v2847_v51 = vld [vmem:[#allocation3 + $0x98] sm:$0xff]  ;;  %v4807_v14 = vmul.f32 -1.442695, %v6449_v30  ;;  %v2815_v17 = vmul.f32 %v6435_v23, %v2798_v12 }
 0x4f3   : > { %v2864_v25 = vmul.f32 %v6439_v18, %v2847_v51 }
 0x4f4   : > { %v2782_v20 = vadd.f32 %v2766_v5, %v2733_v16  ;;  %5169 = vpow2.f32 %v4807_v14 }
 0x4f6   : > { %v2831_v35 = vadd.f32 %v2815_v17, %v2782_v20 }
 0x4f7   : > { %v2563_v24 = vpop.f32.mrf.mxu0  ;;  %v2698_v63 = vld [vmem:[#allocation3 + $0x9d] sm:$0xff] }
 0x4f8   : > { %v2750_v27 = vld [vmem:[#allocation3 + $0x9e] sm:$0xff]  ;;  %2679 = vst.msk [vmem:[#allocation3 + $0xa8] sm:$0xff] %vm613_vm2, %v2563_v24  ;;  %2618 = vrot.lane.b32.xlu1 %v2563_v24, %s5441_s12  ;;  %v6461_v32 = vadd.f32 %v2864_v25, %v2831_v35  ;;  %v2715_v33 = vmul.f32 %v6423_v36, %v2698_v63 }
 0x4f9   : > { %v2767_v21 = vmul.f32 %v6430_v1, %v2750_v27  ;;  %v2799_v34 = vld [vmem:[#allocation3 + $0x9f] sm:$0xff] }
 0x4fa   : > { %v4808_v58 = vmul.f32 -1.442695, %v6461_v32  ;;  %v2734_v19 = vadd.f32 %v6428_v29, %v2715_v33  ;;  %v5170_v22 = vpop.eup %5169  ;;  %v2848_v41 = vld [vmem:[#allocation3 + $0xa0] sm:$0xff]  ;;  %v2816_v6 = vmul.f32 %v6435_v23, %v2799_v34 }
 0x4fb   : > { %v2945_v39 = vadd.f32 1.0, %v5170_v22  ;;  %v2865_v53 = vmul.f32 %v6439_v18, %v2848_v41 }
 0x4fc   : > { %5171 = vpow2.f32 %v4808_v58  ;;  %v2783_v56 = vadd.f32 %v2767_v21, %v2734_v19 }
 0x4fd   : > { %5173 = vrcp.f32 %v2945_v39  ;;  %v2972_v31 = vand.u32 2147483648, %v2945_v39  ;;  %v2970_v3 = vand.u32 2147483647, %v2945_v39  ;;  %vm2966_vm0 = vweird.f32 %v2945_v39 }
 0x4fe   : > { %v2832_v42 = vadd.f32 %v2816_v6, %v2783_v56 }
 0x4ff   : > { %v2566_v45 = vpop.f32.mrf.mxu0  ;;  %v2699_v40 = vld [vmem:[#allocation3 + $0xa5] sm:$0xff]  ;;  %v2973_v51 = vor.u32 1.1754944e-38, %v2972_v31  ;;  %vm2971_vm4 = vcmp.eq.f32.partialorder %v2970_v3, 8.507059e+37 }
 0x500   : > { %v2751_v44 = vld [vmem:[#allocation3 + $0xa6] sm:$0xff]  ;;  %2680 = vst.msk [vmem:[#allocation3 + $0xb0] sm:$0xff] %vm613_vm2, %v2566_v45  ;;  %2620 = vrot.lane.b32.xlu2 %v2566_v45, %s5441_s12  ;;  %v2716_v37 = vmul.f32 %v6423_v36, %v2699_v40  ;;  %v6472_v48 = vadd.f32 %v2865_v53, %v2832_v42 }
 0x501   : > { %v2800_v26 = vld [vmem:[#allocation3 + $0xa7] sm:$0xff]  ;;  %v2768_v0 = vmul.f32 %v6430_v1, %v2751_v44 }
 0x502   : > { %v5172_v54 = vpop.eup %5171  ;;  %v2735_v55 = vadd.f32 %v6428_v29, %v2716_v37  ;;  %v2849_v61 = vld [vmem:[#allocation3 + $0xa8] sm:$0xff]  ;;  %v4809_v62 = vmul.f32 -1.442695, %v6472_v48  ;;  %v2817_v7 = vmul.f32 %v6435_v23, %v2800_v26 }
 0x503   : > { %v6476_v9 = vadd.f32 1.0, %v5172_v54  ;;  %v5174_v43 = vpop.eup %5173  ;;  %v2866_v10 = vmul.f32 %v6439_v18, %v2849_v61 }
 0x504   : > { %v2784_v4 = vadd.f32 %v2768_v0, %v2735_v55  ;;  %v2962_v28 = vmul.f32 %v5174_v43, %v2945_v39  ;;  %vm2967_vm13 = vweird.f32 %v5174_v43 }
 0x505   : > { %5175 = vrcp.f32 %v6476_v9  ;;  %vm2968_vm3 = vmor %vm2966_vm0, %vm2967_vm13  ;;  %v2987_v19 = vand.u32 2147483648, %v6476_v9  ;;  %v2985_v41 = vand.u32 2147483647, %v6476_v9  ;;  %vm2981_vm0 = vweird.f32 %v6476_v9 }
 0x506   : > { %v2833_v59 = vadd.f32 %v2817_v7, %v2784_v4  ;;  %5177 = vpow2.f32 %v4809_v62  ;;  %v2963_v13 = vsub.f32 1.0, %v2962_v28 }
 0x507   : > { %v2568_v8 = vpop.f32.mrf.mxu0  ;;  %v2700_v47 = vld [vmem:[#allocation3 + $0xad] sm:$0xff]  ;;  %v2988_v37 = vor.u32 1.1754944e-38, %v2987_v19 }
 0x508   : > { %v2752_v2 = vld [vmem:[#allocation3 + $0xae] sm:$0xff]  ;;  %2681 = vst.msk [vmem:[#allocation3 + $0xb8] sm:$0xff] %vm613_vm2, %v2568_v8  ;;  %2622 = vrot.lane.b32.xlu2 %v2568_v8, %s5441_s12  ;;  %v6484_v57 = vadd.f32 %v2866_v10, %v2833_v59  ;;  %v2717_v60 = vmul.f32 %v6423_v36, %v2700_v47  ;;  %v2964_v50 = vmul.f32 %v5174_v43, %v2963_v13 }
 0x509   : > { %v2801_v49 = vld [vmem:[#allocation3 + $0xaf] sm:$0xff]  ;;  %v2769_v12 = vmul.f32 %v6430_v1, %v2752_v2 }
 0x50a   : > { %v4810_v38 = vmul.f32 -1.442695, %v6484_v57  ;;  %v2736_v15 = vadd.f32 %v6428_v29, %v2717_v60  ;;  %v2965_v5 = vadd.f32 %v5174_v43, %v2964_v50  ;;  %v2818_v11 = vmul.f32 %v6435_v23, %v2801_v49  ;;  %v2850_v35 = vld [vmem:[#allocation3 + $0xb0] sm:$0xff] }
 0x50b   : > { %v5176_v16 = vpop.eup %5175  ;;  %v2867_v39 = vmul.f32 %v6439_v18, %v2850_v35 }
 0x50c   : > { %v5178_v14 = vpop.eup %5177  ;;  %v2977_v20 = vmul.f32 %v5176_v16, %v6476_v9  ;;  %5179 = vpow2.f32 %v4810_v38  ;;  %v2785_v17 = vadd.f32 %v2769_v12, %v2736_v15  ;;  %v2969_v25 = vsel %vm2968_vm3, %v5174_v43, %v2965_v5 }
 0x50d   : > { %v6492_v24 = vadd.f32 1.0, %v5178_v14  ;;  %v2974_v63 = vsel %vm2971_vm4, %v2973_v51, %v2969_v25  ;;  %vm2982_vm13 = vweird.f32 %v5176_v16  ;;  %vm2986_vm4 = vcmp.eq.f32.partialorder %v2985_v41, 8.507059e+37 }
 0x50e   : > { %v2978_v27 = vsub.f32 1.0, %v2977_v20  ;;  %v2834_v33 = vadd.f32 %v2818_v11, %v2785_v17  ;;  %v3201_v21 = vmul.f32 %v2974_v63, %v6449_v30  ;;  %vm2983_vm3 = vmor %vm2981_vm0, %vm2982_vm13 }
 0x50f   : > { %v2571_v58 = vpop.f32.mrf.mxu0  ;;  %5181 = vrcp.f32 %v6492_v24  ;;  %v2701_v34 = vld [vmem:[#allocation3 + $0xb5] sm:$0xff]  ;;  %v3002_v60 = vand.u32 2147483648, %v6492_v24  ;;  %vm2996_vm0 = vweird.f32 %v6492_v24 }
 0x510   : > { %v2753_v22 = vld [vmem:[#allocation3 + $0xb6] sm:$0xff]  ;;  %2682 = vst.msk [vmem:[#allocation3 + $0xc0] sm:$0xff] %vm613_vm2, %v2571_v58  ;;  %2624 = vrot.lane.b32.xlu0 %v2571_v58, %s5441_s12  ;;  %v2979_v56 = vmul.f32 %v5176_v16, %v2978_v27  ;;  %v2718_v6 = vmul.f32 %v6423_v36, %v2701_v34  ;;  %v6503_v45 = vadd.f32 %v2867_v39, %v2834_v33 }
 0x511   : > { %3217 = vst.msk [vmem:[#allocation4] sm:$0xff] %vm613_vm2, %v3201_v21  ;;  %v2770_v42 = vmul.f32 %v6430_v1, %v2753_v22  ;;  %v2802_v53 = vld [vmem:[#allocation3 + $0xb7] sm:$0xff]  ;;  %v3003_v35 = vor.u32 1.1754944e-38, %v3002_v60 }
 0x512   : > { %v5180_v30 = vpop.eup %5179  ;;  %v2980_v40 = vadd.f32 %v5176_v16, %v2979_v56  ;;  %v2737_v44 = vadd.f32 %v6428_v29, %v2718_v6  ;;  %v4811_v54 = vmul.f32 -1.442695, %v6503_v45  ;;  %v2851_v61 = vld [vmem:[#allocation3 + $0xb8] sm:$0xff]  ;;  %v2819_v9 = vmul.f32 %v6435_v23, %v2802_v53 }
 0x513   : > { %v6508_v26 = vadd.f32 1.0, %v5180_v30  ;;  %v2868_v10 = vmul.f32 %v6439_v18, %v2851_v61 }
 0x514   : > { %v2984_v55 = vsel %vm2983_vm3, %v5176_v16, %v2980_v40  ;;  %v2786_v0 = vadd.f32 %v2770_v42, %v2737_v44 }
 0x515   : > { %v5182_v62 = vpop.eup %5181  ;;  %v2989_v43 = vsel %vm2986_vm4, %v2988_v37, %v2984_v55  ;;  %5183 = vrcp.f32 %v6508_v26  ;;  %v3015_v19 = vand.u32 2147483647, %v6508_v26 }
 0x516   : > { %v3202_v4 = vmul.f32 %v2989_v43, %v6461_v32  ;;  %v2992_v7 = vmul.f32 %v5182_v62, %v6492_v24  ;;  %v2835_v59 = vadd.f32 %v2819_v9, %v2786_v0  ;;  %5185 = vpow2.f32 %v4811_v54 }
 0x517   : > { %v2573_v28 = vpop.f32.mrf.mxu0  ;;  %v2702_v8 = vld [vmem:[#allocation3 + $0xbd] sm:$0xff]  ;;  %v3000_v32 = vand.u32 2147483647, %v6492_v24  ;;  %vm2997_vm13 = vweird.f32 %v5182_v62 }
 0x518   : > { %v2754_v13 = vld [vmem:[#allocation3 + $0xbe] sm:$0xff]  ;;  %2683 = vst.msk [vmem:[#allocation3 + $0xc8] sm:$0xff] %vm613_vm2, %v2573_v28  ;;  %2626 = vrot.lane.b32.xlu1 %v2573_v28, %s5441_s12  ;;  %v3233_v31 = vpack.c.bf16 %v3202_v4, %v3201_v21  ;;  %v2993_v47 = vsub.f32 1.0, %v2992_v7  ;;  %v2719_v2 = vmul.f32 %v6423_v36, %v2702_v8  ;;  %v6522_v50 = vadd.f32 %v2868_v10, %v2835_v59  ;;  %vm2998_vm3 = vmor %vm2996_vm0, %vm2997_vm13 }
 0x519   : > { %3218 = vst.msk [vmem:[#allocation4 + $0x8] sm:$0xff] %vm613_vm2, %v3202_v4  ;;  %v2803_v3 = vld [vmem:[#allocation3 + $0xbf] sm:$0xff]  ;;  %v2771_v15 = vmul.f32 %v6430_v1, %v2754_v13  ;;  %vm3001_vm4 = vcmp.eq.f32.partialorder %v3000_v32, 8.507059e+37  ;;  %v3017_v21 = vand.u32 2147483648, %v6508_v26  ;;  %vm3011_vm0 = vweird.f32 %v6508_v26 }
 0x51a   : > { %4835 = vmatmul.msk.bf16.vlgmr.msrb.gmra.mxu2 %vm613_vm2, %v3233_v31  ;;  %v2994_v49 = vmul.f32 %v5182_v62, %v2993_v47  ;;  %v2738_v38 = vadd.f32 %v6428_v29, %v2719_v2  ;;  %v4812_v16 = vmul.f32 -1.442695, %v6522_v50  ;;  %v2820_v20 = vmul.f32 %v6435_v23, %v2803_v3  ;;  %v2852_v17 = vld [vmem:[#allocation3 + $0xc0] sm:$0xff] }
 0x51b   : > { %v5184_v12 = vpop.eup %5183  ;;  %v2869_v22 = vmul.f32 %v6439_v18, %v2852_v17  ;;  %v3018_v53 = vor.u32 1.1754944e-38, %v3017_v21 }
 0x51c   : > { %v2995_v5 = vadd.f32 %v5182_v62, %v2994_v49  ;;  %v3007_v51 = vmul.f32 %v5184_v12, %v6508_v26  ;;  %v2787_v14 = vadd.f32 %v2771_v15, %v2738_v38  ;;  %v5186_v11 = vpop.eup %5185  ;;  %5187 = vpow2.f32 %v4812_v16 }
 0x51d   : > { %v6531_v27 = vadd.f32 1.0, %v5186_v11  ;;  %vm3012_vm13 = vweird.f32 %v5184_v12 }
 0x51e   : > { %v2999_v25 = vsel %vm2998_vm3, %v5182_v62, %v2995_v5  ;;  %v3008_v63 = vsub.f32 1.0, %v3007_v51  ;;  %v2836_v33 = vadd.f32 %v2820_v20, %v2787_v14  ;;  %vm3013_vm3 = vmor %vm3011_vm0, %vm3012_vm13 }
 0x51f   : > { %v2576_v24 = vpop.f32.mrf.mxu0  ;;  %v3004_v58 = vsel %vm3001_vm4, %v3003_v35, %v2999_v25  ;;  %v2703_v34 = vld [vmem:[#allocation3 + $0xc5] sm:$0xff]  ;;  %5189 = vrcp.f32 %v6531_v27  ;;  %vm3016_vm4 = vcmp.eq.f32.partialorder %v3015_v19, 8.507059e+37  ;;  %v3030_v32 = vand.u32 2147483647, %v6531_v27 }
 0x520   : > { %2684 = vst.msk [vmem:[#allocation3 + $0xd0] sm:$0xff] %vm613_vm2, %v2576_v24  ;;  %2628 = vrot.lane.b32.xlu2 %v2576_v24, %s5441_s12  ;;  %v3009_v39 = vmul.f32 %v5184_v12, %v3008_v63  ;;  %v3203_v56 = vmul.f32 %v3004_v58, %v6472_v48  ;;  %v2755_v41 = vld [vmem:[#allocation3 + $0xc6] sm:$0xff]  ;;  %v2720_v6 = vmul.f32 %v6423_v36, %v2703_v34  ;;  %v3032_v60 = vand.u32 2147483648, %v6531_v27 }
 0x521   : > { %v2804_v40 = vld [vmem:[#allocation3 + $0xc7] sm:$0xff]  ;;  %v6543_v44 = vadd.f32 %v2869_v22, %v2836_v33  ;;  %v2772_v48 = vmul.f32 %v6430_v1, %v2755_v41  ;;  %vm3026_vm0 = vweird.f32 %v6531_v27 }
 0x522   : > { %v3010_v30 = vadd.f32 %v5184_v12, %v3009_v39  ;;  %3219 = vst.msk [vmem:[#allocation4 + $0x10] sm:$0xff] %vm613_vm2, %v3203_v56  ;;  %v5188_v42 = vpop.eup %5187  ;;  %v2739_v37 = vadd.f32 %v6428_v29, %v2720_v6  ;;  %v2853_v0 = vld [vmem:[#allocation3 + $0xc8] sm:$0xff]  ;;  %v2821_v43 = vmul.f32 %v6435_v23, %v2804_v40  ;;  %v3033_v35 = vor.u32 1.1754944e-38, %v3032_v60 }
 0x523   : > { %v6547_v55 = vadd.f32 1.0, %v5188_v42  ;;  %v4813_v61 = vmul.f32 -1.442695, %v6543_v44  ;;  %v2870_v10 = vmul.f32 %v6439_v18, %v2853_v0 }
 0x524   : > { %v3014_v54 = vsel %vm3013_vm3, %v5184_v12, %v3010_v30  ;;  %v2788_v62 = vadd.f32 %v2772_v48, %v2739_v37 }
 0x525   : > { %v3019_v26 = vsel %vm3016_vm4, %v3018_v53, %v3014_v54  ;;  %v5190_v9 = vpop.eup %5189  ;;  %5191 = vrcp.f32 %v6547_v55  ;;  %vm3031_vm4 = vcmp.eq.f32.partialorder %v3030_v32, 8.507059e+37  ;;  %v3045_v25 = vand.u32 2147483647, %v6547_v55 }
 0x526   : > { %v3204_v4 = vmul.f32 %v3019_v26, %v6484_v57  ;;  %v3022_v28 = vmul.f32 %v5190_v9, %v6531_v27  ;;  %v2837_v59 = vadd.f32 %v2821_v43, %v2788_v62  ;;  %5193 = vpow2.f32 %v4813_v61 }
 0x527   : > { %v2578_v7 = vpop.f32.mrf.mxu0  ;;  %v2704_v8 = vld [vmem:[#allocation3 + $0xcd] sm:$0xff]  ;;  %vm3027_vm13 = vweird.f32 %v5190_v9  ;;  %v3047_v22 = vand.u32 2147483648, %v6547_v55 }
 0x528   : > { %v2756_v13 = vld [vmem:[#allocation3 + $0xce] sm:$0xff]  ;;  %2685 = vst.msk [vmem:[#allocation3 + $0xd8] sm:$0xff] %vm613_vm2, %v2578_v7  ;;  %2630 = vrot.lane.b32.xlu0 %v2578_v7, %s5441_s12  ;;  %v3234_v31 = vpack.c.bf16 %v3204_v4, %v3203_v56  ;;  %v2721_v47 = vmul.f32 %v6423_v36, %v2704_v8  ;;  %v3023_v57 = vsub.f32 1.0, %v3022_v28  ;;  %v6559_v2 = vadd.f32 %v2870_v10, %v2837_v59  ;;  %vm3028_vm3 = vmor %vm3026_vm0, %vm3027_vm13 }
 0x529   : > { %3220 = vst.msk [vmem:[#allocation4 + $0x18] sm:$0xff] %vm613_vm2, %v3204_v4  ;;  %v2773_v49 = vmul.f32 %v6430_v1, %v2756_v13  ;;  %v2805_v38 = vld [vmem:[#allocation3 + $0xcf] sm:$0xff]  ;;  %vm3041_vm0 = vweird.f32 %v6547_v55  ;;  %v3048_v54 = vor.u32 1.1754944e-38, %v3047_v22 }
 0x52a   : > { %4836 = vmatmul.msk.bf16.gmra.mxu2 %vm613_vm2, %v3234_v31  ;;  %v2740_v3 = vadd.f32 %v6428_v29, %v2721_v47  ;;  %v3024_v15 = vmul.f32 %v5190_v9, %v3023_v57  ;;  %v4814_v12 = vmul.f32 -1.442695, %v6559_v2  ;;  %v2822_v20 = vmul.f32 %v6435_v23, %v2805_v38  ;;  %v2854_v17 = vld [vmem:[#allocation3 + $0xd0] sm:$0xff] }
 0x52b   : > { %v5192_v16 = vpop.eup %5191  ;;  %v2871_v56 = vmul.f32 %v6439_v18, %v2854_v17 }
 0x52c   : > { %v2789_v5 = vadd.f32 %v2773_v49, %v2740_v3  ;;  %v3025_v51 = vadd.f32 %v5190_v9, %v3024_v15  ;;  %v3037_v14 = vmul.f32 %v5192_v16, %v6547_v55  ;;  %5195 = vpow2.f32 %v4814_v12  ;;  %v5194_v11 = vpop.eup %5193 }
 0x52d   : > { %v6571_v58 = vadd.f32 1.0, %v5194_v11  ;;  %vm3042_vm13 = vweird.f32 %v5192_v16 }
 0x52e   : > { %v3029_v33 = vsel %vm3028_vm3, %v5190_v9, %v3025_v51  ;;  %v3038_v24 = vsub.f32 1.0, %v3037_v14  ;;  %v2838_v21 = vadd.f32 %v2822_v20, %v2789_v5  ;;  %vm3043_vm3 = vmor %vm3041_vm0, %vm3042_vm13 }
 0x52f   : > { %v2581_v63 = vpop.f32.mrf.mxu0  ;;  %v2705_v27 = vld [vmem:[#allocation3 + $0xd5] sm:$0xff]  ;;  %v3034_v34 = vsel %vm3031_vm4, %v3033_v35, %v3029_v33  ;;  %5197 = vrcp.f32 %v6571_v58  ;;  %vm3046_vm4 = vcmp.eq.f32.partialorder %v3045_v25, 8.507059e+37  ;;  %v3060_v32 = vand.u32 2147483647, %v6571_v58 }
 0x530   : > { %v2757_v19 = vld [vmem:[#allocation3 + $0xd6] sm:$0xff]  ;;  %2686 = vst.msk [vmem:[#allocation3 + $0xe0] sm:$0xff] %vm613_vm2, %v2581_v63  ;;  %2632 = vrot.lane.b32.xlu1 %v2581_v63, %s5441_s12  ;;  %v2722_v39 = vmul.f32 %v6423_v36, %v2705_v27  ;;  %v3039_v41 = vmul.f32 %v5192_v16, %v3038_v24  ;;  %v3205_v6 = vmul.f32 %v3034_v34, %v6503_v45  ;;  %v3062_v49 = vand.u32 2147483648, %v6571_v58 }
 0x531   : > { %v2774_v40 = vmul.f32 %v6430_v1, %v2757_v19  ;;  %v2806_v42 = vld [vmem:[#allocation3 + $0xd7] sm:$0xff]  ;;  %v6584_v48 = vadd.f32 %v2871_v56, %v2838_v21  ;;  %vm3056_vm0 = vweird.f32 %v6571_v58 }
 0x532   : > { %v2741_v30 = vadd.f32 %v6428_v29, %v2722_v39  ;;  %v5196_v53 = vpop.eup %5195  ;;  %v3040_v37 = vadd.f32 %v5192_v16, %v3039_v41  ;;  %3221 = vst.msk [vmem:[#allocation4 + $0x20] sm:$0xff] %vm613_vm2, %v3205_v6  ;;  %v2855_v61 = vld [vmem:[#allocation3 + $0xd8] sm:$0xff]  ;;  %v2823_v62 = vmul.f32 %v6435_v23, %v2806_v42  ;;  %v3063_v63 = vor.u32 1.1754944e-38, %v3062_v49 }
 0x533   : > { %v6586_v0 = vadd.f32 1.0, %v5196_v53  ;;  %v4815_v43 = vmul.f32 -1.442695, %v6584_v48  ;;  %v2872_v59 = vmul.f32 %v6439_v18, %v2855_v61 }
 0x534   : > { %v2790_v45 = vadd.f32 %v2774_v40, %v2741_v30  ;;  %v3044_v26 = vsel %vm3043_vm3, %v5192_v16, %v3040_v37  ;;  %vm6608_vm3 = vcmp.eq.f32.partialorder %v3060_v32, 8.507059e+37 }
 0x535   : > { %v3049_v9 = vsel %vm3046_vm4, %v3048_v54, %v3044_v26  ;;  %5199 = vrcp.f32 %v6586_v0  ;;  %v5198_v55 = vpop.eup %5197  ;;  %v3075_v24 = vand.u32 2147483647, %v6586_v0  ;;  %v3077_v21 = vand.u32 2147483648, %v6586_v0 }
 0x536   : > { %v3206_v7 = vmul.f32 %v3049_v9, %v6522_v50  ;;  %v2839_v28 = vadd.f32 %v2823_v62, %v2790_v45  ;;  %5201 = vpow2.f32 %v4815_v43  ;;  %v3052_v13 = vmul.f32 %v5198_v55, %v6571_v58 }
 0x537   : > { %v2583_v4 = vpop.f32.mrf.mxu0  ;;  %v2706_v10 = vld [vmem:[#allocation3 + $0xdd] sm:$0xff]  ;;  %vm3057_vm13 = vweird.f32 %v5198_v55  ;;  %v3078_v45 = vor.u32 1.1754944e-38, %v3077_v21 }
 0x538   : > { %v2758_v8 = vld [vmem:[#allocation3 + $0xde] sm:$0xff]  ;;  %2687 = vst.msk [vmem:[#allocation3 + $0xe8] sm:$0xff] %vm613_vm2, %v2583_v4  ;;  %2634 = vrot.lane.b32.xlu2 %v2583_v4, %s5441_s12  ;;  %v2723_v31 = vmul.f32 %v6423_v36, %v2706_v10  ;;  %v3235_v47 = vpack.c.bf16 %v3206_v7, %v3205_v6  ;;  %v6598_v57 = vadd.f32 %v2872_v59, %v2839_v28  ;;  %v3053_v50 = vsub.f32 1.0, %v3052_v13  ;;  %vm3058_vm4 = vmor %vm3056_vm0, %vm3057_vm13 }
 0x539   : > { %3222 = vst.msk [vmem:[#allocation4 + $0x28] sm:$0xff] %vm613_vm2, %v3206_v7  ;;  %v2775_v3 = vmul.f32 %v6430_v1, %v2758_v8  ;;  %v2807_v15 = vld [vmem:[#allocation3 + $0xdf] sm:$0xff]  ;;  %vm3071_vm0 = vweird.f32 %v6586_v0 }
 0x53a   : > { %v2742_v60 = vadd.f32 %v6428_v29, %v2723_v31  ;;  %4837 = vmatmul.msk.bf16.gmra.mxu2 %vm613_vm2, %v3235_v47  ;;  %v4816_v38 = vmul.f32 -1.442695, %v6598_v57  ;;  %v3054_v16 = vmul.f32 %v5198_v55, %v3053_v50  ;;  %v2824_v35 = vmul.f32 %v6435_v23, %v2807_v15  ;;  %v2856_v58 = vld [vmem:[#allocation3 + $0xe0] sm:$0xff] }
 0x53b   : > { %v5200_v12 = vpop.eup %5199  ;;  %v2873_v30 = vmul.f32 %v6439_v18, %v2856_v58 }
 0x53c   : > { %v2791_v5 = vadd.f32 %v2775_v3, %v2742_v60  ;;  %v5202_v51 = vpop.eup %5201  ;;  %v3067_v14 = vmul.f32 %v5200_v12, %v6586_v0  ;;  %5203 = vpow2.f32 %v4816_v38  ;;  %v3055_v20 = vadd.f32 %v5198_v55, %v3054_v16 }
 0x53d   : > { %v6612_v11 = vadd.f32 1.0, %v5202_v51  ;;  %vm3072_vm13 = vweird.f32 %v5200_v12 }
 0x53e   : > { %v3068_v33 = vsub.f32 1.0, %v3067_v14  ;;  %v3059_v19 = vsel %vm3058_vm4, %v5198_v55, %v3055_v20  ;;  %v2840_v22 = vadd.f32 %v2824_v35, %v2791_v5  ;;  %vm3073_vm4 = vmor %vm3071_vm0, %vm3072_vm13 }
 0x53f   : > { %v2586_v25 = vpop.f32.mrf.mxu0  ;;  %v2707_v27 = vld [vmem:[#allocation3 + $0xe5] sm:$0xff]  ;;  %5205 = vrcp.f32 %v6612_v11  ;;  %v3064_v39 = vsel %vm6608_vm3, %v3063_v63, %v3059_v19  ;;  %vm3076_vm3 = vcmp.eq.f32.partialorder %v3075_v24, 8.507059e+37  ;;  %vm3086_vm0 = vweird.f32 %v6612_v11 }
 0x540   : > { %2688 = vst.msk [vmem:[#allocation3 + $0xf0] sm:$0xff] %vm613_vm2, %v2586_v25  ;;  %2636 = vrot.lane.b32.xlu0 %v2586_v25, %s5441_s12  ;;  %v2759_v34 = vld [vmem:[#allocation3 + $0xe6] sm:$0xff]  ;;  %v3069_v56 = vmul.f32 %v5200_v12, %v3068_v33  ;;  %v2724_v41 = vmul.f32 %v6423_v36, %v2707_v27  ;;  %v3207_v6 = vmul.f32 %v3064_v39, %v6543_v44 }
 0x541   : > { %v2776_v37 = vmul.f32 %v6430_v1, %v2759_v34  ;;  %v2808_v54 = vld [vmem:[#allocation3 + $0xe7] sm:$0xff]  ;;  %v6631_v26 = vadd.f32 %v2873_v30, %v2840_v22 }
 0x542   : > { %v5204_v40 = vpop.eup %5203  ;;  %v3070_v42 = vadd.f32 %v5200_v12, %v3069_v56  ;;  %v2743_v53 = vadd.f32 %v6428_v29, %v2724_v41  ;;  %3223 = vst.msk [vmem:[#allocation4 + $0x30] sm:$0xff] %vm613_vm2, %v3207_v6  ;;  %v2857_v43 = vld [vmem:[#allocation3 + $0xe8] sm:$0xff]  ;;  %v2825_v0 = vmul.f32 %v6435_v23, %v2808_v54 }
 0x543   : > { %v6629_v61 = vadd.f32 1.0, %v5204_v40  ;;  %v2874_v13 = vmul.f32 %v6439_v18, %v2857_v43  ;;  %v4817_v31 = vmul.f32 -1.442695, %v6631_v26 }
 0x544   : > { %v3074_v44 = vsel %vm3073_vm4, %v5200_v12, %v3070_v42  ;;  %v2792_v62 = vadd.f32 %v2776_v37, %v2743_v53  ;;  %v3090_v12 = vand.u32 2147483647, %v6612_v11 }
 0x545   : > { %v5206_v9 = vpop.eup %5205  ;;  %v3079_v55 = vsel %vm3076_vm3, %v3078_v45, %v3074_v44  ;;  %5207 = vrcp.f32 %v6629_v61  ;;  %v3105_v58 = vand.u32 2147483647, %v6629_v61  ;;  %v3107_v22 = vand.u32 2147483648, %v6629_v61 }
 0x546   : > { %v3208_v7 = vmul.f32 %v3079_v55, %v6559_v2  ;;  %v3082_v28 = vmul.f32 %v5206_v9, %v6612_v11  ;;  %v2841_v8 = vadd.f32 %v2825_v0, %v2792_v62  ;;  %v3092_v2 = vand.u32 2147483648, %v6612_v11 }
 0x547   : > { %v2588_v4 = vpop.f32.mrf.mxu0  ;;  %v2708_v59 = vld [vmem:[#allocation3 + $0xed] sm:$0xff]  ;;  %5209 = vpow2.f32 %v4817_v31  ;;  %vm3087_vm13 = vweird.f32 %v5206_v9  ;;  %vm3091_vm3 = vcmp.eq.f32.partialorder %v3090_v12, 8.507059e+37 }
 0x548   : > { %v2760_v10 = vld [vmem:[#allocation3 + $0xee] sm:$0xff]  ;;  %2689 = vst.msk [vmem:[#allocation3 + $0xf8] sm:$0xff] %vm613_vm2, %v2588_v4  ;;  %2638 = vrot.lane.b32.xlu1 %v2588_v4, %s5441_s12  ;;  %v2725_v47 = vmul.f32 %v6423_v36, %v2708_v59  ;;  %v3236_v50 = vpack.c.bf16 %v3208_v7, %v3207_v6  ;;  %v3083_v32 = vsub.f32 1.0, %v3082_v28  ;;  %v6644_v3 = vadd.f32 %v2874_v13, %v2841_v8  ;;  %vm3088_vm4 = vmor %vm3086_vm0, %vm3087_vm13 }
 0x549   : > { %3224 = vst.msk [vmem:[#allocation4 + $0x38] sm:$0xff] %vm613_vm2, %v3208_v7  ;;  %v2809_v60 = vld [vmem:[#allocation3 + $0xef] sm:$0xff]  ;;  %v2777_v38 = vmul.f32 %v6430_v1, %v2760_v10  ;;  %v3093_v25 = vor.u32 1.1754944e-38, %v3092_v2  ;;  %vm3101_vm0 = vweird.f32 %v6629_v61 }
 0x54a   : > { %v2744_v49 = vadd.f32 %v6428_v29, %v2725_v47  ;;  %4838 = vmatmul.msk.bf16.gmra.mxu2 %vm613_vm2, %v3236_v50  ;;  %v3084_v15 = vmul.f32 %v5206_v9, %v3083_v32  ;;  %v4818_v5 = vmul.f32 -1.442695, %v6644_v3  ;;  %v2826_v14 = vmul.f32 %v6435_v23, %v2809_v60  ;;  %v2858_v35 = vld [vmem:[#allocation3 + $0xf0] sm:$0xff] }
 0x54b   : > { %v5208_v16 = vpop.eup %5207  ;;  %v2875_v56 = vmul.f32 %v6439_v18, %v2858_v35 }
 0x54c   : > { %v2793_v51 = vadd.f32 %v2777_v38, %v2744_v49  ;;  %v3085_v20 = vadd.f32 %v5206_v9, %v3084_v15  ;;  %v3097_v17 = vmul.f32 %v5208_v16, %v6629_v61  ;;  %5211 = vpow2.f32 %v4818_v5 }
 0x54d   : > { %v5210_v34 = vpop.eup %5209  ;;  %vm3102_vm13 = vweird.f32 %v5208_v16 }
 0x54e   : > { %v2842_v63 = vadd.f32 %v2826_v14, %v2793_v51  ;;  %v3089_v24 = vsel %vm3088_vm4, %v5206_v9, %v3085_v20  ;;  %v3098_v27 = vsub.f32 1.0, %v3097_v17  ;;  %v6661_v30 = vadd.f32 1.0, %v5210_v34  ;;  %vm3103_vm4 = vmor %vm3101_vm0, %vm3102_vm13 }
 0x54f   : > { %v2591_v33 = vpop.f32.mrf.mxu0  ;;  %v2709_v19 = vld [vmem:[#allocation3 + $0xf5] sm:$0xff]  ;;  %v3094_v11 = vsel %vm3091_vm3, %v3093_v25, %v3089_v24  ;;  %vm3106_vm3 = vcmp.eq.f32.partialorder %v3105_v58, 8.507059e+37 }
 0x550   : > { %v2761_v21 = vld [vmem:[#allocation3 + $0xf6] sm:$0xff]  ;;  %2690 = vst.msk [vmem:[#allocation3 + $0x100] sm:$0xff] %vm613_vm2, %v2591_v33  ;;  %2640 = vrot.lane.b32.xlu2 %v2591_v33, %s5441_s12  ;;  %v2726_v39 = vmul.f32 %v6423_v36, %v2709_v19  ;;  %v3099_v41 = vmul.f32 %v5208_v16, %v3098_v27  ;;  %v3209_v6 = vmul.f32 %v3094_v11, %v6584_v48  ;;  %5213 = vrcp.f32 %v6661_v30 }
 0x551   : > { %v2810_v40 = vld [vmem:[#allocation3 + $0xf7] sm:$0xff]  ;;  %v2778_v37 = vmul.f32 %v6430_v1, %v2761_v21  ;;  %v6665_v54 = vadd.f32 %v2875_v56, %v2842_v63  ;;  %v3108_v48 = vor.u32 1.1754944e-38, %v3107_v22  ;;  %v3120_v38 = vand.u32 2147483647, %v6661_v30 }
 0x552   : > { %v2613_v42 = vpop.permute.xlu0 %2612  ;;  %v2745_v53 = vadd.f32 %v6428_v29, %v2726_v39  ;;  %v3100_v45 = vadd.f32 %v5208_v16, %v3099_v41  ;;  %v2859_v44 = vld [vmem:[#allocation3 + $0xf8] sm:$0xff]  ;;  %v5212_v62 = vpop.eup %5211  ;;  %3225 = vst.msk [vmem:[#allocation4 + $0x40] sm:$0xff] %vm613_vm2, %v3209_v6  ;;  %v2827_v9 = vmul.f32 %v6435_v23, %v2810_v40  ;;  %v3122_v15 = vand.u32 2147483648, %v6661_v30 }
 0x553   : > { %2660 = vst.msk [vmem:[#allocation6] sm:$0xff] %vm613_vm2, %v2613_v42  ;;  %v4819_v55 = vmul.f32 -1.442695, %v6665_v54  ;;  %v6673_v4 = vadd.f32 1.0, %v5212_v62  ;;  %v2876_v61 = vmul.f32 %v6439_v18, %v2859_v44  ;;  %vm3116_vm0 = vweird.f32 %v6661_v30 }
 0x554   : > { %v2794_v43 = vadd.f32 %v2778_v37, %v2745_v53  ;;  %v3104_v0 = vsel %vm3103_vm4, %v5208_v16, %v3100_v45  ;;  %vm6698_vm4 = vcmp.eq.f32.partialorder %v3120_v38, 8.507059e+37  ;;  %v3123_v19 = vor.u32 1.1754944e-38, %v3122_v15 }
 0x555   : > { %v3109_v7 = vsel %vm3106_vm3, %v3108_v48, %v3104_v0  ;;  %5215 = vpow2.f32 %v4819_v55  ;;  %v3135_v41 = vand.u32 2147483647, %v6673_v4 }
 0x556   : > { %v2843_v28 = vadd.f32 %v2827_v9, %v2794_v43  ;;  %v3210_v10 = vmul.f32 %v3109_v7, %v6598_v57  ;;  %5217 = vrcp.f32 %v6673_v4  ;;  %v5214_v50 = vpop.eup %5213 }
 0x557   : > { %v2593_v59 = vpop.f32.mrf.mxu0  ;;  %v2710_v8 = vld [vmem:[#allocation3 + $0xfd] sm:$0xff]  ;;  %v3112_v57 = vmul.f32 %v5214_v50, %v6661_v30  ;;  %vm3117_vm13 = vweird.f32 %v5214_v50 }
 0x558   : > { %2691 = vst.msk [vmem:[#allocation3 + $0x108] sm:$0xff] %vm613_vm2, %v2593_v59  ;;  %2642 = vrot.lane.b32.xlu0 %v2593_v59, %s5441_s12  ;;  %v6680_v13 = vadd.f32 %v2876_v61, %v2843_v28  ;;  %v2727_v31 = vmul.f32 %v6423_v36, %v2710_v8  ;;  %v2762_v47 = vld [vmem:[#allocation3 + $0xfe] sm:$0xff]  ;;  %v3237_v32 = vpack.c.bf16 %v3210_v10, %v3209_v6  ;;  %vm3118_vm3 = vmor %vm3116_vm0, %vm3117_vm13  ;;  %v3137_v6 = vand.u32 2147483648, %v6673_v4 }
 0x559   : > { %3226 = vst.msk [vmem:[#allocation4 + $0x48] sm:$0xff] %vm613_vm2, %v3210_v10  ;;  %v2779_v16 = vmul.f32 %v6430_v1, %v2762_v47  ;;  %v2811_v5 = vld [vmem:[#allocation3 + $0xff] sm:$0xff]  ;;  %v3113_v14 = vsub.f32 1.0, %v3112_v57  ;;  %vm3136_vm0 = vcmp.eq.f32.partialorder %v3135_v41, 8.507059e+37 }
 0x55a   : > { %v2615_v2 = vpop.permute.xlu0 %2614  ;;  %v2621_v60 = vpop.permute.xlu2 %2620  ;;  %v4820_v49 = vmul.f32 -1.442695, %v6680_v13  ;;  %4839 = vmatmul.msk.bf16.gmra.mxu2 %vm613_vm2, %v3237_v32  ;;  %v2746_v12 = vadd.f32 %v6428_v29, %v2727_v31  ;;  %v2828_v33 = vmul.f32 %v6435_v23, %v2811_v5  ;;  %v2860_v24 = vld [vmem:[#allocation3 + $0x100] sm:$0xff]  ;;  %v3138_v61 = vor.u32 1.1754944e-38, %v3137_v6 }
 0x55b   : > { %2661 = vst.msk [vmem:[#allocation6 + $0x8] sm:$0xff] %vm613_vm2, %v2615_v2  ;;  %v5216_v51 = vpop.eup %5215  ;;  %v3114_v25 = vmul.f32 %v5214_v50, %v3113_v14  ;;  %v2877_v40 = vmul.f32 %v6439_v18, %v2860_v24 }
 0x55c   : > { %2664 = vst.msk [vmem:[#allocation6 + $0x20] sm:$0xff] %vm613_vm2, %v2621_v60  ;;  %5219 = vpow2.f32 %v4820_v49  ;;  %v5218_v20 = vpop.eup %5217  ;;  %v6693_v17 = vadd.f32 1.0, %v5216_v51  ;;  %v2795_v35 = vadd.f32 %v2779_v16, %v2746_v12 }
 0x55d   : > { %v3127_v63 = vmul.f32 %v5218_v20, %v6673_v4  ;;  %v3115_v34 = vadd.f32 %v5214_v50, %v3114_v25  ;;  %vm3132_vm12 = vweird.f32 %v5218_v20 }
 0x55e   : > { %5221 = vrcp.f32 %v6693_v17  ;;  %v2844_v56 = vadd.f32 %v2828_v33, %v2795_v35  ;;  %v3150_v32 = vand.u32 2147483647, %v6693_v17  ;;  %v3152_v2 = vand.u32 2147483648, %v6693_v17 }
 0x55f   : > { %v2895_v27 = vld [vmem:[#allocation3 + $0x10d] sm:$0x7]  ;;  %v2711_v21 = vld [vmem:[#allocation3 + $0x105] sm:$0xff]  ;;  %v3128_v11 = vsub.f32 1.0, %v3127_v63  ;;  %v3119_v45 = vsel %vm3118_vm3, %v5214_v50, %v3115_v34 }
 0x560   : > { %2896 = vst.msk [vmem:[#allocation3 + $0x8d] sm:$0x7] %vm848_vm15, %v2895_v27  ;;  %v2728_v22 = vmul.f32 %v6423_v36, %v2711_v21  ;;  %v2763_v39 = vld [vmem:[#allocation3 + $0x106] sm:$0xff]  ;;  %v3124_v48 = vsel %vm6698_vm4, %v3123_v19, %v3119_v45  ;;  %vm3131_vm15 = vweird.f32 %v6673_v4  ;;  %v6715_v55 = vadd.f32 %v2877_v40, %v2844_v56 }
 0x561   : > { %v2812_v30 = vld [vmem:[#allocation3 + $0x107] sm:$0xff]  ;;  %v3129_v44 = vmul.f32 %v5218_v20, %v3128_v11  ;;  %v2780_v36 = vmul.f32 %v6430_v1, %v2763_v39  ;;  %v3211_v7 = vmul.f32 %v3124_v48, %v6631_v26  ;;  %vm3133_vm13 = vmor %vm3131_vm15, %vm3132_vm12  ;;  %vm3146_vm4 = vweird.f32 %v6693_v17 }
 0x562   : > { %v5220_v42 = vpop.eup %5219  ;;  %v2617_v53 = vpop.permute.xlu1 %2616  ;;  %v2747_v62 = vadd.f32 %v6428_v29, %v2728_v22  ;;  %v2861_v9 = vld [vmem:[#allocation3 + $0x108] sm:$0xff]  ;;  %v2829_v29 = vmul.f32 %v6435_v23, %v2812_v30  ;;  %v4821_v26 = vmul.f32 -1.442695, %v6715_v55  ;;  %v3153_v12 = vor.u32 1.1754944e-38, %v3152_v2 }
 0x563   : > { %v2623_v37 = vpop.permute.xlu2 %2622  ;;  %2662 = vst.msk [vmem:[#allocation6 + $0x10] sm:$0xff] %vm613_vm2, %v2617_v53  ;;  %v2958_v43 = vadd.f32 1.0, %v5220_v42  ;;  %v3130_v0 = vadd.f32 %v5218_v20, %v3129_v44  ;;  %v2878_v8 = vmul.f32 %v6439_v18, %v2861_v9  ;;  %vm3151_vm15 = vcmp.eq.f32.partialorder %v3150_v32, 8.507059e+37 }
 0x564   : > { %2665 = vst.msk [vmem:[#allocation6 + $0x28] sm:$0xff] %vm613_vm2, %v2623_v37  ;;  %v2796_v28 = vadd.f32 %v2780_v36, %v2747_v62  ;;  %v5222_v1 = vpop.eup %5221 }
 0x565   : > { %5223 = vrcp.f32 %v2958_v43  ;;  %v3134_v59 = vsel %vm3133_vm13, %v5218_v20, %v3130_v0  ;;  %3227 = vst.msk [vmem:[#allocation4 + $0x50] sm:$0xff] %vm613_vm2, %v3211_v7  ;;  %v3142_v4 = vmul.f32 %v5222_v1, %v6693_v17  ;;  %vm3147_vm12 = vweird.f32 %v5222_v1 }
 0x566   : > { %v2845_v10 = vadd.f32 %v2829_v29, %v2796_v28  ;;  %v3139_v31 = vsel %vm3136_vm0, %v3138_v61, %v3134_v59  ;;  %5225 = vpow2.f32 %v4821_v26  ;;  %vm3148_vm3 = vmor %vm3146_vm4, %vm3147_vm12  ;;  %v3165_v20 = vand.u32 2147483647, %v2958_v43 }
 0x567   : > { %v3212_v47 = vmul.f32 %v3139_v31, %v6644_v3  ;;  %v3143_v23 = vsub.f32 1.0, %v3142_v4  ;;  %v3167_v35 = vand.u32 2147483648, %v2958_v43  ;;  %vm3161_vm0 = vweird.f32 %v2958_v43 }
 0x568   : > { %v6726_v50 = vadd.f32 %v2878_v8, %v2845_v10  ;;  %vm3166_vm4 = vcmp.eq.f32.partialorder %v3165_v20, 8.507059e+37 }
 0x569   : > { %3228 = vst.msk [vmem:[#allocation4 + $0x58] sm:$0xff] %vm613_vm2, %v3212_v47  ;;  %v3238_v57 = vpack.c.bf16 %v3212_v47, %v3211_v7  ;;  %v3144_v49 = vmul.f32 %v5222_v1, %v3143_v23  ;;  %v3168_v17 = vor.u32 1.1754944e-38, %v3167_v35 }
 0x56a   : > { %v2619_v60 = vpop.permute.xlu1 %2618  ;;  %v4822_v18 = vmul.f32 -1.442695, %v6726_v50 }
 0x56b   : > { %v5224_v38 = vpop.eup %5223  ;;  %2663 = vst.msk [vmem:[#allocation6 + $0x18] sm:$0xff] %vm613_vm2, %v2619_v60  ;;  %4840 = vmatmul.msk.bf16.gmra.mxu2 %vm613_vm2, %v3238_v57  ;;  %v3145_v3 = vadd.f32 %v5222_v1, %v3144_v49 }
 0x56c   : > { %v3157_v15 = vmul.f32 %v5224_v38, %v2958_v43  ;;  %5227 = vpow2.f32 %v4822_v18  ;;  %v5226_v51 = vpop.eup %5225  ;;  %vm3162_vm13 = vweird.f32 %v5224_v38 }
 0x56d   : > { %v3149_v16 = vsel %vm3148_vm3, %v5222_v1, %v3145_v3  ;;  %v2959_v33 = vadd.f32 1.0, %v5226_v51  ;;  %vm3163_vm12 = vmor %vm3161_vm0, %vm3162_vm13  ;;  %v4843_v1 = vld [vmem:[%s7268_s5 + $0x4] sm:$0xf] }
 0x56e   : > { %v3158_v5 = vsub.f32 1.0, %v3157_v15  ;;  %v3154_v14 = vsel %vm3151_vm15, %v3153_v12, %v3149_v16  ;;  %v3515_v59 = vsel %vm1465_vm9, %v4843_v1, 0 }
 0x56f   : > { %v3213_v63 = vmul.f32 %v3154_v14, %v6665_v54  ;;  %5229 = vrcp.f32 %v2959_v33  ;;  %v3182_v6 = vand.u32 2147483648, %v2959_v33  ;;  %v3180_v42 = vand.u32 2147483647, %v2959_v33  ;;  %3524 = vmatpush.bf16.msrb.mxu1 %v3515_v59 }
 0x570   : > { %v3159_v25 = vmul.f32 %v5224_v38, %v3158_v5  ;;  %vm3176_vm15 = vweird.f32 %v2959_v33 }
 0x571   : > { %3229 = vst.msk [vmem:[#allocation4 + $0x60] sm:$0xff] %vm613_vm2, %v3213_v63  ;;  %v3183_v45 = vor.u32 1.1754944e-38, %v3182_v6  ;;  %v6810_v6 = vld [vmem:[%s7269_s6 + $0x1] ss:$0 sm:$0xff] }
 0x572   : > { %v5228_v24 = vpop.eup %5227  ;;  %v3160_v27 = vadd.f32 %v5224_v38, %v3159_v25 }
 0x573   : > { %v2960_v58 = vadd.f32 1.0, %v5228_v24 }
 0x574   : > { %v3164_v19 = vsel %vm3163_vm12, %v5224_v38, %v3160_v27  ;;  %vm3181_vm12 = vcmp.eq.f32.partialorder %v3180_v42, 8.507059e+37 }
 0x575   : > { %v3169_v21 = vsel %vm3166_vm4, %v3168_v17, %v3164_v19  ;;  %5231 = vrcp.f32 %v2960_v58  ;;  %v5230_v11 = vpop.eup %5229  ;;  %v3195_v62 = vand.u32 2147483647, %v2960_v58  ;;  %vm3191_vm4 = vweird.f32 %v2960_v58 }
 0x576   : > { %v3214_v34 = vmul.f32 %v3169_v21, %v6680_v13  ;;  %v3172_v22 = vmul.f32 %v5230_v11, %v2959_v33  ;;  %vm3177_vm3 = vweird.f32 %v5230_v11  ;;  %v3197_v13 = vand.u32 2147483648, %v2960_v58 }
 0x577   : > { %vm3178_vm13 = vmor %vm3176_vm15, %vm3177_vm3  ;;  %vm3196_vm10 = vcmp.eq.f32.partialorder %v3195_v62, 8.507059e+37 }
 0x578   : > { %3230 = vst.msk [vmem:[#allocation4 + $0x68] sm:$0xff] %vm613_vm2, %v3214_v34  ;;  %v3239_v54 = vpack.c.bf16 %v3214_v34, %v3213_v63  ;;  %v3173_v41 = vsub.f32 1.0, %v3172_v22  ;;  %v3198_v0 = vor.u32 1.1754944e-38, %v3197_v13 }
 0x57a   : > { %v2629_v39 = vpop.permute.xlu2 %2628  ;;  %v3174_v40 = vmul.f32 %v5230_v11, %v3173_v41 }
 0x57b   : > { %v5232_v56 = vpop.eup %5231  ;;  %2668 = vst.msk [vmem:[#allocation6 + $0x40] sm:$0xff] %vm613_vm2, %v2629_v39  ;;  %4841 = vmatmul.msk.bf16.gmra.mxu2 %vm613_vm2, %v3239_v54 }
 0x57c   : > { %v3187_v30 = vmul.f32 %v5232_v56, %v2960_v58  ;;  %v3175_v37 = vadd.f32 %v5230_v11, %v3174_v40  ;;  %vm3192_vm0 = vweird.f32 %v5232_v56 }
 0x57d   : > { %vm3193_vm11 = vmor %vm3191_vm4, %vm3192_vm0 }
 0x57e   : > { %v3188_v53 = vsub.f32 1.0, %v3187_v30  ;;  %v3179_v36 = vsel %vm3178_vm13, %v5230_v11, %v3175_v37 }
 0x57f   : > { %v3184_v43 = vsel %vm3181_vm12, %v3183_v45, %v3179_v36 }
 0x580   : > { %v3189_v44 = vmul.f32 %v5232_v56, %v3188_v53  ;;  %v3215_v7 = vmul.f32 %v3184_v43, %v6715_v55 }
 0x582   : > { %v2625_v48 = vpop.permute.xlu0 %2624  ;;  %v3190_v9 = vadd.f32 %v5232_v56, %v3189_v44  ;;  %3231 = vst.msk [vmem:[#allocation4 + $0x70] sm:$0xff] %vm613_vm2, %v3215_v7 }
 0x583   : > { %2666 = vst.msk [vmem:[#allocation6 + $0x30] sm:$0xff] %vm613_vm2, %v2625_v48 }
 0x584   : > { %v3194_v28 = vsel %vm3193_vm11, %v5232_v56, %v3190_v9 }
 0x585   : > { %v3199_v29 = vsel %vm3196_vm10, %v3198_v0, %v3194_v28 }
 0x586   : > { %v3216_v61 = vmul.f32 %v3199_v29, %v6726_v50 }
 0x588   : > { %3232 = vst.msk [vmem:[#allocation4 + $0x78] sm:$0xff] %vm613_vm2, %v3216_v61  ;;  %v3240_v4 = vpack.c.bf16 %v3216_v61, %v3215_v7 }
 0x58a   : > { %v2627_v10 = vpop.permute.xlu1 %2626 }
 0x58b   : > { %2667 = vst.msk [vmem:[#allocation6 + $0x38] sm:$0xff] %vm613_vm2, %v2627_v10  ;;  %4842 = vmatmul.msk.bf16.gmra.mxu2 %vm613_vm2, %v3240_v4 }
 0x592   : > { %v2635_v55 = vpop.permute.xlu2 %2634 }
 0x593   : > { %2671 = vst.msk [vmem:[#allocation6 + $0x58] sm:$0xff] %vm613_vm2, %v2635_v55 }
 0x59a   : > { %v2631_v8 = vpop.permute.xlu0 %2630 }
 0x59b   : > { %2669 = vst.msk [vmem:[#allocation6 + $0x48] sm:$0xff] %vm613_vm2, %v2631_v8 }
 0x59d   : > { %v3291_v31 = vpop.f32.mrf.mxu2 }
 0x59e   : > { %3347 = vrot.lane.b32.xlu1 %v3291_v31, %s5442_s28  ;;  %3411 = vrot.lane.b32.xlu2 %v3291_v31, %s5443_s30 }
 0x5a2   : > { %v2633_v26 = vpop.permute.xlu1 %2632 }
 0x5a3   : > { %2670 = vst.msk [vmem:[#allocation6 + $0x50] sm:$0xff] %vm613_vm2, %v2633_v26 }
 0x5a5   : > { %v3293_v47 = vpop.f32.mrf.mxu2 }
 0x5a6   : > { %3349 = vrot.lane.b32.xlu2 %v3293_v47, %s5442_s28  ;;  %3413 = vrot.lane.b32.xlu0 %v3293_v47, %s5443_s30  ;;  %v3475_v23 = vpack.c.bf16 %v3293_v47, %v3291_v31 }
 0x5a8   : > { %4845 = vmatmul.msk.bf16.vlgmr.msrb.gmra.mxu1 %vm1440_vm14, %v3475_v23 }
 0x5aa   : > { %v2641_v50 = vpop.permute.xlu2 %2640 }
 0x5ab   : > { %2674 = vst.msk [vmem:[#allocation6 + $0x70] sm:$0xff] %vm613_vm2, %v2641_v50 }
 0x5ad   : > { %v3296_v32 = vpop.f32.mrf.mxu2 }
 0x5ae   : > { %3415 = vrot.lane.b32.xlu1 %v3296_v32, %s5443_s30  ;;  %3351 = vrot.lane.b32.xlu0 %v3296_v32, %s5442_s28 }
 0x5b2   : > { %v2637_v2 = vpop.permute.xlu0 %2636 }
 0x5b3   : > { %2672 = vst.msk [vmem:[#allocation6 + $0x60] sm:$0xff] %vm613_vm2, %v2637_v2 }
 0x5b5   : > { %v3298_v60 = vpop.f32.mrf.mxu2 }
 0x5b6   : > { %3353 = vrot.lane.b32.xlu1 %v3298_v60, %s5442_s28  ;;  %3417 = vrot.lane.b32.xlu2 %v3298_v60, %s5443_s30  ;;  %v3476_v57 = vpack.c.bf16 %v3298_v60, %v3296_v32 }
 0x5b8   : > { %4846 = vmatmul.msk.bf16.gmra.mxu1 %vm1440_vm14, %v3476_v57 }
 0x5ba   : > { %v2639_v49 = vpop.permute.xlu1 %2638 }
 0x5bb   : > { %2673 = vst.msk [vmem:[#allocation6 + $0x68] sm:$0xff] %vm613_vm2, %v2639_v49 }
 0x5bd   : > { %v3301_v18 = vpop.f32.mrf.mxu2 }
 0x5be   : > { %3355 = vrot.lane.b32.xlu2 %v3301_v18, %s5442_s28  ;;  %3419 = vrot.lane.b32.xlu0 %v3301_v18, %s5443_s30 }
 0x5c5   : > { %v3303_v38 = vpop.f32.mrf.mxu2 }
 0x5c6   : > { %3421 = vrot.lane.b32.xlu1 %v3303_v38, %s5443_s30  ;;  %3357 = vrot.lane.b32.xlu0 %v3303_v38, %s5442_s28  ;;  %v3477_v3 = vpack.c.bf16 %v3303_v38, %v3301_v18 }
 0x5c8   : > { %4847 = vmatmul.msk.bf16.gmra.mxu1 %vm1440_vm14, %v3477_v3 }
 0x5ca   : > { %v2643_v15 = vpop.permute.xlu0 %2642 }
 0x5cb   : > { %2675 = vst.msk [vmem:[#allocation6 + $0x78] sm:$0xff] %vm613_vm2, %v2643_v15 }
 0x5cd   : > { %v3306_v12 = vpop.f32.mrf.mxu2 }
 0x5ce   : > { %3359 = vrot.lane.b32.xlu1 %v3306_v12, %s5442_s28  ;;  %3423 = vrot.lane.b32.xlu2 %v3306_v12, %s5443_s30 }
 0x5d5   : > { %v3308_v16 = vpop.f32.mrf.mxu2 }
 0x5d6   : > { %3361 = vrot.lane.b32.xlu2 %v3308_v16, %s5442_s28  ;;  %3425 = vrot.lane.b32.xlu0 %v3308_v16, %s5443_s30  ;;  %v3478_v5 = vpack.c.bf16 %v3308_v16, %v3306_v12 }
 0x5d8   : > { %4848 = vmatmul.msk.bf16.gmra.mxu1 %vm1440_vm14, %v3478_v5 }
 0x5dd   : > { %v3311_v51 = vpop.f32.mrf.mxu2 }
 0x5de   : > { %3427 = vrot.lane.b32.xlu1 %v3311_v51, %s5443_s30  ;;  %3363 = vrot.lane.b32.xlu0 %v3311_v51, %s5442_s28 }
 0x5e5   : > { %v3313_v14 = vpop.f32.mrf.mxu2 }
 0x5e6   : > { %3365 = vrot.lane.b32.xlu1 %v3313_v14, %s5442_s28  ;;  %3429 = vrot.lane.b32.xlu2 %v3313_v14, %s5443_s30  ;;  %v3479_v20 = vpack.c.bf16 %v3313_v14, %v3311_v51 }
 0x5e8   : > { %4849 = vmatmul.msk.bf16.gmra.mxu1 %vm1440_vm14, %v3479_v20 }
 0x5ee   : > { %v3316_v35 = vpop.f32.mrf.mxu2 }
 0x5ef   : > { %3367 = vrot.lane.b32.xlu2 %v3316_v35, %s5442_s28  ;;  %3431 = vrot.lane.b32.xlu0 %v3316_v35, %s5443_s30 }
 0x5f6   : > { %v3318_v25 = vpop.f32.mrf.mxu2 }
 0x5f7   : > { %3433 = vrot.lane.b32.xlu1 %v3318_v25, %s5443_s30  ;;  %3369 = vrot.lane.b32.xlu0 %v3318_v25, %s5442_s28  ;;  %v3480_v63 = vpack.c.bf16 %v3318_v25, %v3316_v35 }
 0x5f8   : > { %v3412_v33 = vpop.permute.xlu2 %3411 }
 0x5f9   : > { %3459 = vst.msk [vmem:[#allocation9] sm:$0xff] %vm475_vm1, %v3412_v33  ;;  %4850 = vmatmul.msk.bf16.gmra.mxu1 %vm1440_vm14, %v3480_v63 }
 0x5fe   : > { %v3321_v24 = vpop.f32.mrf.mxu2 }
 0x5ff   : > { %3371 = vrot.lane.b32.xlu1 %v3321_v24, %s5442_s28  ;;  %3435 = vrot.lane.b32.xlu2 %v3321_v24, %s5443_s30 }
 0x600   : > { %v3350_v27 = vpop.permute.xlu2 %3349 }
 0x601   : > { %3396 = vst.msk [vmem:[#allocation8 + $0x8] sm:$0xff] %vm475_vm1, %v3350_v27 }
 0x606   : > { %v3323_v17 = vpop.f32.mrf.mxu2 }
 0x607   : > { %3373 = vrot.lane.b32.xlu2 %v3323_v17, %s5442_s28  ;;  %v3481_v58 = vpack.c.bf16 %v3323_v17, %v3321_v24 }
 0x609   : > { %4851 = vmatmul.msk.bf16.gmra.mxu1 %vm1440_vm14, %v3481_v58 }
 0x60e   : > { %v3326_v19 = vpop.f32.mrf.mxu2 }
 0x60f   : > { %3375 = vrot.lane.b32.xlu0 %v3326_v19, %s5442_s28 }
 0x610   : > { %v3348_v21 = vpop.permute.xlu1 %3347  ;;  %v3418_v34 = vpop.permute.xlu2 %3417 }
 0x611   : > { %3395 = vst.msk [vmem:[#allocation8] sm:$0xff] %vm475_vm1, %v3348_v21 }
 0x612   : > { %3462 = vst.msk [vmem:[#allocation9 + $0x18] sm:$0xff] %vm475_vm1, %v3418_v34 }
 0x616   : > { %v3328_v11 = vpop.f32.mrf.mxu2 }
 0x617   : > { %3437 = vrot.lane.b32.xlu0 %v3323_v17, %s5443_s30  ;;  %3441 = vrot.lane.b32.xlu2 %v3328_v11, %s5443_s30  ;;  %v3482_v22 = vpack.c.bf16 %v3328_v11, %v3326_v19 }
 0x618   : > { %v3414_v54 = vpop.permute.xlu0 %3413  ;;  %3377 = vrot.lane.b32.xlu1 %v3328_v11, %s5442_s28  ;;  %v3356_v39 = vpop.permute.xlu2 %3355 }
 0x619   : > { %3460 = vst.msk [vmem:[#allocation9 + $0x8] sm:$0xff] %vm475_vm1, %v3414_v54  ;;  %4852 = vmatmul.msk.bf16.gmra.mxu1 %vm1440_vm14, %v3482_v22 }
 0x61a   : > { %3399 = vst.msk [vmem:[#allocation8 + $0x20] sm:$0xff] %vm475_vm1, %v3356_v39 }
 0x620   : > { %v3416_v56 = vpop.permute.xlu1 %3415  ;;  %v3352_v41 = vpop.permute.xlu0 %3351  ;;  %3439 = vrot.lane.b32.xlu1 %v3326_v19, %s5443_s30 }
 0x621   : > { %3461 = vst.msk [vmem:[#allocation9 + $0x10] sm:$0xff] %vm475_vm1, %v3416_v56 }
 0x622   : > { %3397 = vst.msk [vmem:[#allocation8 + $0x10] sm:$0xff] %vm475_vm1, %v3352_v41 }
 0x625   : > { %v3526_v30 = vpop.f32.mrf.mxu1 }
 0x626   : > { %v3527_v40 = vadd.f32 %v6810_v6, %v3526_v30 }
 0x628   : > { %v3614_v42 = vand.u32 2147483647, %v3527_v40  ;;  %v3354_v53 = vpop.permute.xlu1 %3353  ;;  %v3424_v37 = vpop.permute.xlu2 %3423  ;;  %v3566_v18 = vmax.f32 %v3527_v40, 0.0  ;;  %vm3582_vm14 = vcmp.ne.f32.partialorder %v3527_v40, %v3527_v40 }
 0x629   : > { %3398 = vst.msk [vmem:[#allocation8 + $0x18] sm:$0xff] %vm475_vm1, %v3354_v53 }
 0x62a   : > { %v3630_v13 = vsub.f32 0.0, %v3614_v42  ;;  %3465 = vst.msk [vmem:[#allocation9 + $0x30] sm:$0xff] %vm475_vm1, %v3424_v37 }
 0x62c   : > { %v3646_v45 = vmul.f32 1.442695, %v3630_v13 }
 0x62d   : > { %v3528_v44 = vpop.f32.mrf.mxu1 }
 0x62e   : > { %5233 = vpow2.f32 %v3646_v45  ;;  %v6816_v62 = vadd.f32 %v6810_v6, %v3528_v44 }
 0x630   : > { %v3615_v36 = vand.u32 2147483647, %v6816_v62  ;;  %v3362_v48 = vpop.permute.xlu2 %3361  ;;  %v3420_v43 = vpop.permute.xlu0 %3419  ;;  %v3567_v19 = vmax.f32 %v6816_v62, 0.0  ;;  %vm3583_vm11 = vcmp.ne.f32.partialorder %v6816_v62, %v6816_v62 }
 0x631   : > { %3402 = vst.msk [vmem:[#allocation8 + $0x38] sm:$0xff] %vm475_vm1, %v3362_v48 }
 0x632   : > { %v3631_v9 = vsub.f32 0.0, %v3615_v36  ;;  %3463 = vst.msk [vmem:[#allocation9 + $0x20] sm:$0xff] %vm475_vm1, %v3420_v43 }
 0x634   : > { %v5234_v0 = vpop.eup %5233  ;;  %v3648_v7 = vmul.f32 1.442695, %v3631_v9 }
 0x635   : > { %v3678_v28 = vadd.f32 1.0, %v5234_v0  ;;  %v3681_v29 = vmul.f32 -0.5, %v5234_v0  ;;  %v3531_v1 = vpop.f32.mrf.mxu1  ;;  %v3684_v31 = vand.u32 2147483647, %v5234_v0 }
 0x636   : > { %5235 = vpow2.f32 %v3648_v7  ;;  %v6822_v61 = vadd.f32 %v6810_v6, %v3531_v1 }
 0x637   : > { %5237 = vlog2.f32 %v3678_v28  ;;  %v3682_v4 = vadd.f32 1.0, %v3681_v29  ;;  %vm3685_vm9 = vcmp.lt.f32.partialorder %v3684_v31, 0.0004427343 }
 0x638   : > { %v3616_v59 = vand.u32 2147483647, %v6822_v61  ;;  %v3422_v10 = vpop.permute.xlu1 %3421  ;;  %v3358_v55 = vpop.permute.xlu0 %3357  ;;  %v3568_v43 = vmax.f32 %v6822_v61, 0.0  ;;  %vm3584_vm15 = vcmp.ne.f32.partialorder %v6822_v61, %v6822_v61 }
 0x639   : > { %3464 = vst.msk [vmem:[#allocation9 + $0x28] sm:$0xff] %vm475_vm1, %v3422_v10  ;;  %v3683_v50 = vmul.f32 %v5234_v0, %v3682_v4 }
 0x63a   : > { %v3632_v8 = vsub.f32 0.0, %v3616_v59  ;;  %3400 = vst.msk [vmem:[#allocation8 + $0x28] sm:$0xff] %vm475_vm1, %v3358_v55 }
 0x63c   : > { %v5236_v26 = vpop.eup %5235  ;;  %v3650_v47 = vmul.f32 1.442695, %v3632_v8 }
 0x63d   : > { %v5238_v23 = vpop.eup %5237  ;;  %v3687_v32 = vadd.f32 1.0, %v5236_v26  ;;  %v3533_v2 = vpop.f32.mrf.mxu1  ;;  %v3690_v57 = vmul.f32 -0.5, %v5236_v26  ;;  %v3693_v20 = vand.u32 2147483647, %v5236_v26 }
 0x63e   : > { %v3680_v60 = vmul.f32 0.6931472, %v5238_v23  ;;  %5239 = vpow2.f32 %v3650_v47  ;;  %v6828_v49 = vadd.f32 %v6810_v6, %v3533_v2 }
 0x63f   : > { %5241 = vlog2.f32 %v3687_v32  ;;  %v3691_v5 = vadd.f32 1.0, %v3690_v57  ;;  %vm3694_vm10 = vcmp.lt.f32.partialorder %v3693_v20, 0.0004427343 }
 0x640   : > { %v3686_v38 = vsel %vm3685_vm9, %v3683_v50, %v3680_v60  ;;  %v3617_v3 = vand.u32 2147483647, %v6828_v49  ;;  %v3360_v12 = vpop.permute.xlu1 %3359  ;;  %v3430_v16 = vpop.permute.xlu2 %3429  ;;  %v3569_v50 = vmax.f32 %v6828_v49, 0.0  ;;  %vm3585_vm0 = vcmp.ne.f32.partialorder %v6828_v49, %v6828_v49 }
 0x641   : > { %v3822_v15 = vadd.f32 %v3686_v38, %v3566_v18  ;;  %3401 = vst.msk [vmem:[#allocation8 + $0x30] sm:$0xff] %vm475_vm1, %v3360_v12  ;;  %v3692_v27 = vmul.f32 %v5236_v26, %v3691_v5 }
 0x642   : > { %v3633_v51 = vsub.f32 0.0, %v3617_v3  ;;  %3468 = vst.msk [vmem:[#allocation9 + $0x48] sm:$0xff] %vm475_vm1, %v3430_v16 }
 0x643   : > { %v3838_v14 = vsel %vm3582_vm14, %v3527_v40, %v3822_v15 }
 0x644   : > { %v5240_v35 = vpop.eup %5239  ;;  %3854 = vst.msk [vmem:[#allocation5] sm:$0xff] %vm613_vm2, %v3838_v14  ;;  %v3652_v25 = vmul.f32 1.442695, %v3633_v51 }
 0x645   : > { %v5242_v63 = vpop.eup %5241  ;;  %v3696_v33 = vadd.f32 1.0, %v5240_v35  ;;  %v3699_v17 = vmul.f32 -0.5, %v5240_v35  ;;  %v3536_v58 = vpop.f32.mrf.mxu1  ;;  %v3702_v30 = vand.u32 2147483647, %v5240_v35 }
 0x646   : > { %v3689_v24 = vmul.f32 0.6931472, %v5242_v63  ;;  %5243 = vpow2.f32 %v3652_v25  ;;  %v6836_v21 = vadd.f32 %v6810_v6, %v3536_v58 }
 0x647   : > { %5245 = vlog2.f32 %v3696_v33  ;;  %v3700_v22 = vadd.f32 1.0, %v3699_v17  ;;  %vm3703_vm3 = vcmp.lt.f32.partialorder %v3702_v30, 0.0004427343 }
 0x648   : > { %v3695_v34 = vsel %vm3694_vm10, %v3692_v27, %v3689_v24  ;;  %v3426_v54 = vpop.permute.xlu0 %3425  ;;  %v3618_v39 = vand.u32 2147483647, %v6836_v21  ;;  %vm3586_vm4 = vcmp.ne.f32.partialorder %v6836_v21, %v6836_v21 }
 0x649   : > { %v3823_v11 = vadd.f32 %v3695_v34, %v3567_v19  ;;  %v3368_v56 = vpop.permute.xlu2 %3367  ;;  %3466 = vst.msk [vmem:[#allocation9 + $0x38] sm:$0xff] %vm475_vm1, %v3426_v54  ;;  %v3701_v45 = vmul.f32 %v5240_v35, %v3700_v22 }
 0x64a   : > { %3405 = vst.msk [vmem:[#allocation8 + $0x50] sm:$0xff] %vm475_vm1, %v3368_v56  ;;  %v3634_v42 = vsub.f32 0.0, %v3618_v39 }
 0x64b   : > { %v3839_v41 = vsel %vm3583_vm11, %v6816_v62, %v3823_v11 }
 0x64c   : > { %v5244_v40 = vpop.eup %5243  ;;  %3855 = vst.msk [vmem:[#allocation5 + $0x8] sm:$0xff] %vm613_vm2, %v3839_v41  ;;  %v3654_v36 = vmul.f32 1.442695, %v3634_v42 }
 0x64d   : > { %v5246_v53 = vpop.eup %5245  ;;  %v3705_v37 = vadd.f32 1.0, %v5244_v40  ;;  %v3708_v44 = vmul.f32 -0.5, %v5244_v40  ;;  %v3538_v48 = vpop.f32.mrf.mxu1  ;;  %v3711_v4 = vand.u32 2147483647, %v5244_v40 }
 0x64e   : > { %v3698_v13 = vmul.f32 0.6931472, %v5246_v53  ;;  %v6847_v62 = vadd.f32 %v6810_v6, %v3538_v48 }
 0x64f   : > { %5247 = vlog2.f32 %v3705_v37  ;;  %v3709_v29 = vadd.f32 1.0, %v3708_v44  ;;  %vm3712_vm13 = vcmp.lt.f32.partialorder %v3711_v4, 0.0004427343 }
 0x650   : > { %v3704_v9 = vsel %vm3703_vm3, %v3701_v45, %v3698_v13  ;;  %5249 = vpow2.f32 %v3654_v36  ;;  %v3428_v7 = vpop.permute.xlu1 %3427  ;;  %v3364_v28 = vpop.permute.xlu0 %3363  ;;  %v3619_v1 = vand.u32 2147483647, %v6847_v62  ;;  %v3571_v36 = vmax.f32 %v6847_v62, 0.0 }
 0x651   : > { %v3824_v0 = vadd.f32 %v3704_v9, %v3568_v43  ;;  %3467 = vst.msk [vmem:[#allocation9 + $0x40] sm:$0xff] %vm475_vm1, %v3428_v7  ;;  %v3710_v26 = vmul.f32 %v5244_v40, %v3709_v29  ;;  %vm3587_vm14 = vcmp.ne.f32.partialorder %v6847_v62, %v6847_v62 }
 0x652   : > { %3403 = vst.msk [vmem:[#allocation8 + $0x40] sm:$0xff] %vm475_vm1, %v3364_v28  ;;  %v3635_v10 = vsub.f32 0.0, %v3619_v1 }
 0x653   : > { %v3840_v59 = vsel %vm3584_vm15, %v6822_v61, %v3824_v0 }
 0x654   : > { %3856 = vst.msk [vmem:[#allocation5 + $0x10] sm:$0xff] %vm613_vm2, %v3840_v59  ;;  %v3656_v47 = vmul.f32 1.442695, %v3635_v10 }
 0x655   : > { %v5248_v55 = vpop.eup %5247  ;;  %v3541_v23 = vpop.f32.mrf.mxu1 }
 0x656   : > { %v5250_v8 = vpop.eup %5249  ;;  %v3707_v31 = vmul.f32 0.6931472, %v5248_v55  ;;  %v6858_v2 = vadd.f32 %v6810_v6, %v3541_v23  ;;  %5251 = vpow2.f32 %v3656_v47 }
 0x657   : > { %v3714_v32 = vadd.f32 1.0, %v5250_v8  ;;  %v3717_v60 = vmul.f32 -0.5, %v5250_v8  ;;  %v3720_v5 = vand.u32 2147483647, %v5250_v8 }
 0x658   : > { %v3713_v61 = vsel %vm3712_vm13, %v3710_v26, %v3707_v31  ;;  %v3366_v18 = vpop.permute.xlu1 %3365  ;;  %v3620_v38 = vand.u32 2147483647, %v6858_v2  ;;  %vm3588_vm11 = vcmp.ne.f32.partialorder %v6858_v2, %v6858_v2 }
 0x659   : > { %v3825_v57 = vadd.f32 %v3713_v61, %v3569_v50  ;;  %5253 = vlog2.f32 %v3714_v32  ;;  %3404 = vst.msk [vmem:[#allocation8 + $0x48] sm:$0xff] %vm475_vm1, %v3366_v18  ;;  %v3436_v3 = vpop.permute.xlu2 %3435  ;;  %v3718_v12 = vadd.f32 1.0, %v3717_v60  ;;  %vm3721_vm12 = vcmp.lt.f32.partialorder %v3720_v5, 0.0004427343 }
 0x65a   : > { %3471 = vst.msk [vmem:[#allocation9 + $0x60] sm:$0xff] %vm475_vm1, %v3436_v3  ;;  %v3636_v16 = vsub.f32 0.0, %v3620_v38  ;;  %v3572_v50 = vmax.f32 %v6858_v2, 0.0 }
 0x65b   : > { %v3841_v15 = vsel %vm3585_vm0, %v6828_v49, %v3825_v57  ;;  %v3719_v24 = vmul.f32 %v5250_v8, %v3718_v12  ;;  %v3570_v49 = vmax.f32 %v6836_v21, 0.0 }
 0x65c   : > { %3857 = vst.msk [vmem:[#allocation5 + $0x18] sm:$0xff] %vm613_vm2, %v3841_v15  ;;  %v5252_v51 = vpop.eup %5251  ;;  %v3658_v14 = vmul.f32 1.442695, %v3636_v16 }
 0x65d   : > { %v3543_v20 = vpop.f32.mrf.mxu1  ;;  %v3723_v25 = vadd.f32 1.0, %v5252_v51  ;;  %v3726_v27 = vmul.f32 -0.5, %v5252_v51  ;;  %v3729_v56 = vand.u32 2147483647, %v5252_v51 }
 0x65e   : > { %v6868_v63 = vadd.f32 %v6810_v6, %v3543_v20  ;;  %5255 = vpow2.f32 %v3658_v14 }
 0x65f   : > { %v5254_v35 = vpop.eup %5253  ;;  %5257 = vlog2.f32 %v3723_v25  ;;  %v3727_v54 = vadd.f32 1.0, %v3726_v27  ;;  %vm3730_vm9 = vcmp.lt.f32.partialorder %v3729_v56, 0.0004427343 }
 0x660   : > { %v3716_v33 = vmul.f32 0.6931472, %v5254_v35  ;;  %v3621_v58 = vand.u32 2147483647, %v6868_v63  ;;  %vm3589_vm15 = vcmp.ne.f32.partialorder %v6868_v63, %v6868_v63 }
 0x661   : > { %v3374_v19 = vpop.permute.xlu2 %3373  ;;  %v3432_v34 = vpop.permute.xlu0 %3431  ;;  %v3728_v45 = vmul.f32 %v5252_v51, %v3727_v54 }
 0x662   : > { %v3722_v17 = vsel %vm3721_vm12, %v3719_v24, %v3716_v33  ;;  %3408 = vst.msk [vmem:[#allocation8 + $0x68] sm:$0xff] %vm475_vm1, %v3374_v19  ;;  %v3637_v22 = vsub.f32 0.0, %v3621_v58  ;;  %v3573_v24 = vmax.f32 %v6868_v63, 0.0 }
 0x663   : > { %v3826_v11 = vadd.f32 %v3722_v17, %v3570_v49  ;;  %3469 = vst.msk [vmem:[#allocation9 + $0x50] sm:$0xff] %vm475_vm1, %v3432_v34 }
 0x664   : > { %v5256_v41 = vpop.eup %5255  ;;  %v3660_v30 = vmul.f32 1.442695, %v3637_v22 }
 0x665   : > { %v3842_v39 = vsel %vm3586_vm4, %v6836_v21, %v3826_v11  ;;  %v3546_v40 = vpop.f32.mrf.mxu1  ;;  %v5258_v42 = vpop.eup %5257  ;;  %v3732_v53 = vadd.f32 1.0, %v5256_v41  ;;  %v3735_v44 = vmul.f32 -0.5, %v5256_v41  ;;  %v3738_v1 = vand.u32 2147483647, %v5256_v41 }
 0x666   : > { %3858 = vst.msk [vmem:[#allocation5 + $0x20] sm:$0xff] %vm613_vm2, %v3842_v39  ;;  %v6879_v37 = vadd.f32 %v6810_v6, %v3546_v40  ;;  %v3725_v13 = vmul.f32 0.6931472, %v5258_v42  ;;  %5259 = vpow2.f32 %v3660_v30 }
 0x667   : > { %5261 = vlog2.f32 %v3732_v53  ;;  %v3736_v7 = vadd.f32 1.0, %v3735_v44  ;;  %vm3739_vm10 = vcmp.lt.f32.partialorder %v3738_v1, 0.0004427343 }
 0x668   : > { %v3731_v21 = vsel %vm3730_vm9, %v3728_v45, %v3725_v13  ;;  %v3622_v48 = vand.u32 2147483647, %v6879_v37  ;;  %v3574_v53 = vmax.f32 %v6879_v37, 0.0  ;;  %vm3590_vm0 = vcmp.ne.f32.partialorder %v6879_v37, %v6879_v37 }
 0x669   : > { %v3434_v43 = vpop.permute.xlu1 %3433  ;;  %v3370_v9 = vpop.permute.xlu0 %3369  ;;  %v3827_v0 = vadd.f32 %v3731_v21, %v3571_v36  ;;  %v3737_v47 = vmul.f32 %v5256_v41, %v3736_v7 }
 0x66a   : > { %3470 = vst.msk [vmem:[#allocation9 + $0x58] sm:$0xff] %vm475_vm1, %v3434_v43  ;;  %v3638_v28 = vsub.f32 0.0, %v3622_v48 }
 0x66b   : > { %3406 = vst.msk [vmem:[#allocation8 + $0x58] sm:$0xff] %vm475_vm1, %v3370_v9  ;;  %v3843_v29 = vsel %vm3587_vm14, %v6847_v62, %v3827_v0 }
 0x66c   : > { %v5260_v59 = vpop.eup %5259  ;;  %3859 = vst.msk [vmem:[#allocation5 + $0x28] sm:$0xff] %vm613_vm2, %v3843_v29  ;;  %v3662_v4 = vmul.f32 1.442695, %v3638_v28 }
 0x66d   : > { %v3548_v10 = vpop.f32.mrf.mxu1  ;;  %v5262_v55 = vpop.eup %5261  ;;  %v3741_v8 = vadd.f32 1.0, %v5260_v59  ;;  %v3744_v23 = vmul.f32 -0.5, %v5260_v59  ;;  %v3747_v15 = vand.u32 2147483647, %v5260_v59 }
 0x66e   : > { %v6890_v31 = vadd.f32 %v6810_v6, %v3548_v10  ;;  %v3734_v26 = vmul.f32 0.6931472, %v5262_v55  ;;  %5263 = vpow2.f32 %v3662_v4 }
 0x66f   : > { %5265 = vlog2.f32 %v3741_v8  ;;  %v3745_v18 = vadd.f32 1.0, %v3744_v23  ;;  %vm3748_vm3 = vcmp.lt.f32.partialorder %v3747_v15, 0.0004427343 }
 0x670   : > { %v3740_v62 = vsel %vm3739_vm10, %v3737_v47, %v3734_v26  ;;  %v3623_v32 = vand.u32 2147483647, %v6890_v31  ;;  %v3575_v55 = vmax.f32 %v6890_v31, 0.0  ;;  %vm3591_vm4 = vcmp.ne.f32.partialorder %v6890_v31, %v6890_v31 }
 0x671   : > { %v3372_v61 = vpop.permute.xlu1 %3371  ;;  %v3442_v60 = vpop.permute.xlu2 %3441  ;;  %v3828_v57 = vadd.f32 %v3740_v62, %v3572_v50  ;;  %v3746_v25 = vmul.f32 %v5260_v59, %v3745_v18 }
 0x672   : > { %3407 = vst.msk [vmem:[#allocation8 + $0x60] sm:$0xff] %vm475_vm1, %v3372_v61  ;;  %v3639_v38 = vsub.f32 0.0, %v3623_v32 }
 0x673   : > { %3474 = vst.msk [vmem:[#allocation9 + $0x78] sm:$0xff] %vm475_vm1, %v3442_v60  ;;  %v3844_v3 = vsel %vm3588_vm11, %v6858_v2, %v3828_v57 }
 0x674   : > { %v5264_v12 = vpop.eup %5263  ;;  %3860 = vst.msk [vmem:[#allocation5 + $0x30] sm:$0xff] %vm613_vm2, %v3844_v3  ;;  %v3664_v16 = vmul.f32 1.442695, %v3639_v38 }
 0x675   : > { %v5266_v5 = vpop.eup %5265  ;;  %v3750_v51 = vadd.f32 1.0, %v5264_v12  ;;  %v3753_v14 = vmul.f32 -0.5, %v5264_v12  ;;  %v3756_v34 = vand.u32 2147483647, %v5264_v12 }
 0x676   : > { %v3551_v20 = vpop.f32.mrf.mxu1  ;;  %v3743_v35 = vmul.f32 0.6931472, %v5266_v5  ;;  %5267 = vpow2.f32 %v3664_v16 }
 0x677   : > { %v6901_v33 = vadd.f32 %v6810_v6, %v3551_v20  ;;  %5269 = vlog2.f32 %v3750_v51  ;;  %v3754_v17 = vadd.f32 1.0, %v3753_v14  ;;  %vm3757_vm13 = vcmp.lt.f32.partialorder %v3756_v34, 0.0004427343 }
 0x678   : > { %v3749_v2 = vsel %vm3748_vm3, %v3746_v25, %v3743_v35 }
 0x679   : > { %v3624_v27 = vand.u32 2147483647, %v6901_v33  ;;  %v3829_v49 = vadd.f32 %v3749_v2, %v3573_v24  ;;  %v3755_v39 = vmul.f32 %v5264_v12, %v3754_v17  ;;  %v3576_v51 = vmax.f32 %v6901_v33, 0.0 }
 0x67a   : > { %vm3592_vm14 = vcmp.ne.f32.partialorder %v6901_v33, %v6901_v33 }
 0x67b   : > { %v3640_v58 = vsub.f32 0.0, %v3624_v27  ;;  %v3845_v19 = vsel %vm3589_vm15, %v6868_v63, %v3829_v49 }
 0x67c   : > { %v5268_v11 = vpop.eup %5267  ;;  %3861 = vst.msk [vmem:[#allocation5 + $0x38] sm:$0xff] %vm613_vm2, %v3845_v19 }
 0x67d   : > { %v3666_v54 = vmul.f32 1.442695, %v3640_v58  ;;  %v5270_v22 = vpop.eup %5269  ;;  %v3759_v56 = vadd.f32 1.0, %v5268_v11  ;;  %v3762_v40 = vmul.f32 -0.5, %v5268_v11  ;;  %v3765_v43 = vand.u32 2147483647, %v5268_v11 }
 0x67e   : > { %v3553_v41 = vpop.f32.mrf.mxu1  ;;  %v3752_v30 = vmul.f32 0.6931472, %v5270_v22 }
 0x67f   : > { %5271 = vpow2.f32 %v3666_v54  ;;  %v6910_v42 = vadd.f32 %v6810_v6, %v3553_v41  ;;  %v3763_v36 = vadd.f32 1.0, %v3762_v40  ;;  %vm3766_vm12 = vcmp.lt.f32.partialorder %v3765_v43, 0.0004427343 }
 0x680   : > { %5273 = vlog2.f32 %v3759_v56  ;;  %v3758_v63 = vsel %vm3757_vm13, %v3755_v39, %v3752_v30 }
 0x681   : > { %v3625_v13 = vand.u32 2147483647, %v6910_v42  ;;  %v3376_v45 = vpop.permute.xlu0 %3375  ;;  %v3830_v44 = vadd.f32 %v3758_v63, %v3574_v53  ;;  %v3764_v4 = vmul.f32 %v5268_v11, %v3763_v36  ;;  %v3577_v56 = vmax.f32 %v6910_v42, 0.0  ;;  %v6952_v36 = vld [vmem:[%s7270_s7 + $0x10] sm:$0xff] }
 0x682   : > { %3409 = vst.msk [vmem:[#allocation8 + $0x70] sm:$0xff] %vm475_vm1, %v3376_v45  ;;  %vm3593_vm11 = vcmp.ne.f32.partialorder %v6910_v42, %v6910_v42 }
 0x683   : > { %v3641_v21 = vsub.f32 0.0, %v3625_v13  ;;  %v3846_v48 = vsel %vm3590_vm0, %v6879_v37, %v3830_v44 }
 0x684   : > { %3862 = vst.msk [vmem:[#allocation5 + $0x40] sm:$0xff] %vm613_vm2, %v3846_v48  ;;  %v6959_v48 = vld [vmem:[#allocation2 + $0x10] sm:$0xff]  }
 0x685   : > { %v5272_v9 = vpop.eup %5271  ;;  %v3668_v0 = vmul.f32 1.442695, %v3641_v21  ;;  %v6957_v21 = vld [vmem:[%s7270_s7 + $0x18] sm:$0xff] }
 0x686   : > { %v5274_v7 = vpop.eup %5273  ;;  %v3768_v28 = vadd.f32 1.0, %v5272_v9  ;;  %v3771_v29 = vmul.f32 -0.5, %v5272_v9  ;;  %v3556_v1 = vpop.f32.mrf.mxu1  ;;  %v3774_v61 = vand.u32 2147483647, %v5272_v9 }
 0x687   : > { %v3761_v59 = vmul.f32 0.6931472, %v5274_v7  ;;  %5275 = vpow2.f32 %v3668_v0  ;;  %v6920_v10 = vadd.f32 %v6810_v6, %v3556_v1  ;;  %v6964_v7 = vld [vmem:[%s7271_s8 + $0x1] sm:$0x1] }
 0x688   : > { %5277 = vlog2.f32 %v3768_v28  ;;  %v3772_v23 = vadd.f32 1.0, %v3771_v29  ;;  %vm3775_vm9 = vcmp.lt.f32.partialorder %v3774_v61, 0.0004427343 }
 0x689   : > { %v3767_v37 = vsel %vm3766_vm12, %v3764_v4, %v3761_v59  ;;  %v3626_v8 = vand.u32 2147483647, %v6920_v10  ;;  %v3438_v26 = vpop.permute.xlu0 %3437  ;;  %v3876_v59 = vld [vmem:[#allocation2 + $0x18] sm:$0xff]   ;;  %v3578_v4 = vmax.f32 %v6920_v10, 0.0  ;;  %vm3594_vm15 = vcmp.ne.f32.partialorder %v6920_v10, %v6920_v10 }
 0x68a   : > { %v3831_v47 = vadd.f32 %v3767_v37, %v3575_v55  ;;  %3472 = vst.msk [vmem:[#allocation9 + $0x68] sm:$0xff] %vm475_vm1, %v3438_v26  ;;  %v3378_v50 = vpop.permute.xlu1 %3377  ;;  %v3773_v38 = vmul.f32 %v5272_v9, %v3772_v23 }
 0x68b   : > { %v3642_v62 = vsub.f32 0.0, %v3626_v8  ;;  %3410 = vst.msk [vmem:[#allocation8 + $0x78] sm:$0xff] %vm475_vm1, %v3378_v50 }
 0x68c   : > { %v3847_v32 = vsel %vm3591_vm4, %v6890_v31, %v3831_v47 }
 0x68d   : > { %v5276_v60 = vpop.eup %5275  ;;  %3863 = vst.msk [vmem:[#allocation5 + $0x48] sm:$0xff] %vm613_vm2, %v3847_v32  ;;  %v3670_v57 = vmul.f32 1.442695, %v3642_v62 }
 0x68e   : > { %v5278_v18 = vpop.eup %5277  ;;  %v3777_v3 = vadd.f32 1.0, %v5276_v60  ;;  %v3558_v15 = vpop.f32.mrf.mxu1  ;;  %v3780_v16 = vmul.f32 -0.5, %v5276_v60  ;;  %v3783_v27 = vand.u32 2147483647, %v5276_v60 }
 0x68f   : > { %v3770_v12 = vmul.f32 0.6931472, %v5278_v18  ;;  %5279 = vpow2.f32 %v3670_v57  ;;  %v6931_v5 = vadd.f32 %v6810_v6, %v3558_v15 }
 0x690   : > { %5281 = vlog2.f32 %v3777_v3  ;;  %v3781_v25 = vadd.f32 1.0, %v3780_v16  ;;  %vm3784_vm10 = vcmp.lt.f32.partialorder %v3783_v27, 0.0004427343 }
 0x691   : > { %v3776_v31 = vsel %vm3775_vm9, %v3773_v38, %v3770_v12  ;;  %v3627_v14 = vand.u32 2147483647, %v6931_v5  ;;  %v3579_v38 = vmax.f32 %v6931_v5, 0.0  ;;  %vm3595_vm0 = vcmp.ne.f32.partialorder %v6931_v5, %v6931_v5 }
 0x692   : > { %v3832_v20 = vadd.f32 %v3776_v31, %v3576_v51  ;;  %v3440_v35 = vpop.permute.xlu1 %3439  ;;  %v3782_v22 = vmul.f32 %v5276_v60, %v3781_v25 }
 0x693   : > { %v3643_v24 = vsub.f32 0.0, %v3627_v14  ;;  %3473 = vst.msk [vmem:[#allocation9 + $0x70] sm:$0xff] %vm475_vm1, %v3440_v35 }
 0x694   : > { %v3848_v2 = vsel %vm3592_vm14, %v6901_v33, %v3832_v20 }
 0x695   : > { %v5280_v49 = vpop.eup %5279  ;;  %3864 = vst.msk [vmem:[#allocation5 + $0x50] sm:$0xff] %vm613_vm2, %v3848_v2  ;;  %v3672_v17 = vmul.f32 1.442695, %v3643_v24 }
 0x696   : > { %v5282_v58 = vpop.eup %5281  ;;  %v3786_v19 = vadd.f32 1.0, %v5280_v49  ;;  %v3789_v34 = vmul.f32 -0.5, %v5280_v49  ;;  %v3561_v11 = vpop.f32.mrf.mxu1  ;;  %v3792_v13 = vand.u32 2147483647, %v5280_v49 }
 0x697   : > { %v3779_v54 = vmul.f32 0.6931472, %v5282_v58  ;;  %5283 = vpow2.f32 %v3672_v17  ;;  %v6941_v39 = vadd.f32 %v6810_v6, %v3561_v11 }
 0x698   : > { %5285 = vlog2.f32 %v3786_v19  ;;  %v3790_v40 = vadd.f32 1.0, %v3789_v34  ;;  %vm3793_vm3 = vcmp.lt.f32.partialorder %v3792_v13, 0.0004427343 }
 0x699   : > { %v3785_v33 = vsel %vm3784_vm10, %v3782_v22, %v3779_v54  ;;  %v3628_v41 = vand.u32 2147483647, %v6941_v39  ;;  %v3580_v24 = vmax.f32 %v6941_v39, 0.0  ;;  %vm3596_vm4 = vcmp.ne.f32.partialorder %v6941_v39, %v6941_v39 }
 0x69a   : > { %v3833_v30 = vadd.f32 %v3785_v33, %v3577_v56  ;;  %v3791_v9 = vmul.f32 %v5280_v49, %v3790_v40 }
 0x69b   : > { %v3644_v53 = vsub.f32 0.0, %v3628_v41 }
 0x69c   : > { %v3849_v63 = vsel %vm3593_vm11, %v6910_v42, %v3833_v30 }
 0x69d   : > { %v5284_v45 = vpop.eup %5283  ;;  %3865 = vst.msk [vmem:[#allocation5 + $0x58] sm:$0xff] %vm613_vm2, %v3849_v63  ;;  %v3674_v44 = vmul.f32 1.442695, %v3644_v53 }
 0x69e   : > { %v5286_v43 = vpop.eup %5285  ;;  %v3795_v42 = vadd.f32 1.0, %v5284_v45  ;;  %v3563_v0 = vpop.f32.mrf.mxu1  ;;  %v3798_v29 = vmul.f32 -0.5, %v5284_v45  ;;  %v3801_v50 = vand.u32 2147483647, %v5284_v45 }
 0x69f   : > { %v3788_v28 = vmul.f32 0.6931472, %v5286_v43  ;;  %5287 = vpow2.f32 %v3674_v44  ;;  %v3564_v1 = vadd.f32 %v6810_v6, %v3563_v0 }
 0x6a0   : > { %5289 = vlog2.f32 %v3795_v42  ;;  %v3799_v26 = vadd.f32 1.0, %v3798_v29  ;;  %vm3802_vm13 = vcmp.lt.f32.partialorder %v3801_v50, 0.0004427343 }
 0x6a1   : > { %v3794_v55 = vsel %vm3793_vm3, %v3791_v9, %v3788_v28  ;;  %v3629_v37 = vand.u32 2147483647, %v3564_v1  ;;  %v3581_v11 = vmax.f32 %v3564_v1, 0.0  ;;  %vm3597_vm14 = vcmp.ne.f32.partialorder %v3564_v1, %v3564_v1 }
 0x6a2   : > { %v3834_v8 = vadd.f32 %v3794_v55, %v3578_v4  ;;  %v3800_v57 = vmul.f32 %v5284_v45, %v3799_v26 }
 0x6a3   : > { %v3645_v47 = vsub.f32 0.0, %v3629_v37 }
 0x6a4   : > { %v3850_v23 = vsel %vm3594_vm15, %v6920_v10, %v3834_v8 }
 0x6a5   : > { %v5288_v62 = vpop.eup %5287  ;;  %3866 = vst.msk [vmem:[#allocation5 + $0x60] sm:$0xff] %vm613_vm2, %v3850_v23  ;;  %v3676_v6 = vmul.f32 1.442695, %v3645_v47 }
 0x6a6   : > { %v5290_v32 = vpop.eup %5289  ;;  %v3804_v61 = vadd.f32 1.0, %v5288_v62  ;;  %v3807_v18 = vmul.f32 -0.5, %v5288_v62  ;;  %v3810_v16 = vand.u32 2147483647, %v5288_v62 }
 0x6a7   : > { %v3797_v60 = vmul.f32 0.6931472, %v5290_v32  ;;  %5291 = vpow2.f32 %v3676_v6 }
 0x6a8   : > { %5293 = vlog2.f32 %v3804_v61  ;;  %v3808_v10 = vadd.f32 1.0, %v3807_v18  ;;  %vm3811_vm12 = vcmp.lt.f32.partialorder %v3810_v16, 0.0004427343 }
 0x6a9   : > { %v3803_v3 = vsel %vm3802_vm13, %v3800_v57, %v3797_v60 }
 0x6aa   : > { %v3835_v15 = vadd.f32 %v3803_v3, %v3579_v38  ;;  %v3809_v35 = vmul.f32 %v5288_v62, %v3808_v10 }
 0x6ac   : > { %v3851_v12 = vsel %vm3595_vm0, %v6931_v5, %v3835_v15 }
 0x6ad   : > { %v5292_v51 = vpop.eup %5291  ;;  %3867 = vst.msk [vmem:[#allocation5 + $0x68] sm:$0xff] %vm613_vm2, %v3851_v12 }
 0x6ae   : > { %v5294_v31 = vpop.eup %5293  ;;  %v3813_v14 = vadd.f32 1.0, %v5292_v51  ;;  %v3816_v25 = vmul.f32 -0.5, %v5292_v51  ;;  %v3819_v17 = vand.u32 2147483647, %v5292_v51 }
 0x6af   : > { %v3806_v20 = vmul.f32 0.6931472, %v5294_v31 }
 0x6b0   : > { %5295 = vlog2.f32 %v3813_v14  ;;  %v3817_v49 = vadd.f32 1.0, %v3816_v25  ;;  %vm3820_vm9 = vcmp.lt.f32.partialorder %v3819_v17, 0.0004427343 }
 0x6b1   : > { %v3812_v2 = vsel %vm3811_vm12, %v3809_v35, %v3806_v20 }
 0x6b2   : > { %v3836_v27 = vadd.f32 %v3812_v2, %v3580_v24  ;;  %v3818_v34 = vmul.f32 %v5292_v51, %v3817_v49 }
 0x6b4   : > { %v3852_v5 = vsel %vm3596_vm4, %v6941_v39, %v3836_v27 }
 0x6b5   : > { %3868 = vst.msk [vmem:[#allocation5 + $0x70] sm:$0xff] %vm613_vm2, %v3852_v5 }
 0x6b6   : > { %v5296_v58 = vpop.eup %5295 }
 0x6b7   : > { %v3815_v19 = vmul.f32 0.6931472, %v5296_v58 }
 0x6b9   : > { %v3821_v54 = vsel %vm3820_vm9, %v3818_v34, %v3815_v19 }
 0x6ba   : > { %v3837_v22 = vadd.f32 %v3821_v54, %v3581_v11 }
 0x6bc   : > { %v3853_v56 = vsel %vm3597_vm14, %v3564_v1, %v3837_v22 }
 0x6bd   : > { %3869 = vst.msk [vmem:[#allocation5 + $0x78] sm:$0xff] %vm613_vm2, %v3853_v56 }
 0x6be LB: >> { %5301 = vset.pattern.permute.xlu2 %v6185_v46  ;;  %5299 = vset.pattern.permute.xlu1 %v6185_v46  ;;  %s7003_s22 = sshll.u32 %s5438_s21, 3  ;;  %vm7295_vm13 = vcmask 1045509   ;;  %vm7296_vm0 = vcmask 1046534   ;;  %vm7297_vm12 = vcmask 1047559   ;;  %s3882_s21 = sadd.s32 1, %s5438_s21   ;;  %s5438_s21 = sphi %s6988_s21, %s3882_s21   ;;  %v5434_v48 = vphi %v6959_v48, %v7299_v48   ;;  %v5430_v59 = vphi %v3876_v59, %v7298_v59  }
 0x6bf   : >> { %5297 = vset.pattern.permute.xlu0 %v6185_v46  ;;  %s3890_s23 = scalar_lea.vmem [#allocation8], %s7003_s22  ;;  %s3892_s24 = scalar_lea.vmem [#allocation9], %s7003_s22 }
 0x6c0   : >> { %v3891_v39 = vld [vmem:[%s3890_s23] sm:$0xff]  ;;  %s3886_s12 = scalar_lea.vmem [#allocation5], %s7003_s22  ;;  %s3888_s26 = scalar_lea.vmem [#allocation4], %s7003_s22 }
 0x6c1   : >> { %v4003_v33 = vperm.slane %v3891_v39, 2  ;;  %v3990_v41 = vperm.slane %v3891_v39, 1  ;;  %v3977_v30 = vperm.slane %v3891_v39, 0  ;;  %v4016_v40 = vperm.slane %v3891_v39, 3  ;;  %v7011_v63 = vld [vmem:[%s3892_s24] sm:$0xff]  ;;  %s3894_s25 = scalar_lea.vmem [#allocation6], %s7003_s22 }
 0x6c2   : >> { %v4055_v53 = vperm.slane %v3891_v39, 6  ;;  %v4184_v13 = vperm.slane %v7011_v63, 3  ;;  %v4042_v45 = vperm.slane %v3891_v39, 5  ;;  %v4029_v44 = vperm.slane %v3891_v39, 4  ;;  %v7038_v50 = vld [vmem:[%s3888_s26] sm:$0xff]  ;;  %s4439_s27 = scalar_lea.vmem [#allocation7], %s7003_s22 }
 0x6c3   : >> { %v4158_v43 = vperm.slane %v7011_v63, 1  ;;  %v4068_v9 = vperm.slane %v3891_v39, 7  ;;  %v4223_v42 = vperm.slane %v7011_v63, 6  ;;  %v4145_v0 = vperm.slane %v7011_v63, 0  ;;  %p3879_p9 = scmp.ge.s32.totalorder %s3882_s21, 16  }
 0x6c4   : >> { %v4171_v28 = vperm.slane %v7011_v63, 2  ;;  %v7029_v29 = vld [vmem:[%s3886_s12] sm:$0xff]  ;;  %v4197_v32 = vperm.slane %v7011_v63, 4  ;;  %v4210_v31 = vperm.slane %v7011_v63, 5  ;;  %v4236_v19 = vperm.slane %v7011_v63, 7 }
 0x6c5   : >> { %v3904_v1 = vperm.slane %v7029_v29, 0  ;;  %v3897_v4 = vrot.slane %v7029_v29, 1  ;;  %v3898_v8 = vrot.slane %v7029_v29, 2  ;;  %v7044_v61 = vmul.f32 %v7038_v50, %v7029_v29 }
 0x6c6   : >> { %4008 = vperm.xlu2 %5301, %v4003_v33   ;;  %3995 = vperm.xlu1 %5299, %v3990_v41  }
 0x6c7   : >> { %3982 = vperm.xlu0 %5297, %v3977_v30   ;;  %v3920_v55 = vmul.f32 %v6952_v36, %v3904_v1  ;;  %v3905_v37 = vperm.slane %v3897_v4, 0  ;;  %v3906_v23 = vperm.slane %v3898_v8, 0  ;;  %v3970_v18 = vrot.slane %v7044_v61, 1 }
 0x6c8   : >> { %v4081_v38 = vperm.slane %v7044_v61, 0  ;;  %v3971_v15 = vrot.slane %v7044_v61, 2  ;;  %v3921_v54 = vmul.f32 %v6957_v21, %v3904_v1 }
 0x6c9   : >> { %v3936_v26 = vmul.f32 1.442695, %v3920_v55  ;;  %v3922_v47 = vmul.f32 %v6952_v36, %v3905_v37  ;;  %v3924_v6 = vmul.f32 %v6952_v36, %v3906_v23  ;;  %v4082_v16 = vperm.slane %v3970_v18, 0 }
 0x6ca   : >> { %v4083_v25 = vperm.slane %v3971_v15, 0  ;;  %v3938_v56 = vmul.f32 1.442695, %v3921_v54  ;;  %v3925_v63 = vmul.f32 %v6957_v21, %v3906_v23 }
 0x6cb   : >> { %5316 = vpow2.f32 %v3936_v26  ;;  %v3940_v62 = vmul.f32 1.442695, %v3922_v47  ;;  %v3944_v57 = vmul.f32 1.442695, %v3924_v6 }
 0x6cd   : >> { %5318 = vpow2.f32 %v3940_v62 }
 0x6ce   : >> { %5302 = vset.pattern.permute.xlu2 %v6195_v52  ;;  %5300 = vset.pattern.permute.xlu1 %v6195_v52  ;;  %5320 = vpow2.f32 %v3944_v57 }
 0x6cf   : >> { %5298 = vset.pattern.permute.xlu0 %v6195_v52  ;;  %5322 = vpow2.f32 %v3938_v56 }
 0x6d1   : >> { %v5317_v60 = vpop.eup %5316 }
 0x6d2   : >> { %v4113_v3 = vmul.f32 %v5434_v48, %v5317_v60 }
 0x6d3   : >> { %v5319_v14 = vpop.eup %5318 }
 0x6d4   : >> { %v5321_v48 = vpop.eup %5320 }
 0x6d6   : >> { %4014 = vperm.xlu2 %5302, %v4003_v33   ;;  %4001 = vperm.xlu1 %5300, %v3990_v41   ;;  %v3923_v33 = vmul.f32 %v6957_v21, %v3905_v37 }
 0x6d7   : >> { %3988 = vperm.xlu0 %5298, %v3977_v30  }
 0x6d8   : >> { %v3942_v30 = vmul.f32 1.442695, %v3923_v33 }
 0x6da   : >> { %5324 = vpow2.f32 %v3942_v30 }
 0x6de   : >> { %4027 = vperm.xlu2 %5302, %v4016_v40   ;;  %5303 = vset.pattern.permute.xlu1 %v6185_v46 }
 0x6df   : >> { %4066 = vperm.xlu0 %5298, %v4055_v53  }
 0x6e6   : >> { %5305 = vset.pattern.permute.xlu2 %v6185_v46  ;;  %4021 = vperm.xlu1 %5303, %v4016_v40   ;;  %v5323_v40 = vpop.eup %5322 }
 0x6e7   : >> { %4195 = vperm.xlu0 %5298, %v4184_v13   ;;  %v5325_v1 = vpop.eup %5324 }
 0x6ee   : >> { %4047 = vperm.xlu2 %5305, %v4042_v45   ;;  %5304 = vset.pattern.permute.xlu1 %v6195_v52 }
 0x6ef   : >> { %5310 = vset.pattern.permute.xlu0 %v6185_v46 }
 0x6f6   : >> { %4060 = vperm.xlu2 %5305, %v4055_v53   ;;  %4040 = vperm.xlu1 %5304, %v4029_v44  }
 0x6f7   : >> { %4034 = vperm.xlu0 %5310, %v4029_v44   ;;  %v4114_v44 = vmul.f32 %v5430_v59, %v5323_v40 }
 0x6fe   : >> { %5307 = vset.pattern.permute.xlu2 %v6195_v52  ;;  %4053 = vperm.xlu1 %5304, %v4042_v45  }
 0x6ff   : >> { %4163 = vperm.xlu0 %5310, %v4158_v43  }
 0x706   : >> { %4079 = vperm.xlu2 %5307, %v4068_v9   ;;  %5306 = vset.pattern.permute.xlu1 %v6185_v46 }
 0x707   : >> { %4228 = vperm.xlu0 %5310, %v4223_v42  }
 0x70e   : >> { %4156 = vperm.xlu2 %5307, %v4145_v0   ;;  %4073 = vperm.xlu1 %5306, %v4068_v9  }
 0x70f   : >> { %5315 = vset.pattern.permute.xlu0 %v6195_v52 }
 0x716   : >> { %5309 = vset.pattern.permute.xlu2 %v6185_v46  ;;  %4150 = vperm.xlu1 %5306, %v4145_v0   ;;  %v3946_v0 = vmul.f32 1.442695, %v3925_v63 }
 0x718   : >> { %5326 = vpow2.f32 %v3946_v0 }
 0x71e   : >> { %4176 = vperm.xlu2 %5309, %v4171_v28   ;;  %5308 = vset.pattern.permute.xlu1 %v6195_v52  ;;  %v5327_v60 = vpop.eup %5326 }
 0x720   : >> { %v4009_v12 = vpop.permute.xlu2 %4008 }
 0x721   : >> { %v4101_v27 = vmul.f32 %v4083_v25, %v4009_v12 }
 0x726   : >> { %4189 = vperm.xlu2 %5309, %v4184_v13   ;;  %4169 = vperm.xlu1 %5308, %v4158_v43   ;;  %v3899_v43 = vrot.slane %v7029_v29, 3 }
 0x728   : >> { %v3907_v4 = vperm.slane %v3899_v43, 0 }
 0x72a   : >> { %v3927_v37 = vmul.f32 %v6957_v21, %v3907_v4  ;;  %v3926_v59 = vmul.f32 %v6952_v36, %v3907_v4 }
 0x72c   : >> { %v3950_v62 = vmul.f32 1.442695, %v3927_v37  ;;  %v3948_v57 = vmul.f32 1.442695, %v3926_v59 }
 0x72e   : >> { %5312 = vset.pattern.permute.xlu2 %v6195_v52  ;;  %4182 = vperm.xlu1 %5308, %v4171_v28  }
 0x730   : >> { %v4015_v17 = vpop.permute.xlu2 %4014 }
 0x736   : >> { %4208 = vperm.xlu2 %5312, %v4197_v32   ;;  %5311 = vset.pattern.permute.xlu1 %v6185_v46 }
 0x738   : >> { %v3996_v20 = vpop.permute.xlu1 %3995  ;;  %v4028_v34 = vpop.permute.xlu2 %4027 }
 0x739   : >> { %v3983_v10 = vpop.permute.xlu0 %3982  ;;  %v4099_v24 = vmul.f32 %v4082_v16, %v3996_v20 }
 0x73a   : >> { %v4097_v51 = vmul.f32 %v4081_v38, %v3983_v10 }
 0x73c   : >> { %v7052_v35 = vadd.f32 %v4113_v3, %v4097_v51  ;;  %v3972_v3 = vrot.slane %v7044_v61, 3 }
 0x73e   : >> { %v4117_v2 = vmul.f32 %v5319_v14, %v7052_v35  ;;  %4221 = vperm.xlu2 %5312, %v4210_v31   ;;  %4202 = vperm.xlu1 %5311, %v4197_v32  }
 0x740   : >> { %v7055_v49 = vadd.f32 %v4117_v2, %v4099_v24 }
 0x742   : >> { %v4121_v5 = vmul.f32 %v5321_v48, %v7055_v49 }
 0x744   : >> { %v7058_v58 = vadd.f32 %v4121_v5, %v4101_v27 }
 0x746   : >> { %5314 = vset.pattern.permute.xlu2 %v6185_v46  ;;  %4215 = vperm.xlu1 %5311, %v4210_v31  }
 0x748   : >> { %v7065_v11 = vpop.permute.xlu2 %4047  ;;  %v4002_v22 = vpop.permute.xlu1 %4001 }
 0x749   : >> { %v3989_v53 = vpop.permute.xlu0 %3988  ;;  %v4100_v47 = vmul.f32 %v4082_v16, %v4002_v22  ;;  %v4084_v16 = vperm.slane %v3972_v3, 0 }
 0x74a   : >> { %v4098_v45 = vmul.f32 %v4081_v38, %v3989_v53  ;;  %v4102_v38 = vmul.f32 %v4083_v25, %v4015_v17  ;;  %v3900_v53 = vrot.slane %v7029_v29, 4 }
 0x74b   : >> { %v4104_v2 = vmul.f32 %v4084_v16, %v4028_v34 }
 0x74c   : >> { %v4116_v28 = vadd.f32 %v4114_v44, %v4098_v45  ;;  %v3908_v4 = vperm.slane %v3900_v53, 0  ;;  %v3973_v53 = vrot.slane %v7044_v61, 4 }
 0x74e   : >> { %4241 = vperm.xlu2 %5314, %v4236_v19   ;;  %5313 = vset.pattern.permute.xlu1 %v6195_v52  ;;  %v4118_v26 = vmul.f32 %v5325_v1, %v4116_v28  ;;  %v3929_v59 = vmul.f32 %v6957_v21, %v3908_v4  ;;  %v3928_v3 = vmul.f32 %v6952_v36, %v3908_v4 }
 0x750   : >> { %v7068_v39 = vpop.permute.xlu2 %4060  ;;  %v4120_v32 = vadd.f32 %v4118_v26, %v4100_v47 }
 0x751   : >> { %v7084_v23 = vpop.permute.xlu0 %4066 }
 0x752   : >> { %v4122_v15 = vmul.f32 %v5327_v60, %v4120_v32 }
 0x754   : >> { %v7091_v14 = vadd.f32 %v4122_v15, %v4102_v38 }
 0x756   : >> { %4234 = vperm.xlu1 %5313, %v4223_v42   ;;  %v7079_v42 = vld [vmem:[%s3894_s25] sm:$0xff] }
 0x757   : >> { %v4857_v55 = vmul.f32 -1.442695, %v7079_v42 }
 0x758   : >> { %v4022_v41 = vpop.permute.xlu1 %4021 }
 0x759   : >> { %5328 = vpow2.f32 %v4857_v55  ;;  %v4196_v31 = vpop.permute.xlu0 %4195  ;;  %v4103_v48 = vmul.f32 %v4084_v16, %v4022_v41 }
 0x75a   : >> { %5330 = vpow2.f32 %v3950_v62 }
 0x75b   : >> { %5332 = vpow2.f32 %v3948_v57 }
 0x75e   : >> { %4247 = vperm.xlu1 %5313, %v4236_v19  }
 0x75f   : >> { %v5329_v18 = vpop.eup %5328 }
 0x760   : >> { %v7071_v13 = vpop.permute.xlu2 %4079  ;;  %v4368_v12 = vadd.f32 1.0, %v5329_v18  ;;  %v5331_v20 = vpop.eup %5330 }
 0x761   : >> { %v5333_v24 = vpop.eup %5332  ;;  %v4126_v27 = vmul.f32 %v5331_v20, %v7091_v14 }
 0x762   : >> { %5334 = vrcp.f32 %v4368_v12  ;;  %v4125_v25 = vmul.f32 %v5333_v24, %v7058_v58  ;;  %vm4374_vm10 = vweird.f32 %v4368_v12  ;;  %v4378_v18 = vand.u32 2147483647, %v4368_v12 }
 0x763   : >> { %v7097_v19 = vadd.f32 %v4126_v27, %v4104_v2  ;;  %v4380_v38 = vand.u32 2147483648, %v4368_v12  ;;  %v3954_v24 = vmul.f32 1.442695, %v3929_v59 }
 0x764   : >> { %v7095_v17 = vadd.f32 %v4125_v25, %v4103_v48  ;;  %vm7119_vm15 = vcmp.eq.f32.partialorder %v4378_v18, 8.507059e+37 }
 0x765   : >> { %v4256_v40 = vmul.f32 %v4196_v31, %v7097_v19  ;;  %5336 = vpow2.f32 %v3954_v24 }
 0x767   : >> { %v4293_v44 = vsel %vm613_vm2, %v4256_v40, 0.0 }
 0x768   : >> { %v7076_v9 = vpop.permute.xlu1 %4040  ;;  %v4157_v8 = vpop.permute.xlu2 %4156 }
 0x769   : >> { %v7099_v54 = vpop.permute.xlu0 %4034  ;;  %v5335_v22 = vpop.eup %5334  ;;  %v4250_v34 = vmul.f32 %v4157_v8, %v4116_v28 }
 0x76a   : >> { %v4370_v30 = vmul.f32 %v5335_v22, %v4368_v12  ;;  %vm4375_vm11 = vweird.f32 %v5335_v22  ;;  %v4381_v12 = vor.u32 1.1754944e-38, %v4380_v38 }
 0x76b   : >> { %v4266_v43 = vsel %vm613_vm2, %v4250_v34, 0.0  ;;  %vm7115_vm3 = vmor %vm4374_vm10, %vm4375_vm11 }
 0x76c   : >> { %v4371_v45 = vsub.f32 1.0, %v4370_v30  ;;  %v4338_v30 = vperm.slane %v6964_v7, 0 }
 0x76e   : >> { %v4372_v26 = vmul.f32 %v5335_v22, %v4371_v45 }
 0x770   : >> { %v7086_v6 = vpop.permute.xlu1 %4053  ;;  %v4373_v57 = vadd.f32 %v5335_v22, %v4372_v26  ;;  %v4085_v26 = vperm.slane %v3973_v53, 0 }
 0x771   : >> { %v4164_v55 = vpop.permute.xlu0 %4163 }
 0x772   : >> { %v4251_v28 = vmul.f32 %v4164_v55, %v7055_v49  ;;  %v4377_v25 = vsel %vm7115_vm3, %v5335_v22, %v4373_v57  ;;  %v3902_v57 = vrot.slane %v7029_v29, 6 }
 0x774   : >> { %v4274_v15 = vsel %vm613_vm2, %v4251_v28, 0.0 }
 0x778   : >> { %v4177_v10 = vpop.permute.xlu2 %4176 }
 0x780   : >> { %v7089_v51 = vpop.permute.xlu1 %4073  ;;  %v4190_v5 = vpop.permute.xlu2 %4189 }
 0x781   : >> { %v4255_v33 = vmul.f32 %v4190_v5, %v7095_v17  ;;  %v3952_v5 = vmul.f32 1.442695, %v3928_v3 }
 0x783   : >> { %v4292_v63 = vsel %vm613_vm2, %v4255_v33, 0.0  ;;  %5338 = vpow2.f32 %v3952_v5 }
 0x784   : >> { %v4294_v1 = vadd.f32 %v4293_v44, %v4292_v63 }
 0x786   : >> { %v4295_v8 = vrot.slane %v4294_v1, 4 }
 0x788   : >> { %v4151_v56 = vpop.permute.xlu1 %4150  ;;  %v4296_v16 = vadd.f32 %v4295_v8, %v4294_v1 }
 0x789   : >> { %v4249_v41 = vmul.f32 %v4151_v56, %v7052_v35  ;;  %v3901_v35 = vrot.slane %v7029_v29, 5  ;;  %v4253_v56 = vmul.f32 %v4177_v10, %v7058_v58 }
 0x78a   : >> { %v4297_v33 = vrot.slane %v4296_v16, 2 }
 0x78b   : >> { %v4265_v0 = vsel %vm613_vm2, %v4249_v41, 0.0  ;;  %v3909_v20 = vperm.slane %v3901_v35, 0  ;;  %v4283_v22 = vsel %vm613_vm2, %v4253_v56, 0.0 }
 0x78c   : >> { %v4267_v37 = vadd.f32 %v4266_v43, %v4265_v0  ;;  %v4298_v58 = vadd.f32 %v4297_v33, %v4296_v16  ;;  %v4382_v0 = vsel %vm7119_vm15, %v4381_v12, %v4377_v25 }
 0x78d   : >> { %v3930_v40 = vmul.f32 %v6952_v36, %v3909_v20  ;;  %v3931_v45 = vmul.f32 %v6957_v21, %v3909_v20 }
 0x78e   : >> { %v4268_v62 = vrot.slane %v4267_v37, 4 }
 0x78f   : >> { %v3956_v1 = vmul.f32 1.442695, %v3930_v40  ;;  %v3958_v8 = vmul.f32 1.442695, %v3931_v45 }
 0x790   : >> { %v4269_v48 = vadd.f32 %v4268_v62, %v4267_v37  ;;  %v7136_v37 = vmul.f32 %v4338_v30, %v7038_v50  ;;  %v4299_v62 = vrot.slane %v4298_v58, 1  ;;  %v3974_v50 = vrot.slane %v7044_v61, 5  ;;  %v4209_v31 = vpop.permute.xlu2 %4208 }
 0x791   : >> { %5340 = vpow2.f32 %v3956_v1 }
 0x792   : >> { %v4270_v63 = vrot.slane %v4269_v48, 2  ;;  %5342 = vpow2.f32 %v3958_v8  ;;  %v4300_v24 = vadd.f32 %v4299_v62, %v4298_v58  ;;  %v4086_v5 = vperm.slane %v3974_v50, 0 }
 0x793   : >> { %v4343_v40 = vrot.slane %v7136_v37, 2 }
 0x794   : >> { %v4271_v28 = vadd.f32 %v4270_v63, %v4269_v48  ;;  %v4107_v58 = vmul.f32 %v4086_v5, %v7065_v11 }
 0x796   : >> { %v4272_v16 = vrot.slane %v4271_v28, 1 }
 0x798   : >> { %v4170_v47 = vpop.permute.xlu1 %4169  ;;  %v4222_v62 = vpop.permute.xlu2 %4221 }
 0x799   : >> { %v4252_v60 = vmul.f32 %v4170_v47, %v4120_v32  ;;  %v7139_v47 = vmul.f32 %v4382_v0, %v7079_v42 }
 0x79b   : >> { %v4275_v49 = vsel %vm613_vm2, %v4252_v60, 0.0  ;;  %v4342_v60 = vrot.slane %v7136_v37, 1  ;;  %v4386_v48 = vrot.slane %v7139_v47, 1 }
 0x79c   : >> { %v4276_v2 = vadd.f32 %v4275_v49, %v4274_v15  ;;  %v4106_v15 = vmul.f32 %v4085_v26, %v7076_v9  ;;  %v4105_v49 = vmul.f32 %v4085_v26, %v7099_v54  ;;  %v4273_v9 = vadd.f32 %v4272_v16, %v4271_v28 }
 0x79e   : >> { %v4277_v27 = vrot.slane %v4276_v2, 4  ;;  %v4357_v0 = vadd.f32 %v7136_v37, %v4273_v9 }
 0x7a0   : >> { %v4278_v34 = vadd.f32 %v4277_v27, %v4276_v2  ;;  %v4183_v41 = vpop.permute.xlu1 %4182  ;;  %v4344_v2 = vrot.slane %v7136_v37, 3  ;;  %v3910_v27 = vperm.slane %v3902_v57, 0 }
 0x7a1   : >> { %v4254_v44 = vmul.f32 %v4183_v41, %v7091_v14  ;;  %v5337_v14 = vpop.eup %5336 }
 0x7a2   : >> { %v4279_v43 = vrot.slane %v4278_v34, 2  ;;  %v5339_v3 = vpop.eup %5338  ;;  %v4130_v42 = vmul.f32 %v5337_v14, %v7097_v19  ;;  %v4360_v41 = vadd.f32 %v4344_v2, %v4300_v24  ;;  %v3932_v45 = vmul.f32 %v6952_v36, %v3910_v27 }
 0x7a3   : >> { %v4284_v10 = vsel %vm613_vm2, %v4254_v44, 0.0  ;;  %v4129_v12 = vmul.f32 %v5339_v3, %v7095_v17  ;;  %v5341_v33 = vpop.eup %5340  ;;  %v4387_v17 = vrot.slane %v7139_v47, 2  ;;  %v3933_v28 = vmul.f32 %v6957_v21, %v3910_v27 }
 0x7a4   : >> { %v4280_v4 = vadd.f32 %v4279_v43, %v4278_v34  ;;  %v4285_v55 = vadd.f32 %v4284_v10, %v4283_v22  ;;  %v4132_v56 = vadd.f32 %v4130_v42, %v4106_v15  ;;  %v5343_v19 = vpop.eup %5342  ;;  %v4388_v34 = vrot.slane %v7139_v47, 3 }
 0x7a5   : >> { %v4131_v30 = vadd.f32 %v4129_v12, %v4105_v49  ;;  %v3903_v43 = vrot.slane %v7029_v29, 7  ;;  %v4108_v10 = vmul.f32 %v4086_v5, %v7086_v6  ;;  %v3960_v29 = vmul.f32 1.442695, %v3932_v45 }
 0x7a6   : >> { %v4281_v35 = vrot.slane %v4280_v4, 1  ;;  %v4286_v59 = vrot.slane %v4285_v55, 4  ;;  %v4258_v53 = vmul.f32 %v4209_v31, %v4132_v56  ;;  %v4404_v8 = vmul.f32 %v4388_v34, %v4360_v41 }
 0x7a7   : >> { %v4401_v6 = vmul.f32 %v7139_v47, %v4357_v0  ;;  %v3962_v50 = vmul.f32 1.442695, %v3933_v28  ;;  %5344 = vpow2.f32 %v3960_v29  ;;  %v3975_v2 = vrot.slane %v7044_v61, 6 }
 0x7a8   : >> { %v4282_v18 = vadd.f32 %v4281_v35, %v4280_v4  ;;  %v4287_v38 = vadd.f32 %v4286_v59, %v4285_v55  ;;  %v4133_v4 = vmul.f32 %v5341_v33, %v4131_v30  ;;  %v4134_v55 = vmul.f32 %v5343_v19, %v4132_v56 }
 0x7a9   : >> { %v4302_v14 = vsel %vm613_vm2, %v4258_v53, 0.0  ;;  %v4423_v16 = vrot.slane %v4404_v8, 5  ;;  %5346 = vpow2.f32 %v3962_v50  ;;  %v4345_v34 = vrot.slane %v7136_v37, 4 }
 0x7aa   : >> { %v4288_v20 = vrot.slane %v4287_v38, 2  ;;  %v4358_v32 = vadd.f32 %v4342_v60, %v4282_v18  ;;  %v4136_v57 = vadd.f32 %v4134_v55, %v4108_v10  ;;  %v3911_v18 = vperm.slane %v3903_v43, 0  ;;  %v4229_v55 = vpop.permute.xlu0 %4228 }
 0x7ab   : >> { %v4135_v15 = vadd.f32 %v4133_v4, %v4107_v58  ;;  %v4389_v45 = vrot.slane %v7139_v47, 4  ;;  %v3976_v58 = vrot.slane %v7044_v61, 7  ;;  %v4346_v29 = vrot.slane %v7136_v37, 5 }
 0x7ac   : >> { %v4289_v25 = vadd.f32 %v4288_v20, %v4287_v38  ;;  %v4402_v63 = vmul.f32 %v4386_v48, %v4358_v32  ;;  %v4260_v49 = vmul.f32 %v4222_v62, %v4136_v57  ;;  %v3934_v48 = vmul.f32 %v6952_v36, %v3911_v18 }
 0x7ae   : >> { %v4290_v54 = vrot.slane %v4289_v25, 1  ;;  %v4417_v35 = vrot.slane %v4402_v63, 7  ;;  %v4311_v5 = vsel %vm613_vm2, %v4260_v49, 0.0 }
 0x7b0   : >> { %v4291_v44 = vadd.f32 %v4290_v54, %v4289_v25  ;;  %v4203_v22 = vpop.permute.xlu1 %4202  ;;  %v4419_v31 = vsel %vm2368_vm5, %v4417_v35, %v4401_v6  ;;  %v3935_v25 = vmul.f32 %v6957_v21, %v3911_v18  ;;  %v3964_v54 = vmul.f32 1.442695, %v3934_v48 }
 0x7b1   : >> { %v4257_v1 = vmul.f32 %v4203_v22, %v4131_v30  ;;  %v4087_v30 = vperm.slane %v3975_v2, 0  ;;  %v4390_v6 = vrot.slane %v7139_v47, 5 }
 0x7b2   : >> { %v4359_v26 = vadd.f32 %v4343_v40, %v4291_v44  ;;  %v5345_v40 = vpop.eup %5344  ;;  %v3966_v53 = vmul.f32 1.442695, %v3935_v25  ;;  %5348 = vpow2.f32 %v3964_v54 }
 0x7b3   : >> { %v4301_v59 = vsel %vm613_vm2, %v4257_v1, 0.0  ;;  %v5347_v63 = vpop.eup %5346  ;;  %v4109_v43 = vmul.f32 %v4087_v30, %v7068_v39  ;;  %v4137_v22 = vmul.f32 %v5345_v40, %v4135_v15  ;;  %v4110_v1 = vmul.f32 %v4087_v30, %v7084_v23 }
 0x7b4   : >> { %v4403_v60 = vmul.f32 %v4387_v17, %v4359_v26  ;;  %v4303_v11 = vadd.f32 %v4302_v14, %v4301_v59  ;;  %5350 = vpow2.f32 %v3966_v53  ;;  %v4138_v4 = vmul.f32 %v5347_v63, %v4136_v57 }
 0x7b5   : >> { %v4139_v8 = vadd.f32 %v4137_v22, %v4109_v43  ;;  %v4088_v14 = vperm.slane %v3976_v58, 0 }
 0x7b6   : >> { %v4420_v38 = vrot.slane %v4403_v60, 6  ;;  %v4304_v3 = vrot.slane %v4303_v11, 4  ;;  %v4140_v60 = vadd.f32 %v4138_v4, %v4110_v1  ;;  %v4392_v1 = vrot.slane %v7139_v47, 7 }
 0x7b7   : >> { %v4261_v62 = vmul.f32 %v4229_v55, %v4139_v8  ;;  %v4111_v57 = vmul.f32 %v4088_v14, %v7089_v51 }
 0x7b8   : >> { %v4422_v42 = vsel %vm2371_vm6, %v4420_v38, %v4419_v31  ;;  %v4305_v20 = vadd.f32 %v4304_v3, %v4303_v11  ;;  %v4216_v24 = vpop.permute.xlu1 %4215  ;;  %v5349_v39 = vpop.eup %5348  ;;  %v4112_v3 = vmul.f32 %v4088_v14, %v7071_v13 }
 0x7b9   : >> { %v4425_v32 = vsel %vm2374_vm7, %v4423_v16, %v4422_v42  ;;  %v4259_v12 = vmul.f32 %v4216_v24, %v4135_v15  ;;  %v4319_v15 = vsel %vm613_vm2, %v4261_v62, 0.0  ;;  %v4141_v16 = vmul.f32 %v5349_v39, %v4139_v8  ;;  %v4242_v42 = vpop.permute.xlu2 %4241 }
 0x7ba   : >> { %v4306_v27 = vrot.slane %v4305_v20, 2  ;;  %v5351_v11 = vpop.eup %5350 }
 0x7bb   : >> { %v4310_v9 = vsel %vm613_vm2, %v4259_v12, 0.0  ;;  %v4142_v31 = vmul.f32 %v5351_v11, %v4140_v60  ;;  %v4143_v2 = vadd.f32 %v4141_v16, %v4111_v57  }
 0x7bc   : >> { %v4307_v56 = vadd.f32 %v4306_v27, %v4305_v20  ;;  %v4312_v33 = vadd.f32 %v4311_v5, %v4310_v9 }
 0x7bd   : >> { %v4263_v12 = vmul.f32 %v4242_v42, %v4143_v2  ;;  %v4144_v27 = vadd.f32 %v4142_v31, %v4112_v3   ;;  %4441 = vst.msk [vmem:[#allocation2 + $0x10] sm:$0xff] (%p3879_p9), %vm613_vm2, %v4143_v2 }
 0x7be   : >> { %v4308_v19 = vrot.slane %v4307_v56, 1  ;;  %v4313_v41 = vrot.slane %v4312_v33, 4 }
 0x7bf   : > { %4442 = vst.msk [vmem:[#allocation2 + $0x18] sm:$0xff] (%p3879_p9), %vm613_vm2, %v4144_v27 }
 0x7c0   : >> { %v4309_v17 = vadd.f32 %v4308_v19, %v4307_v56  ;;  %v4314_v44 = vadd.f32 %v4313_v41, %v4312_v33  ;;  %v4328_v56 = vsel %vm613_vm2, %v4263_v12, 0.0  ;;  %v4347_v19 = vrot.slane %v7136_v37, 6 }
 0x7c1   : >> { %v4391_v41 = vrot.slane %v7139_v47, 6  ;;  %v4888_v47 = vld [vmem:[%s7272_s9 + $0x10] sm:$0xff] (%p3879_p9) }
 0x7c2   : >> { %v4361_v10 = vadd.f32 %v4345_v34, %v4309_v17  ;;  %v4315_v0 = vrot.slane %v4314_v44, 2 }
 0x7c4   : >> { %v4405_v26 = vmul.f32 %v4389_v45, %v4361_v10  ;;  %v4316_v28 = vadd.f32 %v4315_v0, %v4314_v44  ;;  %v4348_v10 = vrot.slane %v7136_v37, 7  ;;  %v4889_v37 = vld [vmem:[%s7272_s9 + $0x18] sm:$0xff] (%p3879_p9) }
 0x7c5   : > { %4514 = vmatpush.bf16.msrb.mxu3 (%p3879_p9), %v4889_v37 }
 0x7c6   : >> { %v4426_v35 = vrot.slane %v4405_v26, 4  ;;  %v4317_v59 = vrot.slane %v4316_v28, 1 }
 0x7c8   : >> { %v4428_v61 = vsel %vm2377_vm8, %v4426_v35, %v4425_v32  ;;  %v4318_v18 = vadd.f32 %v4317_v59, %v4316_v28  ;;  %v4235_v23 = vpop.permute.xlu1 %4234  ;;  %v7298_v59 = vmov %v4144_v27 }
 0x7c9   : >> { %v4262_v38 = vmul.f32 %v4235_v23, %v4140_v60  ;;  %4515 = vmatpush.bf16.msrb.mxu3 (%p3879_p9), %v4888_v47 }
 0x7ca   : >> { %v4362_v50 = vadd.f32 %v4346_v29, %v4318_v18 }
 0x7cb   : >> { %v4320_v49 = vsel %vm613_vm2, %v4262_v38, 0.0 }
 0x7cc   : >> { %v4406_v20 = vmul.f32 %v4390_v6, %v4362_v50  ;;  %v4321_v24 = vadd.f32 %v4320_v49, %v4319_v15 }
 0x7ce   : >> { %v4429_v48 = vrot.slane %v4406_v20, 3  ;;  %v4322_v32 = vrot.slane %v4321_v24, 4 }
 0x7d0   : >> { %v4431_v51 = vsel %vm7295_vm13, %v4429_v48, %v4428_v61  ;;  %v4323_v25 = vadd.f32 %v4322_v32, %v4321_v24  ;;  %v4248_v5 = vpop.permute.xlu1 %4247  ;;  %v7299_v48 = vmov %v4143_v2 }
 0x7d1   : >> { %v4264_v13 = vmul.f32 %v4248_v5, %v4144_v27 }
 0x7d2   : >> { %v4324_v9 = vrot.slane %v4323_v25, 2 }
 0x7d3   : >> { %v4329_v33 = vsel %vm613_vm2, %v4264_v13, 0.0 }
 0x7d4   : >> { %v4325_v30 = vadd.f32 %v4324_v9, %v4323_v25  ;;  %v4330_v54 = vadd.f32 %v4329_v33, %v4328_v56 }
 0x7d6   : >> { %v4326_v40 = vrot.slane %v4325_v30, 1  ;;  %v4331_v34 = vrot.slane %v4330_v54, 4 }
 0x7d8   : >> { %v4327_v53 = vadd.f32 %v4326_v40, %v4325_v30  ;;  %v4332_v63 = vadd.f32 %v4331_v34, %v4330_v54 }
 0x7da   : >> { %v4363_v45 = vadd.f32 %v4347_v19, %v4327_v53  ;;  %v4333_v17 = vrot.slane %v4332_v63, 2 }
 0x7dc   : >> { %v4407_v44 = vmul.f32 %v4391_v41, %v4363_v45  ;;  %v4334_v43 = vadd.f32 %v4333_v17, %v4332_v63 }
 0x7de   : >> { %v4432_v22 = vrot.slane %v4407_v44, 2  ;;  %v4335_v58 = vrot.slane %v4334_v43, 1 }
 0x7e0   : >> { %v4434_v0 = vsel %vm7296_vm0, %v4432_v22, %v4431_v51  ;;  %v4336_v4 = vadd.f32 %v4335_v58, %v4334_v43 }
 0x7e2   : >> { %v4364_v55 = vadd.f32 %v4348_v10, %v4336_v4 }
 0x7e4   : >> { %v4408_v26 = vmul.f32 %v4392_v1, %v4364_v55 }
 0x7e5   : > { %3881 = sbr.rel (!%p3879_p9) target bundleno = 1726 (0x6be), region = 140 }
 0x7e6   : >> { %v4435_v28 = vrot.slane %v4408_v26, 1 }
 0x7e8   : >> { %v4437_v8 = vsel %vm7297_vm12, %v4435_v28, %v4434_v0 }
 0x7e9   : >> { %4440 = vst.msk [vmem:[%s4439_s27] sm:$0xff] %vm613_vm2, %v4437_v8 }
 0x7f0   : > { %v4443_v14 = vld [vmem:[#allocation7] sm:$0xff]  ;;  %v4444_v35 = vld [vmem:[#allocation7 + $0x8] sm:$0xff]  ;;  %v4445_v39 = vld [vmem:[#allocation7 + $0x10] sm:$0xff] }
 0x7f1   : > { %v4459_v29 = vpack.c.bf16 %v4444_v35, %v4443_v14  ;;  %v4446_v46 = vld [vmem:[#allocation7 + $0x18] sm:$0xff]  ;;  %v4447_v36 = vld [vmem:[#allocation7 + $0x20] sm:$0xff]  ;;  %v4448_v21 = vld [vmem:[#allocation7 + $0x28] sm:$0xff] }
 0x7f2   : > { %v4460_v52 = vpack.c.bf16 %v4446_v46, %v4445_v39  ;;  %v4461_v7 = vpack.c.bf16 %v4448_v21, %v4447_v36  ;;  %v4449_v59 = vld [vmem:[#allocation7 + $0x30] sm:$0xff]  ;;  %v4450_v62 = vld [vmem:[#allocation7 + $0x38] sm:$0xff]  ;;  %v4451_v11 = vld [vmem:[#allocation7 + $0x40] sm:$0xff] }
 0x7f3   : > { %4870 = vmatmul.msk.bf16.vlgmr.msrb.gmra.mxu3 %vm613_vm2, %v4459_v29  ;;  %v4462_v60 = vpack.c.bf16 %v4450_v62, %v4449_v59  ;;  %v4452_v61 = vld [vmem:[#allocation7 + $0x48] sm:$0xff]  ;;  %v4453_v18 = vld [vmem:[#allocation7 + $0x50] sm:$0xff]  ;;  %v4454_v23 = vld [vmem:[#allocation7 + $0x58] sm:$0xff] }
 0x7f4   : > { %v4463_v6 = vpack.c.bf16 %v4452_v61, %v4451_v11  ;;  %v4464_v57 = vpack.c.bf16 %v4454_v23, %v4453_v18  ;;  %v4455_v38 = vld [vmem:[#allocation7 + $0x60] sm:$0xff]  ;;  %v4456_v3 = vld [vmem:[#allocation7 + $0x68] sm:$0xff]  ;;  %v4457_v15 = vld [vmem:[#allocation7 + $0x70] sm:$0xff] }
 0x7f5   : > { %v4465_v50 = vpack.c.bf16 %v4456_v3, %v4455_v38  ;;  %v4458_v16 = vld [vmem:[#allocation7 + $0x78] sm:$0xff] }
 0x7f6   : > { %v4466_v49 = vpack.c.bf16 %v4458_v16, %v4457_v15 }
 0x803   : > { %4871 = vmatmul.msk.bf16.gmra.mxu3 %vm613_vm2, %v4460_v52 }
 0x813   : > { %4872 = vmatmul.msk.bf16.gmra.mxu3 %vm613_vm2, %v4461_v7 }
 0x823   : > { %4873 = vmatmul.msk.bf16.gmra.mxu3 %vm613_vm2, %v4462_v60 }
 0x833   : > { %4874 = vmatmul.msk.bf16.gmra.mxu3 %vm613_vm2, %v4463_v6 }
 0x843   : > { %4875 = vmatmul.msk.bf16.gmra.mxu3 %vm613_vm2, %v4464_v57 }
 0x853   : > { %4876 = vmatmul.msk.bf16.gmra.mxu3 %vm613_vm2, %v4465_v50 }
 0x863   : > { %4877 = vmatmul.msk.bf16.gmra.mxu3 %vm613_vm2, %v4466_v49 }
 0x876   : > { %v4517_v31 = vpop.f32.mrf.mxu3 }
 0x877   : > { %4557 = vst.msk [vmem:[%s5537_s29] sm:$0xff] %vm475_vm1, %v4517_v31 }
 0x87e   : > { %v4519_v42 = vpop.f32.mrf.mxu3 }
 0x87f   : > { %4558 = vst.msk [vmem:[%s5537_s29 + $0x8] sm:$0xff] %vm475_vm1, %v4519_v42 }
 0x886   : > { %v4522_v20 = vpop.f32.mrf.mxu3 }
 0x887   : > { %4559 = vst.msk [vmem:[%s5537_s29 + $0x10] sm:$0xff] %vm475_vm1, %v4522_v20 }
 0x88e   : > { %v4524_v24 = vpop.f32.mrf.mxu3 }
 0x88f   : > { %4560 = vst.msk [vmem:[%s5537_s29 + $0x18] sm:$0xff] %vm475_vm1, %v4524_v24 }
 0x896   : > { %v4527_v2 = vpop.f32.mrf.mxu3 }
 0x897   : > { %4561 = vst.msk [vmem:[%s5537_s29 + $0x20] sm:$0xff] %vm475_vm1, %v4527_v2 }
 0x89e   : > { %v4529_v48 = vpop.f32.mrf.mxu3 }
 0x89f   : > { %4562 = vst.msk [vmem:[%s5537_s29 + $0x28] sm:$0xff] %vm475_vm1, %v4529_v48 }
 0x8a6   : > { %v4532_v32 = vpop.f32.mrf.mxu3 }
 0x8a7   : > { %4563 = vst.msk [vmem:[%s5537_s29 + $0x30] sm:$0xff] %vm475_vm1, %v4532_v32 }
 0x8ae   : > { %v4534_v12 = vpop.f32.mrf.mxu3 }
 0x8af   : > { %4564 = vst.msk [vmem:[%s5537_s29 + $0x38] sm:$0xff] %vm475_vm1, %v4534_v12 }
 0x8b6   : > { %v4537_v27 = vpop.f32.mrf.mxu3 }
 0x8b7   : > { %4565 = vst.msk [vmem:[%s5537_s29 + $0x40] sm:$0xff] %vm475_vm1, %v4537_v27 }
 0x8be   : > { %v4539_v51 = vpop.f32.mrf.mxu3 }
 0x8bf   : > { %4566 = vst.msk [vmem:[%s5537_s29 + $0x48] sm:$0xff] %vm475_vm1, %v4539_v51 }
 0x8c6   : > { %v4542_v25 = vpop.f32.mrf.mxu3 }
 0x8c7   : > { %4567 = vst.msk [vmem:[%s5537_s29 + $0x50] sm:$0xff] %vm475_vm1, %v4542_v25 }
 0x8ce   : > { %v4544_v5 = vpop.f32.mrf.mxu3 }
 0x8cf   : > { %4568 = vst.msk [vmem:[%s5537_s29 + $0x58] sm:$0xff] %vm475_vm1, %v4544_v5 }
 0x8d6   : > { %v4547_v13 = vpop.f32.mrf.mxu3 }
 0x8d7   : > { %4569 = vst.msk [vmem:[%s5537_s29 + $0x60] sm:$0xff] %vm475_vm1, %v4547_v13 }
 0x8de   : > { %v4549_v9 = vpop.f32.mrf.mxu3 }
 0x8df   : > { %4570 = vst.msk [vmem:[%s5537_s29 + $0x68] sm:$0xff] %vm475_vm1, %v4549_v9 }
 0x8e6   : > { %v4552_v56 = vpop.f32.mrf.mxu3 }
 0x8e7   : > { %4571 = vst.msk [vmem:[%s5537_s29 + $0x70] sm:$0xff] %vm475_vm1, %v4552_v56 }
 0x8ee   : > { %v4554_v33 = vpop.f32.mrf.mxu3 }
 0x8ef   : > { %4572 = vst.msk [vmem:[%s5537_s29 + $0x78] sm:$0xff] %vm475_vm1, %v4554_v33 }
 0x8f0 PF: > { %s20_s17 = sadd.s32 1, %s5414_s17   ;;  %s7300_s13 = smov %s5406_s15 }
 0x8f1   : > { %p17_p10 = scmp.ge.s32.totalorder %s20_s17, 6   ;;  %s7301_s14 = smov %s5410_s16 }
 0x8f2   : > { %s7302_s15 = smov %s7305_s18  ;;  %s7303_s16 = smov %s7309_s19 }
 0x8f3   :  { %19 = sbr.rel (!%p17_p10) target bundleno = 3 (0x3), region = 151 }

</bundles_post_ra>
